<compile_context>
chip_gen: v7x
topology: tpu7x:2x2x1
jax: 0.10.0
libtpu: 0.0.40
codegen_flags: <defaults>
</compile_context>

<pallas_src>
import jax
import jax.numpy as jnp
import numpy as np
from jax.experimental import pallas as pl
from jax.experimental.pallas import tpu as pltpu

EPS = 1e-5
_MIN_DIRECT_C = 128   # use per-tap accumulating matmuls once the conv K >= this


def _tap_bounds(k, in_size, out_size, stride):
    """One tap of a 3-wide conv with pad=1: output o reads input stride*o + k - 1.
    Returns (lo, hi) valid output range, the input phase (index % stride) this
    tap reads, and the start index inside that phase."""
    lo = max(0, -((k - 1) // stride))
    hi = min(out_size, (in_size - k) // stride + 1)
    src0 = stride * lo + k - 1
    return lo, hi, src0 % stride, src0 // stride


def _make_resblock_kernel(*, H, W, Ho, Wo, Cin, Cout, stride, project,
                          direct1, direct2):
    taps_h1 = [_tap_bounds(k, H, Ho, stride) for k in range(3)]
    taps_w1 = [_tap_bounds(k, W, Wo, stride) for k in range(3)]
    taps_h2 = [_tap_bounds(k, Ho, Ho, 1) for k in range(3)]
    taps_w2 = [_tap_bounds(k, Wo, Wo, 1) for k in range(3)]
    K2 = 9 * Cout + (Cin if (project and not direct2) else 0)
    need_acc = direct1 or direct2

    def kernel(x_ref, w1_ref, sb1_ref, w2_ref, b2_ref, *rest):
        # x_ref  : (1, s*s, Hp//s, Wp//s, Cin) bf16 phase-split input
        # w1_ref : (9*Cin, Cout) or (9, Cin, Cout) bf16
        # sb1_ref: (2, Cout) f32 folded BN1 scale / bias
        # w2_ref : (K2, Cout) or (9, Cout, Cout) bf16 (BN2 [+BNi] folded in)
        # b2_ref : (1, Cout) f32 combined main-path (+identity) bias
        # wi_ref : (Cin, Cout) bf16, only when project and direct2
        # out_ref: (1, Cout, Ho*Wo) f32 (channel-major, lane-dense)
        rest = list(rest)
        wi_ref = rest.pop(0) if (project and direct2) else None
        out_ref, h_ref = rest.pop(0), rest.pop(0)
        acc_ref = rest.pop(0) if need_acc else None

        def x_src(p_r, p_c, r0, rr, c0, cc):            # bf16 (rr, cc, Cin)
            return x_ref[0, p_r * stride + p_c, r0:r0 + rr, c0:c0 + cc, :]

        def h_src(p_r, p_c, r0, rr, c0, cc):            # bf16 (rr, cc, Cout)
            return h_ref[r0:r0 + rr, c0:c0 + cc, :]

        def im2col_fill(col_ref, src_fn, taps_h, taps_w, C):
            """3x3 im2col into col_ref (Ho, Wo, 9*C [+Cin]); pad=1 zeros fused as
            the (<=1 wide) border strips each tap never writes."""
            for kh in range(3):
                lo_r, hi_r, p_r, pr0 = taps_h[kh]
                for kw in range(3):
                    lo_c, hi_c, p_c, pc0 = taps_w[kw]
                    ch = (kh * 3 + kw) * C
                    rr, cc = hi_r - lo_r, hi_c - lo_c
                    if rr <= 0 or cc <= 0:
                        col_ref[:, :, ch:ch + C] = jnp.zeros((Ho, Wo, C), jnp.bfloat16)
                        continue
                    if lo_r > 0:
                        col_ref[0:lo_r, :, ch:ch + C] = jnp.zeros((lo_r, Wo, C), jnp.bfloat16)
                    if hi_r < Ho:
                        col_ref[hi_r:Ho, :, ch:ch + C] = jnp.zeros((Ho - hi_r, Wo, C), jnp.bfloat16)
                    if lo_c > 0:
                        col_ref[lo_r:hi_r, 0:lo_c, ch:ch + C] = jnp.zeros((rr, lo_c, C), jnp.bfloat16)
                    if hi_c < Wo:
                        col_ref[lo_r:hi_r, hi_c:Wo, ch:ch + C] = jnp.zeros((rr, Wo - hi_c, C), jnp.bfloat16)
                    col_ref[lo_r:hi_r, lo_c:hi_c, ch:ch + C] = src_fn(p_r, p_c, pr0, rr, pc0, cc)

        def direct_conv(w_ref, src_fn, taps_h, taps_w, C):
            """9 accumulating MXU matmuls straight from ref-sliced windows (no
            im2col scratch) into acc_ref; used when conv K = C >= 128."""
            acc_ref[...] = jnp.zeros_like(acc_ref)
            for kh in range(3):
                lo_r, hi_r, p_r, pr0 = taps_h[kh]
                for kw in range(3):
                    lo_c, hi_c, p_c, pc0 = taps_w[kw]
                    rr, cc = hi_r - lo_r, hi_c - lo_c
                    if rr <= 0 or cc <= 0:
                        continue
                    xs = src_fn(p_r, p_c, pr0, rr, pc0, cc)
                    part = jnp.dot(xs.reshape(rr * cc, C), w_ref[kh * 3 + kw],
                                   preferred_element_type=jnp.float32)
                    acc_ref[lo_r:hi_r, lo_c:hi_c, :] += part.reshape(rr, cc, Cout)

        # ---------------- conv1: 3x3, stride s, pad 1, then BN1 + ReLU ----------------
        def finish_conv1(acc1):                               # (Ho*Wo, Cout) f32
            h = jnp.maximum(acc1 * sb1_ref[0:1, :] + sb1_ref[1:2, :], 0.0)
            h_ref[...] = h.reshape(Ho, Wo, Cout).astype(jnp.bfloat16)

        if direct1:
            direct_conv(w1_ref, x_src, taps_h1, taps_w1, Cin)
            finish_conv1(acc_ref[...].reshape(Ho * Wo, Cout))
        else:
            def conv1_body(col_ref):
                im2col_fill(col_ref, x_src, taps_h1, taps_w1, Cin)
                acc1 = jnp.dot(col_ref[...].reshape(Ho * Wo, 9 * Cin), w1_ref[...],
                               preferred_element_type=jnp.float32)
                finish_conv1(acc1)
            pl.run_scoped(conv1_body, pltpu.VMEM((Ho, Wo, 9 * Cin), jnp.bfloat16))

        # -- conv2: 3x3, stride 1, pad 1 (BN2 folded in weights) + fused 1x1 identity,
        #    then residual add + ReLU, stored channel-major / lane-dense. --
        def finish(acc2):                                     # (Ho*Wo, Cout) f32
            main = acc2 + b2_ref[0:1, :]
            if not project:                                   # pure pass-through residual
                main = main + x_ref[0, 0].astype(jnp.float32).reshape(Ho * Wo, Cout)
            out = jnp.maximum(main, 0.0)
            out_ref[...] = out.T.reshape(1, Cout, Ho * Wo)    # lanes = Ho*Wo (dense)

        if direct2:
            direct_conv(w2_ref, h_src, taps_h2, taps_w2, Cout)
            if project:                                       # 1x1 identity as a 10th matmul
                acc_ref[...] += jnp.dot(
                    x_ref[0, 0].reshape(Ho * Wo, Cin), wi_ref[...],
                    preferred_element_type=jnp.float32).reshape(Ho, Wo, Cout)
            finish(acc_ref[...].reshape(Ho * Wo, Cout))
        else:
            def conv2_body(col_ref):
                im2col_fill(col_ref, h_src, taps_h2, taps_w2, Cout)
                if project:                                   # identity fused along K
                    col_ref[:, :, 9 * Cout:] = x_ref[0, 0]
                acc2 = jnp.dot(col_ref[...].reshape(Ho * Wo, K2), w2_ref[...],
                               preferred_element_type=jnp.float32)
                finish(acc2)
            pl.run_scoped(conv2_body, pltpu.VMEM((Ho, Wo, K2), jnp.bfloat16))

    return kernel


def resblock_pallas(x_nchw, params, *, in_dim, dim, stride=1):
    """Fused ResBlock forward. x_nchw: (N, Cin, H, W) f32 -> (N, Cout, Ho, Wo) f32."""
    N, Cin, H, W = x_nchw.shape
    assert Cin == in_dim
    s = stride
    Ho, Wo = (H - 1) // s + 1, (W - 1) // s + 1
    Cout = dim
    project = (s != 1) or (in_dim != dim)
    direct1 = Cin >= _MIN_DIRECT_C          # conv1 K = Cin
    direct2 = Cout >= _MIN_DIRECT_C         # conv2 K = Cout

    # Single fused input layout pass: NCHW -> bf16 NHWC, padded to a stride
    # multiple and phase-split so the kernel only needs unit-stride ref slices.
    x = jnp.transpose(x_nchw, (0, 2, 3, 1)).astype(jnp.bfloat16)
    Hp, Wp = -(-H // s) * s, -(-W // s) * s
    if (Hp, Wp) != (H, W):
        x = jnp.pad(x, ((0, 0), (0, Hp - H), (0, Wp - W), (0, 0)))
    Hs, Ws = Hp // s, Wp // s
    x5 = x.reshape(N, Hs, s, Ws, s, Cin).transpose(0, 2, 4, 1, 3, 5)
    x5 = x5.reshape(N, s * s, Hs, Ws, Cin)

    # Inference BatchNorm -> per-channel scale / bias (f32).
    def fold(gamma, beta, mean, var, conv_bias):
        scale = gamma / jnp.sqrt(var + EPS)
        return scale, (conv_bias - mean) * scale + beta

    s1, b1 = fold(params['g1'], params['be1'], params['m1'], params['v1'], params['b1'])
    s2, b2 = fold(params['g2'], params['be2'], params['m2'], params['v2'], params['b2'])
    sb1 = jnp.stack([s1, b1]).astype(jnp.float32)                  # (2, Cout)

    # BN2 / BNi scales folded into the conv2 / projection weights (fold in f32,
    # then a single bf16 cast) so conv2 + the 1x1 identity become one matmul.
    w2s = params['w2'] * s2[None, None, None, :]                   # (3,3,Cout,Cout) f32
    bias_main = b2
    wi_flat = None
    if project:
        si, bi = fold(params['gi'], params['bei'], params['mi'], params['vi'], 0.0)
        wi_flat = params['wi'][0, 0] * si[None, :]                 # (Cin, Cout) f32
        bias_main = bias_main + bi
    bias_main = bias_main.reshape(1, Cout).astype(jnp.float32)

    if direct1:
        w1p = params['w1'].astype(jnp.bfloat16).reshape(9, Cin, Cout)
    else:
        w1p = params['w1'].astype(jnp.bfloat16).reshape(9 * Cin, Cout)

    if direct2:
        w2p = w2s.astype(jnp.bfloat16).reshape(9, Cout, Cout)
    else:
        w2flat = w2s.reshape(9 * Cout, Cout)
        if project:
            w2flat = jnp.concatenate([w2flat, wi_flat], axis=0)    # K = 9*Cout + Cin
        w2p = w2flat.astype(jnp.bfloat16)

    def const_spec(shape):
        rank = len(shape)
        return pl.BlockSpec(shape, lambda n: (0,) * rank)

    args = [x5, w1p, sb1, w2p, bias_main]
    in_specs = [
        pl.BlockSpec((1, s * s, Hs, Ws, Cin), lambda n: (n, 0, 0, 0, 0)),
        const_spec(w1p.shape),
        const_spec((2, Cout)),
        const_spec(w2p.shape),
        const_spec((1, Cout)),
    ]
    if project and direct2:
        args.append(wi_flat.astype(jnp.bfloat16))
        in_specs.append(const_spec((Cin, Cout)))

    scratch = [pltpu.VMEM((Ho, Wo, Cout), jnp.bfloat16)]           # h (post BN1+ReLU)
    if direct1 or direct2:
        scratch.append(pltpu.VMEM((Ho, Wo, Cout), jnp.float32))    # direct-path accumulator

    kernel = _make_resblock_kernel(H=H, W=W, Ho=Ho, Wo=Wo, Cin=Cin, Cout=Cout,
                                   stride=s, project=project,
                                   direct1=direct1, direct2=direct2)
    out = pl.pallas_call(
        kernel,
        out_shape=jax.ShapeDtypeStruct((N, Cout, Ho * Wo), jnp.float32),
        grid_spec=pltpu.PrefetchScalarGridSpec(
            num_scalar_prefetch=0,
            grid=(N,),
            in_specs=in_specs,
            out_specs=pl.BlockSpec((1, Cout, Ho * Wo), lambda n: (n, 0, 0)),
            scratch_shapes=scratch,
        ),
        compiler_params=pltpu.CompilerParams(
            dimension_semantics=("parallel",),
            # <= ~48 MiB leaves headroom inside v7x's 64 MiB physical VMEM.
            vmem_limit_bytes=48 * 1024 * 1024),
    )(*args)

    # Channel-major lane-dense output -> NCHW is a free (metadata) reshape.
    return out.reshape(N, Cout, Ho, Wo)


# ------------------------- pure-JAX references (for checking) -------------------------
def resblock_ref(x_nchw, params, *, in_dim, dim, stride, compute_dtype=jnp.float32):
    """Reference. compute_dtype=bf16 mirrors the kernel's precision model exactly
    (bf16 matmul inputs, BN2/BNi folded into bf16 weights, f32 accumulation);
    compute_dtype=f32 is the exact original module."""
    dn = ('NHWC', 'HWIO', 'NHWC')
    cd = compute_dtype
    project = (stride != 1) or (in_dim != dim)
    x = jnp.transpose(x_nchw, (0, 2, 3, 1)).astype(jnp.float32)

    def conv(v, w, s, pad):
        return jax.lax.conv_general_dilated(
            v.astype(cd), w.astype(cd), (s, s), pad, dimension_numbers=dn,
            preferred_element_type=jnp.float32)

    def fold(g, be, m, var, cb):
        sc = g / jnp.sqrt(var + EPS)
        return sc, (cb - m) * sc + be

    s1, b1 = fold(params['g1'], params['be1'], params['m1'], params['v1'], params['b1'])
    s2, b2 = fold(params['g2'], params['be2'], params['m2'], params['v2'], params['b2'])

    h = conv(x, params['w1'], stride, [(1, 1), (1, 1)])
    h = jnp.maximum(h * s1 + b1, 0.0)
    main = conv(h, params['w2'] * s2[None, None, None, :], 1, [(1, 1), (1, 1)]) + b2
    if project:
        si, bi = fold(params['gi'], params['bei'], params['mi'], params['vi'], 0.0)
        iden = conv(x, params['wi'] * si[None, None, None, :], stride,
                    [(0, 0), (0, 0)]) + bi
    else:
        iden = x.astype(cd).astype(jnp.float32)
    out = jnp.maximum(main + iden, 0.0)
    return jnp.transpose(out, (0, 3, 1, 2))


def make_params(key, in_dim, dim):
    ks = jax.random.split(key, 16)
    n, u = jax.random.normal, jax.random.uniform
    f3a = 1.0 / np.sqrt(9 * in_dim)
    f3b = 1.0 / np.sqrt(9 * dim)
    f1 = 1.0 / np.sqrt(in_dim)
    return {
        'w1': f3a * n(ks[0], (3, 3, in_dim, dim), jnp.float32),
        'b1': 0.1 * n(ks[1], (dim,), jnp.float32),
        'g1': 1.0 + 0.1 * n(ks[2], (dim,), jnp.float32),
        'be1': 0.1 * n(ks[3], (dim,), jnp.float32),
        'm1': 0.1 * n(ks[4], (dim,), jnp.float32),
        'v1': 0.5 + u(ks[5], (dim,), jnp.float32),
        'w2': f3b * n(ks[6], (3, 3, dim, dim), jnp.float32),
        'b2': 0.1 * n(ks[7], (dim,), jnp.float32),
        'g2': 1.0 + 0.1 * n(ks[8], (dim,), jnp.float32),
        'be2': 0.1 * n(ks[9], (dim,), jnp.float32),
        'm2': 0.1 * n(ks[10], (dim,), jnp.float32),
        'v2': 0.5 + u(ks[11], (dim,), jnp.float32),
        'wi': f1 * n(ks[12], (1, 1, in_dim, dim), jnp.float32),
        'gi': 1.0 + 0.1 * n(ks[13], (dim,), jnp.float32),
        'bei': 0.1 * n(ks[14], (dim,), jnp.float32),
        'mi': 0.1 * n(ks[15], (dim,), jnp.float32),
        'vi': 0.5 + u(ks[0], (dim,), jnp.float32),
    }


if __name__ == "__main__":
    key = jax.random.PRNGKey(0)
    configs = [
        dict(N=2, in_dim=4, dim=8, H=16, W=16, stride=1),     # projection (im2col, fused 1x1)
        dict(N=2, in_dim=8, dim=8, H=16, W=16, stride=1),     # pure pass-through residual
        dict(N=2, in_dim=8, dim=16, H=16, W=16, stride=2),    # stride-2 projection (phase split)
        dict(N=1, in_dim=128, dim=128, H=8, W=8, stride=1),   # direct per-tap matmul path
        dict(N=1, in_dim=64, dim=128, H=9, W=10, stride=2),   # mixed paths, odd H, stride 2
    ]
    for cfg in configs:
        key, kx, kp = jax.random.split(key, 3)
        x = jax.random.normal(kx, (cfg['N'], cfg['in_dim'], cfg['H'], cfg['W']),
                              jnp.float32)                    # NCHW, like PyTorch
        params = make_params(kp, cfg['in_dim'], cfg['dim'])

        out = jax.block_until_ready(
            resblock_pallas(x, params, in_dim=cfg['in_dim'], dim=cfg['dim'],
                            stride=cfg['stride']))

        # precision-matched (bf16 inputs / folded bf16 weights, f32 acc): tight
        ref_bf16 = jax.block_until_ready(
            resblock_ref(x, params, in_dim=cfg['in_dim'], dim=cfg['dim'],
                         stride=cfg['stride'], compute_dtype=jnp.bfloat16))
        np.testing.assert_allclose(np.asarray(out), np.asarray(ref_bf16),
                                   rtol=1e-3, atol=1e-3)

        # full-f32 module reference: loose tolerance accounts for bf16 MXU inputs
        ref_f32 = jax.block_until_ready(
            resblock_ref(x, params, in_dim=cfg['in_dim'], dim=cfg['dim'],
                         stride=cfg['stride'], compute_dtype=jnp.float32))
        np.testing.assert_allclose(np.asarray(out), np.asarray(ref_f32),
                                   rtol=5e-2, atol=7e-2)

    print("KERNEL_OK")
</pallas_src>

<mosaic_0001>
module attributes {stable_mosaic.version = 11 : i64} {
  func.func @kernel(%arg0: i32, %arg1: memref<1x1x16x16x4xbf16, #tpu.memory_space<vmem>>, %arg2: memref<36x8xbf16, #tpu.memory_space<vmem>>, %arg3: memref<2x8xf32, #tpu.memory_space<vmem>>, %arg4: memref<76x8xbf16, #tpu.memory_space<vmem>>, %arg5: memref<1x8xf32, #tpu.memory_space<vmem>>, %arg6: memref<1x8x256xf32, #tpu.memory_space<vmem>>, %arg7: memref<16x16x8xbf16, #tpu.memory_space<vmem>>) attributes {dimension_semantics = [#tpu.dimension_semantics<parallel>], iteration_bounds = array<i64: 2>, scalar_prefetch = 0 : i64, scratch_operands = 1 : i64, tpu.core_type = #tpu.core_type<tc>, window_params = [{transform_indices = @transform_0, window_bounds = array<i64: 1, 1, 16, 16, 4>}, {pipeline_mode = #tpu.pipeline_mode<synchronous>, transform_indices = @transform_1, window_bounds = array<i64: 36, 8>}, {pipeline_mode = #tpu.pipeline_mode<synchronous>, transform_indices = @transform_2, window_bounds = array<i64: 2, 8>}, {pipeline_mode = #tpu.pipeline_mode<synchronous>, transform_indices = @transform_3, window_bounds = array<i64: 76, 8>}, {pipeline_mode = #tpu.pipeline_mode<synchronous>, transform_indices = @transform_4, window_bounds = array<i64: 1, 8>}, {transform_indices = @transform_5, window_bounds = array<i64: 1, 8, 256>}]} {
    "tpu.region"() ({
      %alloca = memref.alloca() : memref<16x16x36xbf16, #tpu.memory_space<vmem>>
      %cst = arith.constant 0.000000e+00 : bf16
      %0 = vector.broadcast %cst : bf16 to vector<1x16x4xbf16>
      %c0 = arith.constant 0 : index
      %c0_0 = arith.constant 0 : index
      %c0_1 = arith.constant 0 : index
      %1 = vector.load %alloca[%c0, %c0_0, %c0_1] : memref<16x16x36xbf16, #tpu.memory_space<vmem>>, vector<1x16x4xbf16>
      tpu.vector_store %alloca[%c0, %c0_0, %c0_1], %0 {strides = array<i32>} : memref<16x16x36xbf16, #tpu.memory_space<vmem>>, vector<1x16x4xbf16>,
      %cst_2 = arith.constant 0.000000e+00 : bf16
      %2 = vector.broadcast %cst_2 : bf16 to vector<15x1x4xbf16>
      %c1 = arith.constant 1 : index
      %c0_3 = arith.constant 0 : index
      %c0_4 = arith.constant 0 : index
      %3 = vector.load %alloca[%c1, %c0_3, %c0_4] : memref<16x16x36xbf16, #tpu.memory_space<vmem>>, vector<15x1x4xbf16>
      tpu.vector_store %alloca[%c1, %c0_3, %c0_4], %2 {strides = array<i32>} : memref<16x16x36xbf16, #tpu.memory_space<vmem>>, vector<15x1x4xbf16>,
      %c0_5 = arith.constant 0 : index
      %c0_6 = arith.constant 0 : index
      %c0_7 = arith.constant 0 : index
      %c0_8 = arith.constant 0 : index
      %c0_9 = arith.constant 0 : index
      %4 = vector.load %arg1[%c0_5, %c0_6, %c0_7, %c0_8, %c0_9] : memref<1x1x16x16x4xbf16, #tpu.memory_space<vmem>>, vector<1x1x15x15x4xbf16>
      %5 = vector.shape_cast %4 : vector<1x1x15x15x4xbf16> to vector<15x15x4xbf16>
      %c1_10 = arith.constant 1 : index
      %c1_11 = arith.constant 1 : index
      %c0_12 = arith.constant 0 : index
      %6 = vector.load %alloca[%c1_10, %c1_11, %c0_12] : memref<16x16x36xbf16, #tpu.memory_space<vmem>>, vector<15x15x4xbf16>
      tpu.vector_store %alloca[%c1_10, %c1_11, %c0_12], %5 {strides = array<i32>} : memref<16x16x36xbf16, #tpu.memory_space<vmem>>, vector<15x15x4xbf16>,
      %cst_13 = arith.constant 0.000000e+00 : bf16
      %7 = vector.broadcast %cst_13 : bf16 to vector<1x16x4xbf16>
      %c0_14 = arith.constant 0 : index
      %c0_15 = arith.constant 0 : index
      %c4 = arith.constant 4 : index
      %8 = vector.load %alloca[%c0_14, %c0_15, %c4] : memref<16x16x36xbf16, #tpu.memory_space<vmem>>, vector<1x16x4xbf16>
      tpu.vector_store %alloca[%c0_14, %c0_15, %c4], %7 {strides = array<i32>} : memref<16x16x36xbf16, #tpu.memory_space<vmem>>, vector<1x16x4xbf16>,
      %c0_16 = arith.constant 0 : index
      %c0_17 = arith.constant 0 : index
      %c0_18 = arith.constant 0 : index
      %c0_19 = arith.constant 0 : index
      %c0_20 = arith.constant 0 : index
      %9 = vector.load %arg1[%c0_16, %c0_17, %c0_18, %c0_19, %c0_20] : memref<1x1x16x16x4xbf16, #tpu.memory_space<vmem>>, vector<1x1x15x16x4xbf16>
      %10 = vector.shape_cast %9 : vector<1x1x15x16x4xbf16> to vector<15x16x4xbf16>
      %c1_21 = arith.constant 1 : index
      %c0_22 = arith.constant 0 : index
      %c4_23 = arith.constant 4 : index
      %11 = vector.load %alloca[%c1_21, %c0_22, %c4_23] : memref<16x16x36xbf16, #tpu.memory_space<vmem>>, vector<15x16x4xbf16>
      tpu.vector_store %alloca[%c1_21, %c0_22, %c4_23], %10 {strides = array<i32>} : memref<16x16x36xbf16, #tpu.memory_space<vmem>>, vector<15x16x4xbf16>,
      %cst_24 = arith.constant 0.000000e+00 : bf16
      %12 = vector.broadcast %cst_24 : bf16 to vector<1x16x4xbf16>
      %c0_25 = arith.constant 0 : index
      %c0_26 = arith.constant 0 : index
      %c8 = arith.constant 8 : index
      %13 = vector.load %alloca[%c0_25, %c0_26, %c8] : memref<16x16x36xbf16, #tpu.memory_space<vmem>>, vector<1x16x4xbf16>
      tpu.vector_store %alloca[%c0_25, %c0_26, %c8], %12 {strides = array<i32>} : memref<16x16x36xbf16, #tpu.memory_space<vmem>>, vector<1x16x4xbf16>,
      %cst_27 = arith.constant 0.000000e+00 : bf16
      %14 = vector.broadcast %cst_27 : bf16 to vector<15x1x4xbf16>
      %c1_28 = arith.constant 1 : index
      %c15 = arith.constant 15 : index
      %c8_29 = arith.constant 8 : index
      %15 = vector.load %alloca[%c1_28, %c15, %c8_29] : memref<16x16x36xbf16, #tpu.memory_space<vmem>>, vector<15x1x4xbf16>
      tpu.vector_store %alloca[%c1_28, %c15, %c8_29], %14 {strides = array<i32>} : memref<16x16x36xbf16, #tpu.memory_space<vmem>>, vector<15x1x4xbf16>,
      %c0_30 = arith.constant 0 : index
      %c0_31 = arith.constant 0 : index
      %c0_32 = arith.constant 0 : index
      %c1_33 = arith.constant 1 : index
      %c0_34 = arith.constant 0 : index
      %16 = vector.load %arg1[%c0_30, %c0_31, %c0_32, %c1_33, %c0_34] : memref<1x1x16x16x4xbf16, #tpu.memory_space<vmem>>, vector<1x1x15x15x4xbf16>
      %17 = vector.shape_cast %16 : vector<1x1x15x15x4xbf16> to vector<15x15x4xbf16>
      %c1_35 = arith.constant 1 : index
      %c0_36 = arith.constant 0 : index
      %c8_37 = arith.constant 8 : index
      %18 = vector.load %alloca[%c1_35, %c0_36, %c8_37] : memref<16x16x36xbf16, #tpu.memory_space<vmem>>, vector<15x15x4xbf16>
      tpu.vector_store %alloca[%c1_35, %c0_36, %c8_37], %17 {strides = array<i32>} : memref<16x16x36xbf16, #tpu.memory_space<vmem>>, vector<15x15x4xbf16>,
      %cst_38 = arith.constant 0.000000e+00 : bf16
      %19 = vector.broadcast %cst_38 : bf16 to vector<16x1x4xbf16>
      %c0_39 = arith.constant 0 : index
      %c0_40 = arith.constant 0 : index
      %c12 = arith.constant 12 : index
      %20 = vector.load %alloca[%c0_39, %c0_40, %c12] : memref<16x16x36xbf16, #tpu.memory_space<vmem>>, vector<16x1x4xbf16>
      tpu.vector_store %alloca[%c0_39, %c0_40, %c12], %19 {strides = array<i32>} : memref<16x16x36xbf16, #tpu.memory_space<vmem>>, vector<16x1x4xbf16>,
      %c0_41 = arith.constant 0 : index
      %c0_42 = arith.constant 0 : index
      %c0_43 = arith.constant 0 : index
      %c0_44 = arith.constant 0 : index
      %c0_45 = arith.constant 0 : index
      %21 = vector.load %arg1[%c0_41, %c0_42, %c0_43, %c0_44, %c0_45] : memref<1x1x16x16x4xbf16, #tpu.memory_space<vmem>>, vector<1x1x16x15x4xbf16>
      %22 = vector.shape_cast %21 : vector<1x1x16x15x4xbf16> to vector<16x15x4xbf16>
      %c0_46 = arith.constant 0 : index
      %c1_47 = arith.constant 1 : index
      %c12_48 = arith.constant 12 : index
      %23 = vector.load %alloca[%c0_46, %c1_47, %c12_48] : memref<16x16x36xbf16, #tpu.memory_space<vmem>>, vector<16x15x4xbf16>
      tpu.vector_store %alloca[%c0_46, %c1_47, %c12_48], %22 {strides = array<i32>} : memref<16x16x36xbf16, #tpu.memory_space<vmem>>, vector<16x15x4xbf16>,
      %c0_49 = arith.constant 0 : index
      %c0_50 = arith.constant 0 : index
      %c0_51 = arith.constant 0 : index
      %c0_52 = arith.constant 0 : index
      %c0_53 = arith.constant 0 : index
      %24 = vector.load %arg1[%c0_49, %c0_50, %c0_51, %c0_52, %c0_53] : memref<1x1x16x16x4xbf16, #tpu.memory_space<vmem>>, vector<1x1x16x16x4xbf16>
      %25 = vector.shape_cast %24 : vector<1x1x16x16x4xbf16> to vector<16x16x4xbf16>
      %c0_54 = arith.constant 0 : index
      %c0_55 = arith.constant 0 : index
      %c16 = arith.constant 16 : index
      %26 = vector.load %alloca[%c0_54, %c0_55, %c16] : memref<16x16x36xbf16, #tpu.memory_space<vmem>>, vector<16x16x4xbf16>
      tpu.vector_store %alloca[%c0_54, %c0_55, %c16], %25 {strides = array<i32>} : memref<16x16x36xbf16, #tpu.memory_space<vmem>>, vector<16x16x4xbf16>,
      %cst_56 = arith.constant 0.000000e+00 : bf16
      %27 = vector.broadcast %cst_56 : bf16 to vector<16x1x4xbf16>
      %c0_57 = arith.constant 0 : index
      %c15_58 = arith.constant 15 : index
      %c20 = arith.constant 20 : index
      %28 = vector.load %alloca[%c0_57, %c15_58, %c20] : memref<16x16x36xbf16, #tpu.memory_space<vmem>>, vector<16x1x4xbf16>
      tpu.vector_store %alloca[%c0_57, %c15_58, %c20], %27 {strides = array<i32>} : memref<16x16x36xbf16, #tpu.memory_space<vmem>>, vector<16x1x4xbf16>,
      %c0_59 = arith.constant 0 : index
      %c0_60 = arith.constant 0 : index
      %c0_61 = arith.constant 0 : index
      %c1_62 = arith.constant 1 : index
      %c0_63 = arith.constant 0 : index
      %29 = vector.load %arg1[%c0_59, %c0_60, %c0_61, %c1_62, %c0_63] : memref<1x1x16x16x4xbf16, #tpu.memory_space<vmem>>, vector<1x1x16x15x4xbf16>
      %30 = vector.shape_cast %29 : vector<1x1x16x15x4xbf16> to vector<16x15x4xbf16>
      %c0_64 = arith.constant 0 : index
      %c0_65 = arith.constant 0 : index
      %c20_66 = arith.constant 20 : index
      %31 = vector.load %alloca[%c0_64, %c0_65, %c20_66] : memref<16x16x36xbf16, #tpu.memory_space<vmem>>, vector<16x15x4xbf16>
      tpu.vector_store %alloca[%c0_64, %c0_65, %c20_66], %30 {strides = array<i32>} : memref<16x16x36xbf16, #tpu.memory_space<vmem>>, vector<16x15x4xbf16>,
      %cst_67 = arith.constant 0.000000e+00 : bf16
      %32 = vector.broadcast %cst_67 : bf16 to vector<1x16x4xbf16>
      %c15_68 = arith.constant 15 : index
      %c0_69 = arith.constant 0 : index
      %c24 = arith.constant 24 : index
      %33 = vector.load %alloca[%c15_68, %c0_69, %c24] : memref<16x16x36xbf16, #tpu.memory_space<vmem>>, vector<1x16x4xbf16>
      tpu.vector_store %alloca[%c15_68, %c0_69, %c24], %32 {strides = array<i32>} : memref<16x16x36xbf16, #tpu.memory_space<vmem>>, vector<1x16x4xbf16>,
      %cst_70 = arith.constant 0.000000e+00 : bf16
      %34 = vector.broadcast %cst_70 : bf16 to vector<15x1x4xbf16>
      %c0_71 = arith.constant 0 : index
      %c0_72 = arith.constant 0 : index
      %c24_73 = arith.constant 24 : index
      %35 = vector.load %alloca[%c0_71, %c0_72, %c24_73] : memref<16x16x36xbf16, #tpu.memory_space<vmem>>, vector<15x1x4xbf16>
      tpu.vector_store %alloca[%c0_71, %c0_72, %c24_73], %34 {strides = array<i32>} : memref<16x16x36xbf16, #tpu.memory_space<vmem>>, vector<15x1x4xbf16>,
      %c0_74 = arith.constant 0 : index
      %c0_75 = arith.constant 0 : index
      %c1_76 = arith.constant 1 : index
      %c0_77 = arith.constant 0 : index
      %c0_78 = arith.constant 0 : index
      %36 = vector.load %arg1[%c0_74, %c0_75, %c1_76, %c0_77, %c0_78] : memref<1x1x16x16x4xbf16, #tpu.memory_space<vmem>>, vector<1x1x15x15x4xbf16>
      %37 = vector.shape_cast %36 : vector<1x1x15x15x4xbf16> to vector<15x15x4xbf16>
      %c0_79 = arith.constant 0 : index
      %c1_80 = arith.constant 1 : index
      %c24_81 = arith.constant 24 : index
      %38 = vector.load %alloca[%c0_79, %c1_80, %c24_81] : memref<16x16x36xbf16, #tpu.memory_space<vmem>>, vector<15x15x4xbf16>
      tpu.vector_store %alloca[%c0_79, %c1_80, %c24_81], %37 {strides = array<i32>} : memref<16x16x36xbf16, #tpu.memory_space<vmem>>, vector<15x15x4xbf16>,
      %cst_82 = arith.constant 0.000000e+00 : bf16
      %39 = vector.broadcast %cst_82 : bf16 to vector<1x16x4xbf16>
      %c15_83 = arith.constant 15 : index
      %c0_84 = arith.constant 0 : index
      %c28 = arith.constant 28 : index
      %40 = vector.load %alloca[%c15_83, %c0_84, %c28] : memref<16x16x36xbf16, #tpu.memory_space<vmem>>, vector<1x16x4xbf16>
      tpu.vector_store %alloca[%c15_83, %c0_84, %c28], %39 {strides = array<i32>} : memref<16x16x36xbf16, #tpu.memory_space<vmem>>, vector<1x16x4xbf16>,
      %c0_85 = arith.constant 0 : index
      %c0_86 = arith.constant 0 : index
      %c1_87 = arith.constant 1 : index
      %c0_88 = arith.constant 0 : index
      %c0_89 = arith.constant 0 : index
      %41 = vector.load %arg1[%c0_85, %c0_86, %c1_87, %c0_88, %c0_89] : memref<1x1x16x16x4xbf16, #tpu.memory_space<vmem>>, vector<1x1x15x16x4xbf16>
      %42 = vector.shape_cast %41 : vector<1x1x15x16x4xbf16> to vector<15x16x4xbf16>
      %c0_90 = arith.constant 0 : index
      %c0_91 = arith.constant 0 : index
      %c28_92 = arith.constant 28 : index
      %43 = vector.load %alloca[%c0_90, %c0_91, %c28_92] : memref<16x16x36xbf16, #tpu.memory_space<vmem>>, vector<15x16x4xbf16>
      tpu.vector_store %alloca[%c0_90, %c0_91, %c28_92], %42 {strides = array<i32>} : memref<16x16x36xbf16, #tpu.memory_space<vmem>>, vector<15x16x4xbf16>,
      %cst_93 = arith.constant 0.000000e+00 : bf16
      %44 = vector.broadcast %cst_93 : bf16 to vector<1x16x4xbf16>
      %c15_94 = arith.constant 15 : index
      %c0_95 = arith.constant 0 : index
      %c32 = arith.constant 32 : index
      %45 = vector.load %alloca[%c15_94, %c0_95, %c32] : memref<16x16x36xbf16, #tpu.memory_space<vmem>>, vector<1x16x4xbf16>
      tpu.vector_store %alloca[%c15_94, %c0_95, %c32], %44 {strides = array<i32>} : memref<16x16x36xbf16, #tpu.memory_space<vmem>>, vector<1x16x4xbf16>,
      %cst_96 = arith.constant 0.000000e+00 : bf16
      %46 = vector.broadcast %cst_96 : bf16 to vector<15x1x4xbf16>
      %c0_97 = arith.constant 0 : index
      %c15_98 = arith.constant 15 : index
      %c32_99 = arith.constant 32 : index
      %47 = vector.load %alloca[%c0_97, %c15_98, %c32_99] : memref<16x16x36xbf16, #tpu.memory_space<vmem>>, vector<15x1x4xbf16>
      tpu.vector_store %alloca[%c0_97, %c15_98, %c32_99], %46 {strides = array<i32>} : memref<16x16x36xbf16, #tpu.memory_space<vmem>>, vector<15x1x4xbf16>,
      %c0_100 = arith.constant 0 : index
      %c0_101 = arith.constant 0 : index
      %c1_102 = arith.constant 1 : index
      %c1_103 = arith.constant 1 : index
      %c0_104 = arith.constant 0 : index
      %48 = vector.load %arg1[%c0_100, %c0_101, %c1_102, %c1_103, %c0_104] : memref<1x1x16x16x4xbf16, #tpu.memory_space<vmem>>, vector<1x1x15x15x4xbf16>
      %49 = vector.shape_cast %48 : vector<1x1x15x15x4xbf16> to vector<15x15x4xbf16>
      %c0_105 = arith.constant 0 : index
      %c0_106 = arith.constant 0 : index
      %c32_107 = arith.constant 32 : index
      %50 = vector.load %alloca[%c0_105, %c0_106, %c32_107] : memref<16x16x36xbf16, #tpu.memory_space<vmem>>, vector<15x15x4xbf16>
      tpu.vector_store %alloca[%c0_105, %c0_106, %c32_107], %49 {strides = array<i32>} : memref<16x16x36xbf16, #tpu.memory_space<vmem>>, vector<15x15x4xbf16>,
      %c0_108 = arith.constant 0 : index
      %c0_109 = arith.constant 0 : index
      %c0_110 = arith.constant 0 : index
      %51 = vector.load %alloca[%c0_108, %c0_109, %c0_110] : memref<16x16x36xbf16, #tpu.memory_space<vmem>>, vector<16x16x36xbf16>
      %52 = vector.shape_cast %51 : vector<16x16x36xbf16> to vector<256x36xbf16>
      %c0_111 = arith.constant 0 : index
      %c0_112 = arith.constant 0 : index
      %53 = vector.load %arg2[%c0_111, %c0_112] : memref<36x8xbf16, #tpu.memory_space<vmem>>, vector<36x8xbf16>
      %cst_113 = arith.constant dense<0.000000e+00> : vector<256x8xf32>
      %54 = tpu.matmul %52, %53, %cst_113 {dimension_numbers = #tpu.dot_dimension_numbers<[1], [0], [0], [1], [0, 0, 1, 1], [], []>} : vector<256x36xbf16>, vector<36x8xbf16>, vector<256x8xf32> -> vector<256x8xf32>
      %c0_114 = arith.constant 0 : index
      %c0_115 = arith.constant 0 : index
      %55 = vector.load %arg3[%c0_114, %c0_115] : memref<2x8xf32, #tpu.memory_space<vmem>>, vector<1x8xf32>
      %56 = vector.broadcast %55 : vector<1x8xf32> to vector<256x8xf32>
      %57 = arith.mulf %54, %56 : vector<256x8xf32>
      %c1_116 = arith.constant 1 : index
      %c0_117 = arith.constant 0 : index
      %58 = vector.load %arg3[%c1_116, %c0_117] : memref<2x8xf32, #tpu.memory_space<vmem>>, vector<1x8xf32>
      %59 = vector.broadcast %58 : vector<1x8xf32> to vector<256x8xf32>
      %60 = arith.addf %57, %59 : vector<256x8xf32>
      %cst_118 = arith.constant 0.000000e+00 : f32
      %61 = vector.broadcast %cst_118 : f32 to vector<256x8xf32>
      %62 = arith.maximumf %60, %61 : vector<256x8xf32>
      %63 = vector.shape_cast %62 : vector<256x8xf32> to vector<16x16x8xf32>
      %64 = arith.truncf %63 : vector<16x16x8xf32> to vector<16x16x8xbf16>
      %c0_119 = arith.constant 0 : index
      %c0_120 = arith.constant 0 : index
      %c0_121 = arith.constant 0 : index
      %65 = vector.load %arg7[%c0_119, %c0_120, %c0_121] : memref<16x16x8xbf16, #tpu.memory_space<vmem>>, vector<16x16x8xbf16>
      tpu.vector_store %arg7[%c0_119, %c0_120, %c0_121], %64 {strides = array<i32>} : memref<16x16x8xbf16, #tpu.memory_space<vmem>>, vector<16x16x8xbf16>,
      tpu.yield
    }) : () -> ()
    "tpu.region"() ({
      %alloca = memref.alloca() : memref<16x16x76xbf16, #tpu.memory_space<vmem>>
      %cst = arith.constant 0.000000e+00 : bf16
      %0 = vector.broadcast %cst : bf16 to vector<1x16x8xbf16>
      %c0 = arith.constant 0 : index
      %c0_0 = arith.constant 0 : index
      %c0_1 = arith.constant 0 : index
      %1 = vector.load %alloca[%c0, %c0_0, %c0_1] : memref<16x16x76xbf16, #tpu.memory_space<vmem>>, vector<1x16x8xbf16>
      tpu.vector_store %alloca[%c0, %c0_0, %c0_1], %0 {strides = array<i32>} : memref<16x16x76xbf16, #tpu.memory_space<vmem>>, vector<1x16x8xbf16>,
      %cst_2 = arith.constant 0.000000e+00 : bf16
      %2 = vector.broadcast %cst_2 : bf16 to vector<15x1x8xbf16>
      %c1 = arith.constant 1 : index
      %c0_3 = arith.constant 0 : index
      %c0_4 = arith.constant 0 : index
      %3 = vector.load %alloca[%c1, %c0_3, %c0_4] : memref<16x16x76xbf16, #tpu.memory_space<vmem>>, vector<15x1x8xbf16>
      tpu.vector_store %alloca[%c1, %c0_3, %c0_4], %2 {strides = array<i32>} : memref<16x16x76xbf16, #tpu.memory_space<vmem>>, vector<15x1x8xbf16>,
      %c0_5 = arith.constant 0 : index
      %c0_6 = arith.constant 0 : index
      %c0_7 = arith.constant 0 : index
      %4 = vector.load %arg7[%c0_5, %c0_6, %c0_7] : memref<16x16x8xbf16, #tpu.memory_space<vmem>>, vector<15x15x8xbf16>
      %c1_8 = arith.constant 1 : index
      %c1_9 = arith.constant 1 : index
      %c0_10 = arith.constant 0 : index
      %5 = vector.load %alloca[%c1_8, %c1_9, %c0_10] : memref<16x16x76xbf16, #tpu.memory_space<vmem>>, vector<15x15x8xbf16>
      tpu.vector_store %alloca[%c1_8, %c1_9, %c0_10], %4 {strides = array<i32>} : memref<16x16x76xbf16, #tpu.memory_space<vmem>>, vector<15x15x8xbf16>,
      %cst_11 = arith.constant 0.000000e+00 : bf16
      %6 = vector.broadcast %cst_11 : bf16 to vector<1x16x8xbf16>
      %c0_12 = arith.constant 0 : index
      %c0_13 = arith.constant 0 : index
      %c8 = arith.constant 8 : index
      %7 = vector.load %alloca[%c0_12, %c0_13, %c8] : memref<16x16x76xbf16, #tpu.memory_space<vmem>>, vector<1x16x8xbf16>
      tpu.vector_store %alloca[%c0_12, %c0_13, %c8], %6 {strides = array<i32>} : memref<16x16x76xbf16, #tpu.memory_space<vmem>>, vector<1x16x8xbf16>,
      %c0_14 = arith.constant 0 : index
      %c0_15 = arith.constant 0 : index
      %c0_16 = arith.constant 0 : index
      %8 = vector.load %arg7[%c0_14, %c0_15, %c0_16] : memref<16x16x8xbf16, #tpu.memory_space<vmem>>, vector<15x16x8xbf16>
      %c1_17 = arith.constant 1 : index
      %c0_18 = arith.constant 0 : index
      %c8_19 = arith.constant 8 : index
      %9 = vector.load %alloca[%c1_17, %c0_18, %c8_19] : memref<16x16x76xbf16, #tpu.memory_space<vmem>>, vector<15x16x8xbf16>
      tpu.vector_store %alloca[%c1_17, %c0_18, %c8_19], %8 {strides = array<i32>} : memref<16x16x76xbf16, #tpu.memory_space<vmem>>, vector<15x16x8xbf16>,
      %cst_20 = arith.constant 0.000000e+00 : bf16
      %10 = vector.broadcast %cst_20 : bf16 to vector<1x16x8xbf16>
      %c0_21 = arith.constant 0 : index
      %c0_22 = arith.constant 0 : index
      %c16 = arith.constant 16 : index
      %11 = vector.load %alloca[%c0_21, %c0_22, %c16] : memref<16x16x76xbf16, #tpu.memory_space<vmem>>, vector<1x16x8xbf16>
      tpu.vector_store %alloca[%c0_21, %c0_22, %c16], %10 {strides = array<i32>} : memref<16x16x76xbf16, #tpu.memory_space<vmem>>, vector<1x16x8xbf16>,
      %cst_23 = arith.constant 0.000000e+00 : bf16
      %12 = vector.broadcast %cst_23 : bf16 to vector<15x1x8xbf16>
      %c1_24 = arith.constant 1 : index
      %c15 = arith.constant 15 : index
      %c16_25 = arith.constant 16 : index
      %13 = vector.load %alloca[%c1_24, %c15, %c16_25] : memref<16x16x76xbf16, #tpu.memory_space<vmem>>, vector<15x1x8xbf16>
      tpu.vector_store %alloca[%c1_24, %c15, %c16_25], %12 {strides = array<i32>} : memref<16x16x76xbf16, #tpu.memory_space<vmem>>, vector<15x1x8xbf16>,
      %c0_26 = arith.constant 0 : index
      %c1_27 = arith.constant 1 : index
      %c0_28 = arith.constant 0 : index
      %14 = vector.load %arg7[%c0_26, %c1_27, %c0_28] : memref<16x16x8xbf16, #tpu.memory_space<vmem>>, vector<15x15x8xbf16>
      %c1_29 = arith.constant 1 : index
      %c0_30 = arith.constant 0 : index
      %c16_31 = arith.constant 16 : index
      %15 = vector.load %alloca[%c1_29, %c0_30, %c16_31] : memref<16x16x76xbf16, #tpu.memory_space<vmem>>, vector<15x15x8xbf16>
      tpu.vector_store %alloca[%c1_29, %c0_30, %c16_31], %14 {strides = array<i32>} : memref<16x16x76xbf16, #tpu.memory_space<vmem>>, vector<15x15x8xbf16>,
      %cst_32 = arith.constant 0.000000e+00 : bf16
      %16 = vector.broadcast %cst_32 : bf16 to vector<16x1x8xbf16>
      %c0_33 = arith.constant 0 : index
      %c0_34 = arith.constant 0 : index
      %c24 = arith.constant 24 : index
      %17 = vector.load %alloca[%c0_33, %c0_34, %c24] : memref<16x16x76xbf16, #tpu.memory_space<vmem>>, vector<16x1x8xbf16>
      tpu.vector_store %alloca[%c0_33, %c0_34, %c24], %16 {strides = array<i32>} : memref<16x16x76xbf16, #tpu.memory_space<vmem>>, vector<16x1x8xbf16>,
      %c0_35 = arith.constant 0 : index
      %c0_36 = arith.constant 0 : index
      %c0_37 = arith.constant 0 : index
      %18 = vector.load %arg7[%c0_35, %c0_36, %c0_37] : memref<16x16x8xbf16, #tpu.memory_space<vmem>>, vector<16x15x8xbf16>
      %c0_38 = arith.constant 0 : index
      %c1_39 = arith.constant 1 : index
      %c24_40 = arith.constant 24 : index
      %19 = vector.load %alloca[%c0_38, %c1_39, %c24_40] : memref<16x16x76xbf16, #tpu.memory_space<vmem>>, vector<16x15x8xbf16>
      tpu.vector_store %alloca[%c0_38, %c1_39, %c24_40], %18 {strides = array<i32>} : memref<16x16x76xbf16, #tpu.memory_space<vmem>>, vector<16x15x8xbf16>,
      %c0_41 = arith.constant 0 : index
      %c0_42 = arith.constant 0 : index
      %c0_43 = arith.constant 0 : index
      %20 = vector.load %arg7[%c0_41, %c0_42, %c0_43] : memref<16x16x8xbf16, #tpu.memory_space<vmem>>, vector<16x16x8xbf16>
      %c0_44 = arith.constant 0 : index
      %c0_45 = arith.constant 0 : index
      %c32 = arith.constant 32 : index
      %21 = vector.load %alloca[%c0_44, %c0_45, %c32] : memref<16x16x76xbf16, #tpu.memory_space<vmem>>, vector<16x16x8xbf16>
      tpu.vector_store %alloca[%c0_44, %c0_45, %c32], %20 {strides = array<i32>} : memref<16x16x76xbf16, #tpu.memory_space<vmem>>, vector<16x16x8xbf16>,
      %cst_46 = arith.constant 0.000000e+00 : bf16
      %22 = vector.broadcast %cst_46 : bf16 to vector<16x1x8xbf16>
      %c0_47 = arith.constant 0 : index
      %c15_48 = arith.constant 15 : index
      %c40 = arith.constant 40 : index
      %23 = vector.load %alloca[%c0_47, %c15_48, %c40] : memref<16x16x76xbf16, #tpu.memory_space<vmem>>, vector<16x1x8xbf16>
      tpu.vector_store %alloca[%c0_47, %c15_48, %c40], %22 {strides = array<i32>} : memref<16x16x76xbf16, #tpu.memory_space<vmem>>, vector<16x1x8xbf16>,
      %c0_49 = arith.constant 0 : index
      %c1_50 = arith.constant 1 : index
      %c0_51 = arith.constant 0 : index
      %24 = vector.load %arg7[%c0_49, %c1_50, %c0_51] : memref<16x16x8xbf16, #tpu.memory_space<vmem>>, vector<16x15x8xbf16>
      %c0_52 = arith.constant 0 : index
      %c0_53 = arith.constant 0 : index
      %c40_54 = arith.constant 40 : index
      %25 = vector.load %alloca[%c0_52, %c0_53, %c40_54] : memref<16x16x76xbf16, #tpu.memory_space<vmem>>, vector<16x15x8xbf16>
      tpu.vector_store %alloca[%c0_52, %c0_53, %c40_54], %24 {strides = array<i32>} : memref<16x16x76xbf16, #tpu.memory_space<vmem>>, vector<16x15x8xbf16>,
      %cst_55 = arith.constant 0.000000e+00 : bf16
      %26 = vector.broadcast %cst_55 : bf16 to vector<1x16x8xbf16>
      %c15_56 = arith.constant 15 : index
      %c0_57 = arith.constant 0 : index
      %c48 = arith.constant 48 : index
      %27 = vector.load %alloca[%c15_56, %c0_57, %c48] : memref<16x16x76xbf16, #tpu.memory_space<vmem>>, vector<1x16x8xbf16>
      tpu.vector_store %alloca[%c15_56, %c0_57, %c48], %26 {strides = array<i32>} : memref<16x16x76xbf16, #tpu.memory_space<vmem>>, vector<1x16x8xbf16>,
      %cst_58 = arith.constant 0.000000e+00 : bf16
      %28 = vector.broadcast %cst_58 : bf16 to vector<15x1x8xbf16>
      %c0_59 = arith.constant 0 : index
      %c0_60 = arith.constant 0 : index
      %c48_61 = arith.constant 48 : index
      %29 = vector.load %alloca[%c0_59, %c0_60, %c48_61] : memref<16x16x76xbf16, #tpu.memory_space<vmem>>, vector<15x1x8xbf16>
      tpu.vector_store %alloca[%c0_59, %c0_60, %c48_61], %28 {strides = array<i32>} : memref<16x16x76xbf16, #tpu.memory_space<vmem>>, vector<15x1x8xbf16>,
      %c1_62 = arith.constant 1 : index
      %c0_63 = arith.constant 0 : index
      %c0_64 = arith.constant 0 : index
      %30 = vector.load %arg7[%c1_62, %c0_63, %c0_64] : memref<16x16x8xbf16, #tpu.memory_space<vmem>>, vector<15x15x8xbf16>
      %c0_65 = arith.constant 0 : index
      %c1_66 = arith.constant 1 : index
      %c48_67 = arith.constant 48 : index
      %31 = vector.load %alloca[%c0_65, %c1_66, %c48_67] : memref<16x16x76xbf16, #tpu.memory_space<vmem>>, vector<15x15x8xbf16>
      tpu.vector_store %alloca[%c0_65, %c1_66, %c48_67], %30 {strides = array<i32>} : memref<16x16x76xbf16, #tpu.memory_space<vmem>>, vector<15x15x8xbf16>,
      %cst_68 = arith.constant 0.000000e+00 : bf16
      %32 = vector.broadcast %cst_68 : bf16 to vector<1x16x8xbf16>
      %c15_69 = arith.constant 15 : index
      %c0_70 = arith.constant 0 : index
      %c56 = arith.constant 56 : index
      %33 = vector.load %alloca[%c15_69, %c0_70, %c56] : memref<16x16x76xbf16, #tpu.memory_space<vmem>>, vector<1x16x8xbf16>
      tpu.vector_store %alloca[%c15_69, %c0_70, %c56], %32 {strides = array<i32>} : memref<16x16x76xbf16, #tpu.memory_space<vmem>>, vector<1x16x8xbf16>,
      %c1_71 = arith.constant 1 : index
      %c0_72 = arith.constant 0 : index
      %c0_73 = arith.constant 0 : index
      %34 = vector.load %arg7[%c1_71, %c0_72, %c0_73] : memref<16x16x8xbf16, #tpu.memory_space<vmem>>, vector<15x16x8xbf16>
      %c0_74 = arith.constant 0 : index
      %c0_75 = arith.constant 0 : index
      %c56_76 = arith.constant 56 : index
      %35 = vector.load %alloca[%c0_74, %c0_75, %c56_76] : memref<16x16x76xbf16, #tpu.memory_space<vmem>>, vector<15x16x8xbf16>
      tpu.vector_store %alloca[%c0_74, %c0_75, %c56_76], %34 {strides = array<i32>} : memref<16x16x76xbf16, #tpu.memory_space<vmem>>, vector<15x16x8xbf16>,
      %cst_77 = arith.constant 0.000000e+00 : bf16
      %36 = vector.broadcast %cst_77 : bf16 to vector<1x16x8xbf16>
      %c15_78 = arith.constant 15 : index
      %c0_79 = arith.constant 0 : index
      %c64 = arith.constant 64 : index
      %37 = vector.load %alloca[%c15_78, %c0_79, %c64] : memref<16x16x76xbf16, #tpu.memory_space<vmem>>, vector<1x16x8xbf16>
      tpu.vector_store %alloca[%c15_78, %c0_79, %c64], %36 {strides = array<i32>} : memref<16x16x76xbf16, #tpu.memory_space<vmem>>, vector<1x16x8xbf16>,
      %cst_80 = arith.constant 0.000000e+00 : bf16
      %38 = vector.broadcast %cst_80 : bf16 to vector<15x1x8xbf16>
      %c0_81 = arith.constant 0 : index
      %c15_82 = arith.constant 15 : index
      %c64_83 = arith.constant 64 : index
      %39 = vector.load %alloca[%c0_81, %c15_82, %c64_83] : memref<16x16x76xbf16, #tpu.memory_space<vmem>>, vector<15x1x8xbf16>
      tpu.vector_store %alloca[%c0_81, %c15_82, %c64_83], %38 {strides = array<i32>} : memref<16x16x76xbf16, #tpu.memory_space<vmem>>, vector<15x1x8xbf16>,
      %c1_84 = arith.constant 1 : index
      %c1_85 = arith.constant 1 : index
      %c0_86 = arith.constant 0 : index
      %40 = vector.load %arg7[%c1_84, %c1_85, %c0_86] : memref<16x16x8xbf16, #tpu.memory_space<vmem>>, vector<15x15x8xbf16>
      %c0_87 = arith.constant 0 : index
      %c0_88 = arith.constant 0 : index
      %c64_89 = arith.constant 64 : index
      %41 = vector.load %alloca[%c0_87, %c0_88, %c64_89] : memref<16x16x76xbf16, #tpu.memory_space<vmem>>, vector<15x15x8xbf16>
      tpu.vector_store %alloca[%c0_87, %c0_88, %c64_89], %40 {strides = array<i32>} : memref<16x16x76xbf16, #tpu.memory_space<vmem>>, vector<15x15x8xbf16>,
      %c0_90 = arith.constant 0 : index
      %c0_91 = arith.constant 0 : index
      %c0_92 = arith.constant 0 : index
      %c0_93 = arith.constant 0 : index
      %c0_94 = arith.constant 0 : index
      %42 = vector.load %arg1[%c0_90, %c0_91, %c0_92, %c0_93, %c0_94] : memref<1x1x16x16x4xbf16, #tpu.memory_space<vmem>>, vector<1x1x16x16x4xbf16>
      %43 = vector.shape_cast %42 : vector<1x1x16x16x4xbf16> to vector<16x16x4xbf16>
      %c0_95 = arith.constant 0 : index
      %c0_96 = arith.constant 0 : index
      %c72 = arith.constant 72 : index
      %44 = vector.load %alloca[%c0_95, %c0_96, %c72] : memref<16x16x76xbf16, #tpu.memory_space<vmem>>, vector<16x16x4xbf16>
      tpu.vector_store %alloca[%c0_95, %c0_96, %c72], %43 {strides = array<i32>} : memref<16x16x76xbf16, #tpu.memory_space<vmem>>, vector<16x16x4xbf16>,
      %c0_97 = arith.constant 0 : index
      %c0_98 = arith.constant 0 : index
      %c0_99 = arith.constant 0 : index
      %45 = vector.load %alloca[%c0_97, %c0_98, %c0_99] : memref<16x16x76xbf16, #tpu.memory_space<vmem>>, vector<16x16x76xbf16>
      %46 = vector.shape_cast %45 : vector<16x16x76xbf16> to vector<256x76xbf16>
      %c0_100 = arith.constant 0 : index
      %c0_101 = arith.constant 0 : index
      %47 = vector.load %arg4[%c0_100, %c0_101] : memref<76x8xbf16, #tpu.memory_space<vmem>>, vector<76x8xbf16>
      %cst_102 = arith.constant dense<0.000000e+00> : vector<256x8xf32>
      %48 = tpu.matmul %46, %47, %cst_102 {dimension_numbers = #tpu.dot_dimension_numbers<[1], [0], [0], [1], [0, 0, 1, 1], [], []>} : vector<256x76xbf16>, vector<76x8xbf16>, vector<256x8xf32> -> vector<256x8xf32>
      %c0_103 = arith.constant 0 : index
      %c0_104 = arith.constant 0 : index
      %49 = vector.load %arg5[%c0_103, %c0_104] : memref<1x8xf32, #tpu.memory_space<vmem>>, vector<1x8xf32>
      %50 = vector.broadcast %49 : vector<1x8xf32> to vector<256x8xf32>
      %51 = arith.addf %48, %50 : vector<256x8xf32>
      %cst_105 = arith.constant 0.000000e+00 : f32
      %52 = vector.broadcast %cst_105 : f32 to vector<256x8xf32>
      %53 = arith.maximumf %51, %52 : vector<256x8xf32>
      %54 = tpu.transpose %53, [1, 0] : vector<256x8xf32> -> vector<8x256xf32>
      %55 = vector.shape_cast %54 : vector<8x256xf32> to vector<1x8x256xf32>
      %c0_106 = arith.constant 0 : index
      %c0_107 = arith.constant 0 : index
      %c0_108 = arith.constant 0 : index
      %56 = vector.load %arg6[%c0_106, %c0_107, %c0_108] : memref<1x8x256xf32, #tpu.memory_space<vmem>>, vector<1x8x256xf32>
      tpu.vector_store %arg6[%c0_106, %c0_107, %c0_108], %55 {strides = array<i32>} : memref<1x8x256xf32, #tpu.memory_space<vmem>>, vector<1x8x256xf32>,
      tpu.yield
    }) : () -> ()
    return
  }
  func.func @transform_0(%arg0: i32) -> (i32, i32, i32, i32, i32) {
    %c0_i32 = arith.constant 0 : i32
    %c0_i32_0 = arith.constant 0 : i32
    %c0_i32_1 = arith.constant 0 : i32
    %c0_i32_2 = arith.constant 0 : i32
    %c0_i32_3 = arith.constant 0 : i32
    return %arg0, %c0_i32, %c0_i32_0, %c0_i32_1, %c0_i32_2 : i32, i32, i32, i32, i32
  }
  func.func @transform_1(%arg0: i32) -> (i32, i32) {
    %c0_i32 = arith.constant 0 : i32
    %c0_i32_0 = arith.constant 0 : i32
    %c0_i32_1 = arith.constant 0 : i32
    return %c0_i32, %c0_i32_0 : i32, i32
  }
  func.func @transform_2(%arg0: i32) -> (i32, i32) {
    %c0_i32 = arith.constant 0 : i32
    %c0_i32_0 = arith.constant 0 : i32
    %c0_i32_1 = arith.constant 0 : i32
    return %c0_i32, %c0_i32_0 : i32, i32
  }
  func.func @transform_3(%arg0: i32) -> (i32, i32) {
    %c0_i32 = arith.constant 0 : i32
    %c0_i32_0 = arith.constant 0 : i32
    %c0_i32_1 = arith.constant 0 : i32
    return %c0_i32, %c0_i32_0 : i32, i32
  }
  func.func @transform_4(%arg0: i32) -> (i32, i32) {
    %c0_i32 = arith.constant 0 : i32
    %c0_i32_0 = arith.constant 0 : i32
    %c0_i32_1 = arith.constant 0 : i32
    return %c0_i32, %c0_i32_0 : i32, i32
  }
  func.func @transform_5(%arg0: i32) -> (i32, i32, i32) {
    %c0_i32 = arith.constant 0 : i32
    %c0_i32_0 = arith.constant 0 : i32
    %c0_i32_1 = arith.constant 0 : i32
    return %arg0, %c0_i32, %c0_i32_0 : i32, i32, i32
  }
}

</mosaic_0001>

<bundles_post_ra>
// kernel: tpu_custom_call.1
= control target key start
LH: loop header
LB: loop body
LE: loop exit
PB: predicated region body
PF: predicated region fallthrough
CT: control target
= control target key end

     0   :  { %10 = vsyncpa [#allocation4], 0  ;;  %s8822_s0 = inlined_call_operand.vmem [shape: bf16[2,1,16,16,4], index: 0, kind: input, shape index: {}]   ;;  %s8823_s1 = inlined_call_operand.vmem [shape: bf16[36,8], index: 1, kind: input, shape index: {}]   ;;  %s8824_s2 = inlined_call_operand.vmem [shape: f32[2,8], index: 2, kind: input, shape index: {}]   ;;  %s8825_s3 = inlined_call_operand.vmem [shape: bf16[76,8], index: 3, kind: input, shape index: {}]   ;;  %s8826_s4 = inlined_call_operand.vmem [shape: f32[1,8], index: 4, kind: input, shape index: {}]   ;;  %s8827_s5 = inlined_call_operand.hbm [shape: f32[2,8,256], index: 5, kind: output, shape index: {}]  }
   0x1   :  { %12 = vsyncpa [#allocation4 + $0x1], 0  ;;  %s6488_s18 = smov 0   ;;  %s6490_s19 = smov 0  }
   0x2   :  { %s6492_s20 = smov 0   ;;  %s6494_s21 = smov 0  }
   0x3 LB: > { %s6509_s22 = sadd.s32 4294967295, %s6436_s21   ;;  %s5728_s23 = sadd.s32 4294967294, %s6436_s21   ;;  %s6436_s21 = sphi %s6494_s21, %s8893_s21   ;;  %s6432_s20 = sphi %s6492_s20, %s8892_s20   ;;  %s6428_s19 = sphi %s6490_s19, %s8891_s19   ;;  %s6424_s18 = sphi %s6488_s18, %s8890_s18  }
   0x4   : > { %s6513_s24 = sadd.s32 1, %s6436_s21   ;;  %s135_s25 = sadd.s32 1, %s6432_s20 }
   0x5   : > { %s132_s26 = ssub.s32 %s6436_s21, %s6513_s24  ;;  %p145_p0 = scmp.ne.s32.totalorder %s6432_s20, %s6428_s19 }
   0x6   : > { %p133_p1 = scmp.eq.s32.totalorder %s132_s26, 0  ;;  %p146_p2 = scmp.eq.s32.totalorder %s6509_s22, 1 }
   0x7   : > { %p151_p3 = scmp.ne.s32.totalorder %s6428_s19, %s6424_s18  ;;  %p152_p4 = scmp.eq.s32.totalorder %s5728_s23, 1 }
   0x8   : > { %s6524_s27 = scalar_select %p133_p1, %s6432_s20, %s135_s25  }
   0x9   : > { %p6526_p5 = por %p146_p2, %p145_p0  ;;  %p6530_p6 = por %p152_p4, %p151_p3 }
   0xa   : > { %p5731_p7 = scmp.ge.s32.totalorder %s6436_s21, 1  ;;  %p190_p8 = scmp.lt.s32.totalorder %s6436_s21, 3 }
   0xc   : > { %p191_p9 = pnand %p5731_p7, %p190_p8 }
   0xd   : > { %s215_s30 = sand.u32 (!%p191_p9), 1, %s6428_s19   ;;  %p218_p10 = scmp.lt.s32.totalorder (!%p191_p9), %s6509_s22, 1 }
   0xe   : > { %194 = sbr.rel (%p191_p9) target bundleno = 1350 (0x546), region = 40  ;;  %s5732_s6 = sshll.u32 (!%p191_p9), %s215_s30, 4 }
   0xf   : > { %s6546_s12 = scalar_lea.vmem (!%p191_p9), [#allocation3], %s5732_s6 }
  0x15   : > { %s219_s7 = scalar_select %p218_p10, %s6509_s22, 1 }
  0x17   : > { %s6027_s8 = sshll.u32 %s219_s7, 7 }
  0x18   : > { %s6544_s11 = scalar_lea.vmem %s8822_s0, %s6027_s8 }
  0x19   : > { %v6209_v0 = vld [vmem:[%s6544_s11 + $0x10] sm:$0xff]   ;;  %v6210_v1 = vld [vmem:[%s6544_s11] sm:$0xff]   ;;  %s6438_s13 = smov 4   ;;  %v6211_v2 = vld [vmem:[%s6544_s11 + $0x18] sm:$0xff]   ;;  %s6439_s14 = smov 8   ;;  %vm224_vm0 = vcmask 31744  }
  0x1a   : > { %659 = vrot.lane.b32.xlu1 %v6209_v0, %s6438_s13  ;;  %655 = vrot.lane.b32.xlu0 %v6210_v1, %s6438_s13  ;;  %v6212_v3 = vld [vmem:[%s6544_s11 + $0x8] sm:$0xff]   ;;  %v6213_v4 = vld [vmem:[%s6544_s11] sm:$0xff]   ;;  %vm548_vm1 = vcmask 64544   ;;  %vm715_vm2 = vcmask 97344   ;;  %s6440_s15 = smov 12   ;;  %v6441_v52 = vmov 0  }
  0x1b   : > { %v871_v5 = vshrl.u32 %v6213_v4, 16  ;;  %v873_v6 = vshll.u32 %v6213_v4, 16  ;;  %v6214_v7 = vld [vmem:[%s6544_s11 + $0x20] sm:$0xff]   ;;  %v6217_v9 = vld [vmem:[%s6544_s11 + $0x10] sm:$0xff]   ;;  %v6218_v11 = vld [vmem:[%s6544_s11 + $0x8] sm:$0xff]   ;;  %225 = vst.msk [vmem:[#allocation5] sm:$0xff] %vm224_vm0, %v6441_v52 }
  0x1c   : > { %v6215_v12 = vld [vmem:[%s6544_s11 + $0x30] sm:$0xff]   ;;  %v6216_v13 = vld [vmem:[%s6544_s11 + $0x28] sm:$0xff]   ;;  %v885_v14 = vshrl.u32 %v6217_v9, 16  ;;  %v887_v15 = vshll.u32 %v6217_v9, 16  ;;  %v878_v16 = vshrl.u32 %v6218_v11, 16  ;;  %v880_v17 = vshll.u32 %v6218_v11, 16 }
  0x1d   : > { %v875_v8 = vrot.slane %v873_v6, 1  ;;  %v6221_v19 = vld [vmem:[%s6544_s11 + $0x20] sm:$0xff]   ;;  %v6222_v21 = vld [vmem:[%s6544_s11 + $0x18] sm:$0xff]   ;;  %v6223_v27 = vld [vmem:[%s6544_s11 + $0x8] sm:$0xff]   ;;  %549 = vst.msk [vmem:[#allocation5] sm:$0xff] %vm548_vm1, %v6441_v52  ;;  %s6442_s16 = smov 16  }
  0x1e   : > { %661 = vrot.lane.b32.xlu1 %v6211_v2, %s6438_s13  ;;  %657 = vrot.lane.b32.xlu0 %v6212_v3, %s6438_s13  ;;  %v889_v18 = vrot.slane %v887_v15, 1  ;;  %v882_v20 = vrot.slane %v880_v17, 1  ;;  %v901_v22 = vshll.u32 %v6221_v19, 16  ;;  %v6224_v23 = vld [vmem:[%s6544_s11] sm:$0xff]   ;;  %v894_v26 = vshll.u32 %v6222_v21, 16  ;;  %v6220_v29 = vld [vmem:[%s6544_s11 + $0x38] sm:$0xff]  }
  0x1f   : > { %v876_v10 = vor.u32 %v875_v8, %v871_v5  ;;  %v6219_v28 = vld [vmem:[%s6544_s11 + $0x40] sm:$0xff]   ;;  %v899_v30 = vshrl.u32 %v6221_v19, 16  ;;  %v892_v31 = vshrl.u32 %v6222_v21, 16  ;;  %v1231_v33 = vshrl.u32 %v6224_v23, 16  ;;  %v6230_v42 = vld [vmem:[%s6544_s11 + $0x28] sm:$0xff]   ;;  %v6229_v45 = vld [vmem:[%s6544_s11 + $0x30] sm:$0xff]  }
  0x20   : > { %v890_v24 = vor.u32 %v889_v18, %v885_v14  ;;  %v883_v25 = vor.u32 %v882_v20, %v878_v16  ;;  %v896_v32 = vrot.slane %v894_v26, 1  ;;  %v903_v34 = vrot.slane %v901_v22, 1  ;;  %v6226_v46 = vld [vmem:[%s6544_s11] sm:$0xff]   ;;  %v6225_v47 = vld [vmem:[%s6544_s11 + $0x8] sm:$0xff]   ;;  %v6232_v49 = vld [vmem:[%s6544_s11 + $0x10] sm:$0xff]   ;;  %716 = vst.msk [vmem:[#allocation5] sm:$0xff] %vm715_vm2, %v6441_v52 }
  0x21   : > { %v1238_v35 = vshrl.u32 %v6223_v27, 16  ;;  %v1233_v37 = vrot.slane %v1231_v33, 7  ;;  %v1234_v38 = vshll.u32 %v6224_v23, 16  ;;  %v1241_v41 = vshll.u32 %v6223_v27, 16  ;;  %v6231_v51 = vld [vmem:[%s6544_s11 + $0x18] sm:$0xff]   ;;  %v6228_v53 = vld [vmem:[%s6544_s11 + $0x48] sm:$0xff]  }
  0x22   : > { %663 = vrot.lane.b32.xlu0 %v6214_v7, %s6438_s13  ;;  %975 = vrot.lane.b32.xlu1 %v876_v10, %s6439_s14  ;;  %v897_v36 = vor.u32 %v896_v32, %v892_v31  ;;  %v904_v39 = vor.u32 %v903_v34, %v899_v30  ;;  %v908_v48 = vshll.u32 %v6230_v42, 16  ;;  %v915_v50 = vshll.u32 %v6229_v45, 16  ;;  %v6227_v57 = vld [vmem:[%s6544_s11 + $0x50] sm:$0xff]   ;;  %v6238_v4 = vld [vmem:[%s6544_s11 + $0x38] sm:$0xff]   ;;  %s6443_s17 = smov 20   ;;  %s6444_s23 = smov 24  }
  0x23   : > { %v1240_v40 = vrot.slane %v1238_v35, 7  ;;  %v1236_v43 = vor.u32 %v1234_v38, %v1233_v37  ;;  %v906_v54 = vshrl.u32 %v6230_v42, 16  ;;  %v1245_v56 = vshrl.u32 %v6232_v49, 16  ;;  %v6237_v6 = vld [vmem:[%s6544_s11 + $0x40] sm:$0xff]   ;;  %v6233_v7 = vld [vmem:[%s6544_s11 + $0x18] sm:$0xff]   ;;  %v6234_v8 = vld [vmem:[%s6544_s11 + $0x10] sm:$0xff]  }
  0x24   : > { %v910_v55 = vrot.slane %v908_v48, 1  ;;  %v913_v58 = vshrl.u32 %v6229_v45, 16  ;;  %v917_v59 = vrot.slane %v915_v50, 1  ;;  %v1252_v60 = vshrl.u32 %v6231_v51, 16  ;;  %v6240_v10 = vld [vmem:[%s6544_s11 + $0x20] sm:$0xff]   ;;  %v6619_v32 = vld [vmem:[%s6544_s11 + $0x30] sm:$0xff]  }
  0x25   : > { %v1243_v44 = vor.u32 %v1241_v41, %v1240_v40  ;;  %v1247_v62 = vrot.slane %v1245_v56, 7  ;;  %v1248_v63 = vshll.u32 %v6232_v49, 16  ;;  %v1255_v2 = vshll.u32 %v6231_v51, 16  ;;  %v6235_v17 = vld [vmem:[%s6544_s11 + $0x60] sm:$0xff]   ;;  %v6248_v35 = vld [vmem:[%s6544_s11 + $0x50] sm:$0xff]   ;;  %v6639_v56 = vld [vmem:[%s6544_s11 + $0x58] sm:$0xff]  }
  0x26   : > { %665 = vrot.lane.b32.xlu0 %v6216_v13, %s6438_s13  ;;  %667 = vrot.lane.b32.xlu1 %v6215_v12, %s6438_s13  ;;  %v911_v61 = vor.u32 %v910_v55, %v906_v54  ;;  %v918_v0 = vor.u32 %v917_v59, %v913_v58  ;;  %v1254_v1 = vrot.slane %v1252_v60, 7  ;;  %v922_v9 = vshll.u32 %v6238_v4, 16  ;;  %v6239_v12 = vld [vmem:[%s6544_s11 + $0x28] sm:$0xff]   ;;  %v6236_v13 = vld [vmem:[%s6544_s11 + $0x58] sm:$0xff]   ;;  %s6445_s25 = smov 28   ;;  %s6446_s26 = smov 32  }
  0x27   : > { %v1250_v3 = vor.u32 %v1248_v63, %v1247_v62  ;;  %v929_v11 = vshll.u32 %v6237_v6, 16  ;;  %v920_v14 = vshrl.u32 %v6238_v4, 16  ;;  %v1259_v16 = vshrl.u32 %v6240_v10, 16  ;;  %v6628_v40 = vld [vmem:[%s6544_s11 + $0x10] sm:$0xff]   ;;  %v6246_v63 = vld [vmem:[%s6544_s11 + $0x68] sm:$0xff]   ;;  %v6325_v4 = vld [vmem:[%s6544_s11 + $0x58] sm:$0xff]  }
  0x28   : > { %v1257_v5 = vor.u32 %v1255_v2, %v1254_v1  ;;  %v924_v15 = vrot.slane %v922_v9, 1  ;;  %v927_v18 = vshrl.u32 %v6237_v6, 16  ;;  %v1266_v20 = vshrl.u32 %v6239_v12, 16  ;;  %v6267_v62 = vld [vmem:[%s6544_s11 + $0x10] sm:$0xff]   ;;  %v230_v6 = vld [vmem:[#allocation5 + $0x8] sm:$0x1] }
  0x29   : > { %v931_v19 = vrot.slane %v929_v11, 1  ;;  %v1262_v21 = vshll.u32 %v6240_v10, 16  ;;  %v1261_v23 = vrot.slane %v1259_v16, 7  ;;  %v1269_v27 = vshll.u32 %v6239_v12, 16  ;;  %v6667_v16 = vld [vmem:[%s6544_s11 + $0x40] sm:$0xff]  }
  0x2a   : > { %977 = vrot.lane.b32.xlu0 %v883_v25, %s6439_s14  ;;  %979 = vrot.lane.b32.xlu1 %v890_v24, %s6439_s14  ;;  %v925_v22 = vor.u32 %v924_v15, %v920_v14  ;;  %v6244_v24 = vld [vmem:[%s6544_s11] sm:$0xff]   ;;  %v1268_v26 = vrot.slane %v1266_v20, 7  ;;  %v1273_v42 = vshrl.u32 %v6619_v32, 16  ;;  %vm227_vm3 = vcmask 24576  }
  0x2b   : > { %v932_v25 = vor.u32 %v931_v19, %v927_v18  ;;  %v1264_v30 = vor.u32 %v1262_v21, %v1261_v23  ;;  %v1782_v31 = vshll.u32 %v6244_v24, 16  ;;  %v1780_v37 = vshrl.u32 %v6244_v24, 16  ;;  %v6672_v21 = vld [vmem:[%s6544_s11 + $0x60] sm:$0xff]  }
  0x2c   : > { %v1271_v33 = vor.u32 %v1269_v27, %v1268_v26  ;;  %v1796_v50 = vshll.u32 %v6628_v40, 16  ;;  %v1276_v54 = vshll.u32 %v6619_v32, 16  ;;  %v941_v55 = vshrl.u32 %v6248_v35, 16  ;;  %v6271_v27 = vld [vmem:[%s6544_s11 + $0x18] sm:$0xff]  }
  0x2d   : > { %v1784_v41 = vrot.slane %v1782_v31, 1  ;;  %v1794_v60 = vshrl.u32 %v6628_v40, 16  ;;  %vm8829_vm4 = vsmask.f32 256  ;;  %v950_v9 = vshll.u32 %v6639_v56, 16  ;;  %v6720_v40 = vld [vmem:[%s6544_s11 + $0x8] sm:$0xff]  }
  0x2e   : > { %669 = vrot.lane.b32.xlu0 %v6220_v29, %s6438_s13  ;;  %671 = vrot.lane.b32.xlu1 %v6219_v28, %s6438_s13  ;;  %v6243_v28 = vld [vmem:[%s6544_s11 + $0x8] sm:$0xff]   ;;  %v6646_v2 = vrot.slane %v1796_v50, 1  ;;  %vm6653_vm5 = vmand %vm227_vm3, %vm8829_vm4  ;;  %vm8828_vm6 = vsmask.f32 7938  ;;  %vm1068_vm8 = vcmask 122976   ;;  %vm717_vm11 = vcmask 97351  }
  0x2f   : > { %v6245_v29 = vld [vmem:[%s6544_s11 + $0x48] sm:$0xff]   ;;  %v1789_v34 = vshll.u32 %v6243_v28, 16  ;;  %v1785_v51 = vor.u32 %v1784_v41, %v1780_v37  ;;  %v231_v11 = vsel %vm6653_vm5, 0, %v230_v6  ;;  %vm6682_vm7 = vmand %vm224_vm0, %vm8828_vm6  ;;  %v955_v6 = vshrl.u32 %v6672_v21, 16 }
  0x30   : > { %v936_v38 = vshll.u32 %v6245_v29, 16  ;;  %232 = vst [vmem:[#allocation5 + $0x8] sm:$0x1] %v231_v11  ;;  %v242_v50 = vld [vmem:[#allocation5 + $0x28] sm:$0x1]  ;;  %v6278_v11 = vld [vmem:[%s6544_s11 + $0x30] sm:$0xff]   ;;  %vm6772_vm9 = vmand %vm1068_vm8, %vm8829_vm4 }
  0x31   : > { %v1791_v45 = vrot.slane %v1789_v34, 1  ;;  %v6690_v34 = vld [vmem:[%s6544_s11 + $0x48] sm:$0xff]   ;;  %vm8830_vm10 = vsmask.f32 7966  ;;  %vm1021_vm13 = vsmask.f32 7424 }
  0x32   : > { %981 = vrot.lane.b32.xlu0 %v897_v36, %s6439_s14  ;;  %983 = vrot.lane.b32.xlu1 %v904_v39, %s6439_s14  ;;  %v6242_v36 = vld [vmem:[%s6544_s11 + $0x20] sm:$0xff]   ;;  %v6625_v39 = vld [vmem:[%s6544_s11 + $0x38] sm:$0xff]   ;;  %v938_v48 = vrot.slane %v936_v38, 1  ;;  %vm6831_vm12 = vmand %vm717_vm11, %vm8830_vm10  ;;  %vm1390_vm15 = vcmask 130144   ;;  %vm1617_vm3 = vcmask 195751   ;;  %vm1939_vm11 = vcmask 195744  }
  0x33   : > { %v1280_v49 = vshrl.u32 %v6625_v39, 16  ;;  %v1283_v59 = vshll.u32 %v6625_v39, 16  ;;  %v1287_v39 = vshrl.u32 %v6667_v16, 16  ;;  %vm6863_vm14 = vmand %vm715_vm2, %vm1021_vm13  ;;  %vm1600_vm2 = vcmask 162944  }
  0x34   : > { %vm6921_vm0 = vmand %vm1390_vm15, %vm8828_vm6 }
  0x35   : > { %v1282_v1 = vrot.slane %v1280_v49, 7  ;;  %v957_v49 = vshll.u32 %v6672_v21, 16  ;;  %v6735_v21 = vld [vmem:[%s6544_s11 + $0x28] sm:$0xff]   ;;  %vm6987_vm8 = vmand %vm1617_vm3, %vm8830_vm10  ;;  %vm1992_vm3 = vcmask 221376  }
  0x36   : > { %1342 = vrot.lane.b32.xlu0 %v1236_v43, %s6440_s15  ;;  %1344 = vrot.lane.b32.xlu1 %v1243_v44, %s6440_s15  ;;  %v6241_v43 = vld [vmem:[%s6544_s11 + $0x28] sm:$0xff]   ;;  %v1787_v44 = vshrl.u32 %v6243_v28, 16  ;;  %v233_v28 = vld [vmem:[#allocation5 + $0x10] sm:$0x1]  ;;  %vm7107_vm15 = vmand %vm1939_vm11, %vm1021_vm13 }
  0x37   : > { %v234_v32 = vsel %vm6653_vm5, 0, %v233_v28  ;;  %v1285_v38 = vor.u32 %v1283_v59, %v1282_v1  ;;  %v1289_v59 = vrot.slane %v1287_v39, 7  ;;  %vm7153_vm11 = vmand %vm1992_vm3, %vm8829_vm4  ;;  %vm2945_vm3 = vcmask 1041408  }
  0x38   : > { %235 = vst [vmem:[#allocation5 + $0x10] sm:$0x1] %v234_v32 }
  0x3a   : > { %1552 = vrot.lane.b32.xlu0 %v6226_v46, %s6442_s16  ;;  %1554 = vrot.lane.b32.xlu1 %v6225_v47, %s6442_s16  ;;  %v943_v46 = vshll.u32 %v6248_v35, 16  ;;  %v934_v47 = vshrl.u32 %v6245_v29, 16  ;;  %v6272_v29 = vld [vmem:[%s6544_s11 + $0x8] sm:$0xff]   ;;  %v402_v35 = vshrl.u32 %v6271_v27, 16 }
  0x3b   : > { %v388_v37 = vshrl.u32 %v6272_v29, 16 }
  0x3c   : > { %v945_v58 = vrot.slane %v943_v46, 1  ;;  %v404_v46 = vrot.slane %v402_v35, 7 }
  0x3e   : > { %673 = vrot.lane.b32.xlu0 %v6228_v53, %s6438_s13  ;;  %675 = vrot.lane.b32.xlu1 %v6227_v57, %s6438_s13  ;;  %v1275_v53 = vrot.slane %v1273_v42, 7  ;;  %v1792_v57 = vor.u32 %v1791_v45, %v1787_v44  ;;  %v946_v20 = vor.u32 %v945_v58, %v941_v55  ;;  %v503_v42 = vld [vmem:[#allocation5 + $0x8] sm:$0xff]  ;;  %v6275_v58 = vld [vmem:[%s6544_s11 + $0x20] sm:$0xff]  }
  0x3f   : > { %v409_v1 = vshrl.u32 %v6275_v58, 16 }
  0x40   : > { %v1278_v19 = vor.u32 %v1276_v54, %v1275_v53 }
  0x42   : > { %985 = vrot.lane.b32.xlu0 %v911_v61, %s6439_s14  ;;  %987 = vrot.lane.b32.xlu1 %v918_v0, %s6439_s14  ;;  %v236_v61 = vld [vmem:[#allocation5 + $0x18] sm:$0x1]  ;;  %v939_v0 = vor.u32 %v938_v48, %v934_v47  ;;  %v390_v47 = vrot.slane %v388_v37, 7  ;;  %v1290_v48 = vshll.u32 %v6667_v16, 16  ;;  %v6264_v37 = vld [vmem:[%s6544_s11 + $0x68] sm:$0xff]  }
  0x43   : > { %v237_v10 = vsel %vm6653_vm5, 0, %v236_v61  ;;  %v1294_v61 = vshrl.u32 %v6690_v34, 16 }
  0x44   : > { %238 = vst [vmem:[#allocation5 + $0x18] sm:$0x1] %v237_v10  ;;  %v506_v10 = vld [vmem:[#allocation5 + $0x10] sm:$0xff] }
  0x46   : > { %1346 = vrot.lane.b32.xlu0 %v1250_v3, %s6440_s15  ;;  %1348 = vrot.lane.b32.xlu1 %v1257_v5, %s6440_s15  ;;  %v6649_v3 = vld [vmem:[%s6544_s11 + $0x18] sm:$0xff]   ;;  %v395_v5 = vshrl.u32 %v6267_v62, 16 }
  0x47   : > { %v1803_v23 = vshll.u32 %v6649_v3, 16 }
  0x48   : > { %v397_v12 = vrot.slane %v395_v5, 7  ;;  %v412_v5 = vshll.u32 %v6275_v58, 16 }
  0x49   : > { %v1805_v53 = vrot.slane %v1803_v23, 1  ;;  %v423_v23 = vshrl.u32 %v6278_v11, 16 }
  0x4a   : > { %1556 = vrot.lane.b32.xlu0 %v6234_v8, %s6442_s16  ;;  %1558 = vrot.lane.b32.xlu1 %v6233_v7, %s6442_s16  ;;  %v6268_v7 = vld [vmem:[%s6544_s11] sm:$0xff]   ;;  %v948_v8 = vshrl.u32 %v6639_v56, 16  ;;  %v426_v56 = vshll.u32 %v6278_v11, 16 }
  0x4b   : > { %v381_v14 = vshrl.u32 %v6268_v7, 16  ;;  %v384_v15 = vshll.u32 %v6268_v7, 16  ;;  %v509_v41 = vld [vmem:[#allocation5 + $0x18] sm:$0xff]  ;;  %v959_v7 = vrot.slane %v957_v49, 1  ;;  %v254_v49 = vld [vmem:[#allocation5 + $0x48] sm:$0x1] }
  0x4d   : > { %v383_v18 = vrot.slane %v381_v14, 7  ;;  %v6279_v14 = vld [vmem:[%s6544_s11 + $0x28] sm:$0xff]   ;;  %v960_v28 = vor.u32 %v959_v7, %v955_v6 }
  0x4e   : > { %677 = vrot.lane.b32.xlu0 %v6236_v13, %s6438_s13  ;;  %679 = vrot.lane.b32.xlu1 %v6235_v17, %s6438_s13  ;;  %v398_v13 = vshll.u32 %v6267_v62, 16  ;;  %v1801_v17 = vshrl.u32 %v6649_v3, 16  ;;  %v1799_v62 = vor.u32 %v6646_v2, %v1794_v60  ;;  %v411_v2 = vrot.slane %v409_v1, 7 }
  0x50   : > { %v400_v24 = vor.u32 %v398_v13, %v397_v12  ;;  %v1297_v12 = vshll.u32 %v6690_v34, 16  ;;  %v248_v13 = vld [vmem:[#allocation5 + $0x38] sm:$0x1]  ;;  %v1806_v16 = vor.u32 %v1805_v53, %v1801_v17  ;;  %v416_v17 = vshrl.u32 %v6279_v14, 16 }
  0x51   : > { %v1817_v34 = vshll.u32 %v6735_v21, 16 }
  0x52   : > { %989 = vrot.lane.b32.xlu0 %v925_v22, %s6439_s14  ;;  %991 = vrot.lane.b32.xlu1 %v932_v25, %s6439_s14  ;;  %v239_v22 = vld [vmem:[#allocation5 + $0x20] sm:$0x1]  ;;  %v386_v25 = vor.u32 %v384_v15, %v383_v18  ;;  %v510_v44 = vsel %vm6682_vm7, %v400_v24, %v509_v41  ;;  %v1296_v18 = vrot.slane %v1294_v61, 7  ;;  %v2146_v24 = vshrl.u32 %v6720_v40, 16 }
  0x53   : > { %v240_v26 = vsel %vm6653_vm5, 0, %v239_v22  ;;  %511 = vst [vmem:[#allocation5 + $0x18] sm:$0xff] %v510_v44  ;;  %v414_v22 = vor.u32 %v412_v5, %v411_v2  ;;  %v418_v32 = vrot.slane %v416_v17, 7  ;;  %v6284_v44 = vld [vmem:[%s6544_s11 + $0x40] sm:$0xff]   ;;  %v6786_v17 = vld [vmem:[%s6544_s11 + $0x30] sm:$0xff]  }
  0x54   : > { %241 = vst [vmem:[#allocation5 + $0x20] sm:$0x1] %v240_v26  ;;  %v504_v45 = vsel %vm6682_vm7, %v386_v25, %v503_v42  ;;  %v425_v26 = vrot.slane %v423_v23, 7  ;;  %v2148_v41 = vrot.slane %v2146_v24, 7  ;;  %v2149_v42 = vshll.u32 %v6720_v40, 16 }
  0x55   : > { %505 = vst [vmem:[#allocation5 + $0x8] sm:$0xff] %v504_v45  ;;  %v1299_v45 = vor.u32 %v1297_v12, %v1296_v18  ;;  %v440_v61 = vshll.u32 %v6284_v44, 16 }
  0x56   : > { %1350 = vrot.lane.b32.xlu0 %v1264_v30, %s6440_s15  ;;  %1352 = vrot.lane.b32.xlu1 %v1271_v33, %s6440_s15  ;;  %v952_v30 = vrot.slane %v950_v9, 1  ;;  %v6249_v33 = vld [vmem:[%s6544_s11 + $0x30] sm:$0xff]   ;;  %v428_v35 = vor.u32 %v426_v56, %v425_v26  ;;  %v2151_v18 = vor.u32 %v2149_v42, %v2148_v41  ;;  %v6803_v42 = vld [vmem:[%s6544_s11 + $0x20] sm:$0xff]  }
  0x58   : > { %v953_v15 = vor.u32 %v952_v30, %v948_v8  ;;  %v245_v8 = vld [vmem:[#allocation5 + $0x30] sm:$0x1] }
  0x59   : > { %v246_v3 = vsel %vm6653_vm5, 0, %v245_v8 }
  0x5a   : > { %1560 = vrot.lane.b32.xlu0 %v6242_v36, %s6442_s16  ;;  %1562 = vrot.lane.b32.xlu1 %v6241_v43, %s6442_s16  ;;  %v405_v36 = vshll.u32 %v6271_v27, 16  ;;  %v391_v43 = vshll.u32 %v6272_v29, 16  ;;  %247 = vst [vmem:[#allocation5 + $0x30] sm:$0x1] %v246_v3  ;;  %v419_v27 = vshll.u32 %v6279_v14, 16  ;;  %v6742_v29 = vld [vmem:[%s6544_s11 + $0x10] sm:$0xff]  }
  0x5b   : > { %v2156_v40 = vshll.u32 %v6742_v29, 16 }
  0x5c   : > { %v407_v54 = vor.u32 %v405_v36, %v404_v46  ;;  %v393_v55 = vor.u32 %v391_v43, %v390_v47  ;;  %v421_v43 = vor.u32 %v419_v27, %v418_v32  ;;  %v1815_v46 = vshrl.u32 %v6735_v21, 16 }
  0x5d   : > { %v2153_v47 = vshrl.u32 %v6742_v29, 16  ;;  %v6294_v29 = vld [vmem:[%s6544_s11 + $0x50] sm:$0xff]  }
  0x5e   : > { %1891 = vrot.lane.b32.xlu0 %v1785_v51, %s6443_s17  ;;  %1893 = vrot.lane.b32.xlu1 %v1792_v57, %s6443_s17  ;;  %v6252_v51 = vld [vmem:[%s6544_s11 + $0x38] sm:$0xff]   ;;  %v243_v57 = vsel %vm6653_vm5, 0, %v242_v50  ;;  %v507_v60 = vsel %vm6682_vm7, %v393_v55, %v506_v10  ;;  %v6260_v55 = vld [vmem:[%s6544_s11 + $0x48] sm:$0xff]  }
  0x5f   : > { %244 = vst [vmem:[#allocation5 + $0x28] sm:$0x1] %v243_v57  ;;  %508 = vst [vmem:[#allocation5 + $0x10] sm:$0xff] %v507_v60  ;;  %v6285_v50 = vld [vmem:[%s6544_s11 + $0x38] sm:$0xff]   ;;  %v964_v57 = vshll.u32 %v6264_v37, 16  ;;  %v962_v60 = vshrl.u32 %v6264_v37, 16 }
  0x60   : > { %v430_v1 = vshrl.u32 %v6285_v50, 16  ;;  %v433_v6 = vshll.u32 %v6285_v50, 16 }
  0x61   : > { %v518_v58 = vld [vmem:[#allocation5 + $0x30] sm:$0xff]  ;;  %v966_v2 = vrot.slane %v964_v57, 1 }
  0x62   : > { %681 = vrot.lane.b32.xlu0 %v6246_v63, %s6438_s13  ;;  %993 = vrot.lane.b32.xlu1 %v939_v0, %s6439_s14  ;;  %v6712_v63 = vld [vmem:[%s6544_s11 + $0x20] sm:$0xff]   ;;  %v432_v10 = vrot.slane %v430_v1, 7 }
  0x63   : > { %v512_v0 = vld [vmem:[#allocation5 + $0x20] sm:$0xff]  ;;  %v1808_v36 = vshrl.u32 %v6712_v63, 16  ;;  %v967_v3 = vor.u32 %v966_v2, %v962_v60 }
  0x64   : > { %v513_v9 = vsel %vm6682_vm7, %v407_v54, %v512_v0  ;;  %v255_v54 = vsel %vm6653_vm5, 0, %v254_v49  ;;  %v6809_v49 = vld [vmem:[%s6544_s11 + $0x18] sm:$0xff]  }
  0x65   : > { %514 = vst [vmem:[#allocation5 + $0x20] sm:$0xff] %v513_v9  ;;  %256 = vst [vmem:[#allocation5 + $0x48] sm:$0x1] %v255_v54  ;;  %v6265_v9 = vld [vmem:[%s6544_s11 + $0x50] sm:$0xff]   ;;  %v2160_v1 = vshrl.u32 %v6809_v49, 16 }
  0x66   : > { %995 = vrot.lane.b32.xlu0 %v946_v20, %s6439_s14  ;;  %1354 = vrot.lane.b32.xlu1 %v1278_v19, %s6440_s15  ;;  %v249_v19 = vsel %vm6653_vm5, 0, %v248_v13  ;;  %v1810_v20 = vshll.u32 %v6712_v63, 16  ;;  %v515_v25 = vld [vmem:[#allocation5 + $0x28] sm:$0xff]  ;;  %v519_v63 = vsel %vm6682_vm7, %v421_v43, %v518_v58  ;;  %v6269_v13 = vld [vmem:[%s6544_s11 + $0x58] sm:$0xff]   ;;  %v1304_v27 = vshll.u32 %v6265_v9, 16  ;;  %v6816_v58 = vld [vmem:[%s6544_s11 + $0x60] sm:$0xff]  }
  0x67   : > { %250 = vst [vmem:[#allocation5 + $0x38] sm:$0x1] %v249_v19  ;;  %v516_v30 = vsel %vm6682_vm7, %v414_v22, %v515_v25  ;;  %520 = vst [vmem:[#allocation5 + $0x30] sm:$0xff] %v519_v63  ;;  %v2155_v19 = vrot.slane %v2153_v47, 7  ;;  %v1308_v56 = vshrl.u32 %v6269_v13, 16  ;;  %v454_v43 = vshll.u32 %v6294_v29, 16 }
  0x68   : > { %517 = vst [vmem:[#allocation5 + $0x28] sm:$0xff] %v516_v30  ;;  %v1812_v39 = vrot.slane %v1810_v20, 1  ;;  %v1301_v20 = vshrl.u32 %v6265_v9, 16  ;;  %v6266_v30 = vld [vmem:[%s6544_s11 + $0x8] sm:$0xff]   ;;  %v1822_v63 = vshrl.u32 %v6786_v17, 16 }
  0x69   : > { %v2158_v25 = vor.u32 %v2156_v40, %v2155_v19  ;;  %v1310_v32 = vrot.slane %v1308_v56, 7  ;;  %v6843_v19 = vld [vmem:[%s6544_s11 + $0x68] sm:$0xff]   ;;  %v6305_v56 = vld [vmem:[%s6544_s11 + $0x58] sm:$0xff]  }
  0x6a   : > { %1356 = vrot.lane.b32.xlu0 %v1285_v38, %s6440_s15  ;;  %1564 = vrot.lane.b32.xlu1 %v6249_v33, %s6442_s16  ;;  %v1292_v33 = vor.u32 %v1290_v48, %v1289_v59  ;;  %v6257_v38 = vld [vmem:[%s6544_s11 + $0x40] sm:$0xff]   ;;  %v437_v59 = vshrl.u32 %v6284_v44, 16  ;;  %v1813_v7 = vor.u32 %v1812_v39, %v1808_v36  ;;  %v1303_v26 = vrot.slane %v1301_v20, 7  ;;  %v257_v39 = vld [vmem:[#allocation5 + $0x50] sm:$0x1] }
  0x6b   : > { %v1824_v36 = vshll.u32 %v6786_v17, 16  ;;  %v258_v44 = vsel %vm6653_vm5, 0, %v257_v39  ;;  %v6304_v20 = vld [vmem:[%s6544_s11 + $0x60] sm:$0xff]   ;;  %v1318_v17 = vshll.u32 %v6816_v58, 16 }
  0x6c   : > { %v439_v5 = vrot.slane %v437_v59, 7  ;;  %v527_v21 = vld [vmem:[#allocation5 + $0x48] sm:$0xff]  ;;  %v1306_v41 = vor.u32 %v1304_v27, %v1303_v26  ;;  %259 = vst [vmem:[#allocation5 + $0x50] sm:$0x1] %v258_v44 }
  0x6e   : > { %1566 = vrot.lane.b32.xlu0 %v6252_v51, %s6442_s16  ;;  %1895 = vrot.lane.b32.xlu1 %v1799_v62, %s6443_s17  ;;  %v521_v48 = vld [vmem:[#allocation5 + $0x38] sm:$0xff]  ;;  %v1819_v51 = vrot.slane %v1817_v34, 1  ;;  %v251_v62 = vld [vmem:[#allocation5 + $0x40] sm:$0x1]  ;;  %v442_v12 = vor.u32 %v440_v61, %v439_v5  ;;  %v6295_v34 = vld [vmem:[%s6544_s11 + $0x48] sm:$0xff]  }
  0x6f   : > { %v522_v53 = vsel %vm6682_vm7, %v428_v35, %v521_v48  ;;  %v252_v0 = vsel %vm6653_vm5, 0, %v251_v62  ;;  %v6796_v35 = vld [vmem:[%s6544_s11 + $0x38] sm:$0xff]   ;;  %v447_v48 = vshll.u32 %v6295_v34, 16  ;;  %v6274_v61 = vld [vmem:[%s6544_s11 + $0x50] sm:$0xff]   ;;  %v2167_v62 = vshrl.u32 %v6803_v42, 16 }
  0x70   : > { %523 = vst [vmem:[#allocation5 + $0x38] sm:$0xff] %v522_v53  ;;  %253 = vst [vmem:[#allocation5 + $0x40] sm:$0x1] %v252_v0  ;;  %v1820_v14 = vor.u32 %v1819_v51, %v1815_v46  ;;  %v528_v23 = vsel %vm6682_vm7, %v442_v12, %v527_v21  ;;  %v6270_v46 = vld [vmem:[%s6544_s11 + $0x10] sm:$0xff]   ;;  %v1831_v54 = vshll.u32 %v6796_v35, 16  ;;  %v1826_v0 = vrot.slane %v1824_v36, 1 }
  0x71   : > { %529 = vst [vmem:[#allocation5 + $0x48] sm:$0xff] %v528_v23  ;;  %v1829_v9 = vshrl.u32 %v6796_v35, 16  ;;  %v266_v23 = vld [vmem:[#allocation5 + $0x68] sm:$0x1]  ;;  %v458_v35 = vshrl.u32 %v6305_v56, 16 }
  0x72   : > { %1897 = vrot.lane.b32.xlu0 %v1806_v16, %s6443_s17  ;;  %997 = vrot.lane.b32.xlu1 %v953_v15, %s6439_s14  ;;  %v435_v15 = vor.u32 %v433_v6, %v432_v10  ;;  %v1070_v16 = vld [vmem:[#allocation5] sm:$0x1]  ;;  %v1833_v10 = vrot.slane %v1831_v54, 1  ;;  %v1827_v21 = vor.u32 %v1826_v0, %v1822_v63  ;;  %v6283_v54 = vld [vmem:[%s6544_s11 + $0x18] sm:$0xff]  }
  0x73   : > { %v1071_v22 = vsel %vm6772_vm9, 0, %v1070_v16  ;;  %v530_v40 = vld [vmem:[#allocation5 + $0x50] sm:$0xff]  ;;  %v2169_v16 = vrot.slane %v2167_v62, 7  ;;  %v460_v44 = vrot.slane %v458_v35, 7 }
  0x74   : > { %1072 = vst [vmem:[#allocation5] sm:$0x1] %v1071_v22  ;;  %v2162_v22 = vrot.slane %v2160_v1, 7 }
  0x76   : > { %999 = vrot.lane.b32.xlu0 %v960_v28, %s6439_s14  ;;  %1358 = vrot.lane.b32.xlu1 %v1292_v33, %s6440_s15  ;;  %v260_v28 = vld [vmem:[#allocation5 + $0x58] sm:$0x1]  ;;  %v1311_v33 = vshll.u32 %v6269_v13, 16  ;;  %v2170_v13 = vshll.u32 %v6803_v42, 16 }
  0x77   : > { %v524_v8 = vld [vmem:[#allocation5 + $0x40] sm:$0xff]  ;;  %v261_v37 = vsel %vm6653_vm5, 0, %v260_v28 }
  0x78   : > { %v525_v24 = vsel %vm6682_vm7, %v435_v15, %v524_v8  ;;  %262 = vst [vmem:[#allocation5 + $0x58] sm:$0x1] %v261_v37  ;;  %v1313_v53 = vor.u32 %v1311_v33, %v1310_v32  ;;  %v1322_v37 = vshrl.u32 %v6843_v19, 16 }
  0x79   : > { %526 = vst [vmem:[#allocation5 + $0x40] sm:$0xff] %v525_v24  ;;  %v267_v24 = vsel %vm6653_vm5, 0, %v266_v23 }
  0x7a   : > { %1360 = vrot.lane.b32.xlu0 %v1299_v45, %s6440_s15  ;;  %1568 = vrot.lane.b32.xlu1 %v6257_v38, %s6442_s16  ;;  %v451_v38 = vshrl.u32 %v6294_v29, 16  ;;  %v444_v45 = vshrl.u32 %v6295_v34, 16  ;;  %268 = vst [vmem:[#allocation5 + $0x68] sm:$0x1] %v267_v24  ;;  %v465_v29 = vshrl.u32 %v6304_v20, 16 }
  0x7b   : > { %v263_v34 = vld [vmem:[#allocation5 + $0x60] sm:$0x1] }
  0x7c   : > { %v453_v47 = vrot.slane %v451_v38, 7  ;;  %v446_v50 = vrot.slane %v444_v45, 7  ;;  %v467_v38 = vrot.slane %v465_v29, 7  ;;  %v264_v39 = vsel %vm6653_vm5, 0, %v263_v34  ;;  %v6289_v29 = vld [vmem:[%s6544_s11 + $0x60] sm:$0xff]  }
  0x7d   : > { %265 = vst [vmem:[#allocation5 + $0x60] sm:$0x1] %v264_v39  ;;  %v461_v45 = vshll.u32 %v6305_v56, 16 }
  0x7e   : > { %1570 = vrot.lane.b32.xlu0 %v6260_v55, %s6442_s16  ;;  %1899 = vrot.lane.b32.xlu1 %v1813_v7, %s6443_s17  ;;  %v456_v55 = vor.u32 %v454_v43, %v453_v47  ;;  %v449_v59 = vor.u32 %v447_v48, %v446_v50  ;;  %v6273_v7 = vld [vmem:[%s6544_s11 + $0x58] sm:$0xff]   ;;  %v2172_v43 = vor.u32 %v2170_v13, %v2169_v16 }
  0x7f   : > { %v533_v5 = vld [vmem:[#allocation5 + $0x58] sm:$0xff]  ;;  %v463_v63 = vor.u32 %v461_v45, %v460_v44 }
  0x80   : > { %v534_v12 = vsel %vm6682_vm7, %v456_v55, %v533_v5  ;;  %v531_v15 = vsel %vm6682_vm7, %v449_v59, %v530_v40  ;;  %v6880_v55 = vld [vmem:[%s6544_s11 + $0x40] sm:$0xff]   ;;  %v1325_v59 = vshll.u32 %v6843_v19, 16 }
  0x81   : > { %535 = vst [vmem:[#allocation5 + $0x58] sm:$0xff] %v534_v12  ;;  %532 = vst [vmem:[#allocation5 + $0x50] sm:$0xff] %v531_v15  ;;  %v539_v62 = vld [vmem:[#allocation5 + $0x68] sm:$0xff]  ;;  %v6287_v40 = vld [vmem:[%s6544_s11 + $0x20] sm:$0xff]   ;;  %v1838_v15 = vshll.u32 %v6880_v55, 16  ;;  %v1836_v56 = vshrl.u32 %v6880_v55, 16 }
  0x82   : > { %1901 = vrot.lane.b32.xlu0 %v1820_v14, %s6443_s17  ;;  %2250 = vrot.lane.b32.xlu1 %v2151_v18, %s6444_s23  ;;  %v1315_v14 = vshrl.u32 %v6816_v58, 16  ;;  %v2163_v18 = vshll.u32 %v6809_v49, 16  ;;  %v6871_v49 = vld [vmem:[%s6544_s11 + $0x48] sm:$0xff]   ;;  %v1324_v58 = vrot.slane %v1322_v37, 7  ;;  %v6929_v37 = vld [vmem:[%s6544_s11 + $0x70] sm:$0xff]  }
  0x83   : > { %v6316_v55 = vld [vmem:[%s6544_s11 + $0x68] sm:$0xff]  }
  0x84   : > { %v1317_v28 = vrot.slane %v1315_v14, 7  ;;  %v2165_v36 = vor.u32 %v2163_v18, %v2162_v22  ;;  %v536_v16 = vld [vmem:[#allocation5 + $0x60] sm:$0xff]  ;;  %v1327_v18 = vor.u32 %v1325_v59, %v1324_v58  ;;  %v1843_v22 = vshrl.u32 %v6871_v49, 16  ;;  %v269_v59 = vld [vmem:[#allocation5 + $0x70] sm:$0x1] }
  0x85   : > { %v537_v19 = vsel %vm6682_vm7, %v463_v63, %v536_v16  ;;  %v6297_v16 = vld [vmem:[%s6544_s11 + $0x28] sm:$0xff]  }
  0x86   : > { %1001 = vrot.lane.b32.xlu0 %v967_v3, %s6439_s14  ;;  %2252 = vrot.lane.b32.xlu1 %v2158_v25, %s6444_s23  ;;  %v1834_v3 = vor.u32 %v1833_v10, %v1829_v9  ;;  %538 = vst [vmem:[#allocation5 + $0x60] sm:$0xff] %v537_v19  ;;  %v475_v19 = vshll.u32 %v6316_v55, 16 }
  0x8a   : > { %2449 = vrot.lane.b32.xlu0 %v6266_v30, %s6445_s25  ;;  %1362 = vrot.lane.b32.xlu1 %v1306_v41, %s6440_s15  ;;  %v468_v30 = vshll.u32 %v6304_v20, 16 }
  0x8c   : > { %v660_v51 = vpop.permute.xlu1 %659  ;;  %v656_v57 = vpop.permute.xlu0 %655  ;;  %v470_v50 = vor.u32 %v468_v30, %v467_v38 }
  0x8d   : > { %702 = vst.msk [vmem:[#allocation5 + $0x18] sm:$0xff] %vm548_vm1, %v660_v51  ;;  %700 = vst.msk [vmem:[#allocation5 + $0x8] sm:$0xff] %vm548_vm1, %v656_v57  ;;  %v1320_v57 = vor.u32 %v1318_v17, %v1317_v28 }
  0x8e   : > { %2451 = vrot.lane.b32.xlu0 %v6270_v46, %s6445_s25  ;;  %1364 = vrot.lane.b32.xlu1 %v1313_v53, %s6440_s15 }
  0x90   : > { %v662_v6 = vpop.permute.xlu1 %661  ;;  %v658_v2 = vpop.permute.xlu0 %657 }
  0x91   : > { %703 = vst.msk [vmem:[#allocation5 + $0x20] sm:$0xff] %vm548_vm1, %v662_v6  ;;  %701 = vst.msk [vmem:[#allocation5 + $0x10] sm:$0xff] %vm548_vm1, %v658_v2  ;;  %v1845_v6 = vshll.u32 %v6871_v49, 16  ;;  %v6894_v2 = vld [vmem:[%s6544_s11 + $0x28] sm:$0xff]  }
  0x92   : > { %1572 = vrot.lane.b32.xlu0 %v6274_v61, %s6442_s16  ;;  %1574 = vrot.lane.b32.xlu1 %v6273_v7, %s6442_s16  ;;  %v6885_v61 = vld [vmem:[%s6544_s11 + $0x30] sm:$0xff]   ;;  %v540_v7 = vsel %vm6682_vm7, %v470_v50, %v539_v62 }
  0x93   : > { %541 = vst [vmem:[#allocation5 + $0x68] sm:$0xff] %v540_v7  ;;  %v1847_v23 = vrot.slane %v1845_v6, 1 }
  0x94   : > { %v726_v8 = vld [vmem:[#allocation5 + $0x18] sm:$0x80]  ;;  %v720_v26 = vld [vmem:[#allocation5 + $0x8] sm:$0x80]  ;;  %v664_v27 = vpop.permute.xlu0 %663  ;;  %v976_v33 = vpop.permute.xlu1 %975 }
  0x95   : > { %v727_v25 = vsel %vm6831_vm12, 0, %v726_v8  ;;  %v721_v32 = vsel %vm6831_vm12, 0, %v720_v26  ;;  %704 = vst.msk [vmem:[#allocation5 + $0x28] sm:$0xff] %vm548_vm1, %v664_v27  ;;  %v2181_v8 = vshrl.u32 %v6885_v61, 16  ;;  %v6288_v26 = vld [vmem:[%s6544_s11 + $0x68] sm:$0xff]  }
  0x96   : > { %728 = vst [vmem:[#allocation5 + $0x18] sm:$0x80] %v727_v25  ;;  %722 = vst [vmem:[#allocation5 + $0x8] sm:$0x80] %v721_v32  ;;  %1903 = vrot.lane.b32.xlu0 %v1827_v21, %s6443_s17  ;;  %1905 = vrot.lane.b32.xlu1 %v1834_v3, %s6443_s17  ;;  %v1840_v32 = vrot.slane %v1838_v15, 1 }
  0x98   : > { %v729_v41 = vld [vmem:[#allocation5 + $0x20] sm:$0x80]  ;;  %v723_v47 = vld [vmem:[#allocation5 + $0x10] sm:$0x80]  ;;  %v666_v48 = vpop.permute.xlu0 %665  ;;  %v668_v53 = vpop.permute.xlu1 %667 }
  0x99   : > { %v730_v46 = vsel %vm6831_vm12, 0, %v729_v41  ;;  %v724_v51 = vsel %vm6831_vm12, 0, %v723_v47  ;;  %705 = vst.msk [vmem:[#allocation5 + $0x30] sm:$0xff] %vm548_vm1, %v666_v48  ;;  %706 = vst.msk [vmem:[#allocation5 + $0x38] sm:$0xff] %vm548_vm1, %v668_v53  ;;  %v1392_v47 = vld [vmem:[#allocation5] sm:$0xff]  ;;  %v1841_v48 = vor.u32 %v1840_v32, %v1836_v56  ;;  %v1848_v53 = vor.u32 %v1847_v23, %v1843_v22  ;;  %v6296_v22 = vld [vmem:[%s6544_s11 + $0x70] sm:$0xff]  }
  0x9a   : > { %731 = vst [vmem:[#allocation5 + $0x20] sm:$0x80] %v730_v46  ;;  %725 = vst [vmem:[#allocation5 + $0x10] sm:$0x80] %v724_v51  ;;  %2254 = vrot.lane.b32.xlu0 %v2165_v36, %s6444_s23  ;;  %2256 = vrot.lane.b32.xlu1 %v2172_v43, %s6444_s23  ;;  %v2184_v36 = vshll.u32 %v6885_v61, 16  ;;  %v2177_v43 = vshll.u32 %v6894_v2, 16 }
  0x9c   : > { %v732_v0 = vld [vmem:[#allocation5 + $0x28] sm:$0x80]  ;;  %v978_v5 = vpop.permute.xlu0 %977  ;;  %v980_v12 = vpop.permute.xlu1 %979 }
  0x9d   : > { %v1029_v1 = vld [vmem:[#allocation5 + $0x18] sm:$0xff]  ;;  %v1023_v9 = vld [vmem:[#allocation5 + $0x8] sm:$0xff]  ;;  %v733_v10 = vsel %vm6831_vm12, 0, %v732_v0 }
  0x9e   : > { %v1024_v13 = vsel %vm6863_vm14, %v976_v33, %v1023_v9  ;;  %734 = vst [vmem:[#allocation5 + $0x28] sm:$0x80] %v733_v10  ;;  %v1030_v14 = vsel %vm6863_vm14, %v980_v12, %v1029_v1  ;;  %2453 = vrot.lane.b32.xlu0 %v6283_v54, %s6445_s25  ;;  %1366 = vrot.lane.b32.xlu1 %v1320_v57, %s6440_s15  ;;  %v2174_v33 = vshrl.u32 %v6894_v2, 16  ;;  %v2183_v54 = vrot.slane %v2181_v8, 7  ;;  %v6956_v12 = vld [vmem:[%s6544_s11 + $0x8] sm:$0xff]  }
  0x9f   : > { %1025 = vst [vmem:[#allocation5 + $0x8] sm:$0xff] %v1024_v13  ;;  %1031 = vst [vmem:[#allocation5 + $0x18] sm:$0xff] %v1030_v14  ;;  %v1329_v1 = vshrl.u32 %v6929_v37, 16  ;;  %v1332_v10 = vshll.u32 %v6929_v37, 16  ;;  %v472_v14 = vshrl.u32 %v6316_v55, 16 }
  0xa0   : > { %v735_v20 = vld [vmem:[#allocation5 + $0x30] sm:$0x80]  ;;  %v670_v21 = vpop.permute.xlu0 %669  ;;  %v738_v3 = vld [vmem:[#allocation5 + $0x38] sm:$0x80]  ;;  %v672_v25 = vpop.permute.xlu1 %671  ;;  %v2176_v49 = vrot.slane %v2174_v33, 7  ;;  %v2186_v13 = vor.u32 %v2184_v36, %v2183_v54 }
  0xa1   : > { %v736_v17 = vsel %vm6831_vm12, 0, %v735_v20  ;;  %v1026_v24 = vld [vmem:[#allocation5 + $0x10] sm:$0xff]  ;;  %707 = vst.msk [vmem:[#allocation5 + $0x40] sm:$0xff] %vm548_vm1, %v670_v21  ;;  %v739_v27 = vsel %vm6831_vm12, 0, %v738_v3  ;;  %708 = vst.msk [vmem:[#allocation5 + $0x48] sm:$0xff] %vm548_vm1, %v672_v25  ;;  %v1032_v35 = vld [vmem:[#allocation5 + $0x20] sm:$0xff] }
  0xa2   : > { %737 = vst [vmem:[#allocation5 + $0x30] sm:$0x80] %v736_v17  ;;  %v1027_v28 = vsel %vm6863_vm14, %v978_v5, %v1026_v24  ;;  %2455 = vrot.lane.b32.xlu0 %v6287_v40, %s6445_s25  ;;  %740 = vst [vmem:[#allocation5 + $0x38] sm:$0x80] %v739_v27  ;;  %1368 = vrot.lane.b32.xlu1 %v1327_v18, %s6440_s15  ;;  %v6949_v5 = vld [vmem:[%s6544_s11 + $0x10] sm:$0xff]   ;;  %v2179_v9 = vor.u32 %v2177_v43, %v2176_v49  ;;  %v270_v40 = vsel %vm6653_vm5, 0, %v269_v59 }
  0xa3   : > { %1028 = vst [vmem:[#allocation5 + $0x10] sm:$0xff] %v1027_v28  ;;  %271 = vst [vmem:[#allocation5 + $0x70] sm:$0x1] %v270_v40  ;;  %v6965_v18 = vld [vmem:[%s6544_s11 + $0x50] sm:$0xff]   ;;  %v1331_v23 = vrot.slane %v1329_v1, 7  ;;  %v474_v56 = vrot.slane %v472_v14, 7 }
  0xa4   : > { %v982_v34 = vpop.permute.xlu0 %981  ;;  %v984_v38 = vpop.permute.xlu1 %983  ;;  %v2666_v17 = vshll.u32 %v6956_v12, 16  ;;  %v6978_v27 = vld [vmem:[%s6544_s11 + $0x58] sm:$0xff]  }
  0xa5   : > { %v1035_v39 = vld [vmem:[#allocation5 + $0x28] sm:$0xff]  ;;  %v1033_v41 = vsel %vm6863_vm14, %v982_v34, %v1032_v35  ;;  %v477_v28 = vor.u32 %v475_v19, %v474_v56  ;;  %v6298_v34 = vld [vmem:[%s6544_s11 + $0x30] sm:$0xff]   ;;  %v2671_v35 = vshrl.u32 %v6949_v5, 16  ;;  %v1334_v37 = vor.u32 %v1332_v10, %v1331_v23 }
  0xa6   : > { %v1073_v44 = vld [vmem:[#allocation5 + $0x8] sm:$0x1]  ;;  %v1079_v45 = vld [vmem:[#allocation5 + $0x18] sm:$0x1]  ;;  %v1036_v46 = vsel %vm6863_vm14, %v984_v38, %v1035_v39  ;;  %1034 = vst [vmem:[#allocation5 + $0x20] sm:$0xff] %v1033_v41  ;;  %1576 = vrot.lane.b32.xlu0 %v6289_v29, %s6442_s16  ;;  %1578 = vrot.lane.b32.xlu1 %v6288_v26, %s6442_s16  ;;  %v2673_v26 = vshll.u32 %v6949_v5, 16 }
  0xa7   : > { %v1074_v50 = vsel %vm6772_vm9, 0, %v1073_v44  ;;  %v1080_v51 = vsel %vm6772_vm9, 0, %v1079_v45  ;;  %1037 = vst [vmem:[#allocation5 + $0x28] sm:$0xff] %v1036_v46  ;;  %v2664_v38 = vshrl.u32 %v6956_v12, 16  ;;  %v2668_v39 = vrot.slane %v2666_v17, 1  ;;  %v6998_v45 = vld [vmem:[%s6544_s11 + $0x38] sm:$0xff]  }
  0xa8   : > { %1075 = vst [vmem:[#allocation5 + $0x8] sm:$0x1] %v1074_v50  ;;  %1081 = vst [vmem:[#allocation5 + $0x18] sm:$0x1] %v1080_v51  ;;  %v741_v57 = vld [vmem:[#allocation5 + $0x40] sm:$0x80]  ;;  %v1343_v58 = vpop.permute.xlu0 %1342  ;;  %v1345_v63 = vpop.permute.xlu1 %1344 }
  0xa9   : > { %v744_v61 = vld [vmem:[#allocation5 + $0x48] sm:$0x80]  ;;  %v742_v62 = vsel %vm6831_vm12, 0, %v741_v57  ;;  %v1393_v0 = vsel %vm6921_vm0, %v1343_v58, %v1392_v47  ;;  %v1852_v41 = vshll.u32 %v6965_v18, 16  ;;  %v2675_v44 = vrot.slane %v2673_v26, 1  ;;  %v7002_v47 = vld [vmem:[%s6544_s11 + $0x40] sm:$0xff]  }
  0xaa   : > { %v1076_v6 = vld [vmem:[#allocation5 + $0x10] sm:$0x1]  ;;  %v745_v7 = vsel %vm6831_vm12, 0, %v744_v61  ;;  %743 = vst [vmem:[#allocation5 + $0x40] sm:$0x80] %v742_v62  ;;  %1394 = vst [vmem:[#allocation5] sm:$0xff] %v1393_v0  ;;  %1907 = vrot.lane.b32.xlu0 %v1841_v48, %s6443_s17  ;;  %1909 = vrot.lane.b32.xlu1 %v1848_v53, %s6443_s17  ;;  %v2669_v59 = vor.u32 %v2668_v39, %v2664_v38 }
  0xab   : > { %v1077_v2 = vsel %vm6772_vm9, 0, %v1076_v6  ;;  %746 = vst [vmem:[#allocation5 + $0x48] sm:$0x80] %v745_v7  ;;  %v542_v43 = vld [vmem:[#allocation5 + $0x70] sm:$0xff]  ;;  %v1859_v46 = vshll.u32 %v6978_v27, 16  ;;  %v1041_v55 = vld [vmem:[#allocation5 + $0x38] sm:$0xff] }
  0xac   : > { %1078 = vst [vmem:[#allocation5 + $0x10] sm:$0x1] %v1077_v2  ;;  %v1553_v15 = vpop.permute.xlu0 %1552  ;;  %v1555_v21 = vpop.permute.xlu1 %1554  ;;  %v543_v48 = vsel %vm6682_vm7, %v477_v28, %v542_v43  ;;  %v1038_v51 = vld [vmem:[#allocation5 + $0x30] sm:$0xff]  ;;  %v1850_v61 = vshrl.u32 %v6965_v18, 16  ;;  %v1854_v62 = vrot.slane %v1852_v41, 1  ;;  %v2188_v0 = vshrl.u32 %v6998_v45, 16 }
  0xad   : > { %v1082_v20 = vld [vmem:[#allocation5 + $0x20] sm:$0x1]  ;;  %1601 = vst.msk [vmem:[#allocation5] sm:$0xff] %vm1600_vm2, %v1553_v15  ;;  %544 = vst [vmem:[#allocation5 + $0x70] sm:$0xff] %v543_v48  ;;  %v1857_v1 = vshrl.u32 %v6978_v27, 16  ;;  %v1861_v5 = vrot.slane %v1859_v46, 1 }
  0xae   : > { %v1085_v8 = vld [vmem:[#allocation5 + $0x28] sm:$0x1]  ;;  %v1083_v3 = vsel %vm6772_vm9, 0, %v1082_v20  ;;  %2258 = vrot.lane.b32.xlu0 %v2179_v9, %s6444_s23  ;;  %2260 = vrot.lane.b32.xlu1 %v2186_v13, %s6444_s23  ;;  %v7018_v6 = vld [vmem:[%s6544_s11 + $0x18] sm:$0xff]   ;;  %v6303_v12 = vld [vmem:[%s6544_s11 + $0x70] sm:$0xff]   ;;  %v2195_v40 = vshrl.u32 %v7002_v47, 16 }
  0xaf   : > { %v1086_v24 = vsel %vm6772_vm9, 0, %v1085_v8  ;;  %1084 = vst [vmem:[#allocation5 + $0x20] sm:$0x1] %v1083_v3  ;;  %v1395_v25 = vld [vmem:[#allocation5 + $0x8] sm:$0xff]  ;;  %v2190_v23 = vrot.slane %v2188_v0, 7  ;;  %v2191_v56 = vshll.u32 %v6998_v45, 16 }
  0xb0   : > { %1087 = vst [vmem:[#allocation5 + $0x28] sm:$0x1] %v1086_v24  ;;  %v1396_v29 = vsel %vm6921_vm0, %v1345_v63, %v1395_v25  ;;  %v674_v32 = vpop.permute.xlu0 %673  ;;  %v676_v33 = vpop.permute.xlu1 %675  ;;  %v2676_v63 = vor.u32 %v2675_v44, %v2671_v35  ;;  %v2198_v3 = vshll.u32 %v7002_v47, 16  ;;  %v2680_v25 = vshll.u32 %v7018_v6, 16  ;;  %v7039_v26 = vld [vmem:[%s6544_s11 + $0x60] sm:$0xff]   ;;  %v6308_v44 = vld [vmem:[%s6544_s11 + $0x38] sm:$0xff]  }
  0xb1   : > { %1397 = vst [vmem:[#allocation5 + $0x8] sm:$0xff] %v1396_v29  ;;  %709 = vst.msk [vmem:[#allocation5 + $0x50] sm:$0xff] %vm548_vm1, %v674_v32  ;;  %v1862_v29 = vor.u32 %v1861_v5, %v1857_v1  ;;  %v2197_v32 = vrot.slane %v2195_v40, 7  ;;  %v2678_v41 = vshrl.u32 %v7018_v6, 16  ;;  %v1866_v46 = vshll.u32 %v7039_v26, 16  ;;  %v7062_v48 = vld [vmem:[%s6544_s11 + $0x48] sm:$0xff]  }
  0xb2   : > { %1602 = vst.msk [vmem:[#allocation5 + $0x8] sm:$0xff] %vm1600_vm2, %v1555_v21  ;;  %2457 = vrot.lane.b32.xlu0 %v6297_v16, %s6445_s25  ;;  %683 = vrot.lane.b32.xlu1 %v6296_v22, %s6438_s13  ;;  %v1401_v16 = vld [vmem:[#allocation5 + $0x18] sm:$0xff]  ;;  %v1855_v22 = vor.u32 %v1854_v62, %v1850_v61  ;;  %v2682_v43 = vrot.slane %v2680_v25, 1  ;;  %v1047_v61 = vld [vmem:[#allocation5 + $0x48] sm:$0xff]  ;;  %v6311_v5 = vld [vmem:[%s6544_s11 + $0x40] sm:$0xff]  }
  0xb3   : > { %710 = vst.msk [vmem:[#allocation5 + $0x58] sm:$0xff] %vm548_vm1, %v676_v33  ;;  %v1398_v10 = vld [vmem:[#allocation5 + $0x10] sm:$0xff]  ;;  %v7046_v33 = vld [vmem:[%s6544_s11 + $0x20] sm:$0xff]   ;;  %v2200_v45 = vor.u32 %v2198_v3, %v2197_v32 }
  0xb4   : > { %v1619_v49 = vld [vmem:[#allocation5] sm:$0x80]  ;;  %v986_v50 = vpop.permute.xlu0 %985  ;;  %v988_v54 = vpop.permute.xlu1 %987  ;;  %v2687_v47 = vshll.u32 %v7046_v33, 16  ;;  %v2685_v6 = vshrl.u32 %v7046_v33, 16 }
  0xb5   : > { %v1620_v53 = vsel %vm6987_vm8, 0, %v1619_v49  ;;  %v1039_v57 = vsel %vm6863_vm14, %v986_v50, %v1038_v51  ;;  %v1042_v58 = vsel %vm6863_vm14, %v988_v54, %v1041_v55  ;;  %v1864_v54 = vshrl.u32 %v7039_v26, 16  ;;  %v7068_v55 = vld [vmem:[%s6544_s11 + $0x50] sm:$0xff]  }
  0xb6   : > { %1621 = vst [vmem:[#allocation5] sm:$0x80] %v1620_v53  ;;  %1040 = vst [vmem:[#allocation5 + $0x30] sm:$0xff] %v1039_v57  ;;  %1370 = vrot.lane.b32.xlu0 %v1334_v37, %s6440_s15  ;;  %2459 = vrot.lane.b32.xlu1 %v6298_v34, %s6445_s25  ;;  %v7049_v34 = vld [vmem:[%s6544_s11 + $0x68] sm:$0xff]   ;;  %v2193_v37 = vor.u32 %v2191_v56, %v2190_v23  ;;  %v1044_v53 = vld [vmem:[#allocation5 + $0x40] sm:$0xff] }
  0xb7   : > { %1043 = vst [vmem:[#allocation5 + $0x38] sm:$0xff] %v1042_v58  ;;  %v1873_v49 = vshll.u32 %v7049_v34, 16 }
  0xb8   : > { %v747_v7 = vld [vmem:[#allocation5 + $0x50] sm:$0x80]  ;;  %v1347_v9 = vpop.permute.xlu0 %1346  ;;  %v1349_v15 = vpop.permute.xlu1 %1348 }
  0xb9   : > { %v1622_v2 = vld [vmem:[#allocation5 + $0x8] sm:$0x80]  ;;  %v748_v14 = vsel %vm6831_vm12, 0, %v747_v7  ;;  %v1399_v18 = vsel %vm6921_vm0, %v1347_v9, %v1398_v10  ;;  %v1402_v21 = vsel %vm6921_vm0, %v1349_v15, %v1401_v16  ;;  %v2689_v7 = vrot.slane %v2687_v47, 1 }
  0xba   : > { %v750_v13 = vld [vmem:[#allocation5 + $0x58] sm:$0x80]  ;;  %v1623_v19 = vsel %vm6987_vm8, 0, %v1622_v2  ;;  %749 = vst [vmem:[#allocation5 + $0x50] sm:$0x80] %v748_v14  ;;  %1400 = vst [vmem:[#allocation5 + $0x10] sm:$0xff] %v1399_v18  ;;  %2768 = vrot.lane.b32.xlu0 %v2669_v59, %s6446_s26  ;;  %2770 = vrot.lane.b32.xlu1 %v2676_v63, %s6446_s26  ;;  %v2683_v63 = vor.u32 %v2682_v43, %v2678_v41 }
  0xbb   : > { %v751_v20 = vsel %vm6831_vm12, 0, %v750_v13  ;;  %1624 = vst [vmem:[#allocation5 + $0x8] sm:$0x80] %v1623_v19  ;;  %1403 = vst [vmem:[#allocation5 + $0x18] sm:$0xff] %v1402_v21  ;;  %v1868_v9 = vrot.slane %v1866_v46, 1  ;;  %v2202_v10 = vshrl.u32 %v7062_v48, 16  ;;  %v2690_v56 = vor.u32 %v2689_v7, %v2685_v6 }
  0xbc   : > { %752 = vst [vmem:[#allocation5 + $0x58] sm:$0x80] %v751_v20  ;;  %v1557_v8 = vpop.permute.xlu0 %1556  ;;  %v1559_v24 = vpop.permute.xlu1 %1558  ;;  %v1875_v40 = vrot.slane %v1873_v49, 1  ;;  %v1404_v14 = vld [vmem:[#allocation5 + $0x20] sm:$0xff]  ;;  %v2209_v15 = vshrl.u32 %v7068_v55, 16  ;;  %v1407_v20 = vld [vmem:[#allocation5 + $0x28] sm:$0xff] }
  0xbd   : > { %v1088_v17 = vld [vmem:[#allocation5 + $0x30] sm:$0x1]  ;;  %1603 = vst.msk [vmem:[#allocation5 + $0x10] sm:$0xff] %vm1600_vm2, %v1557_v8  ;;  %1604 = vst.msk [vmem:[#allocation5 + $0x18] sm:$0xff] %vm1600_vm2, %v1559_v24  ;;  %v7095_v8 = vld [vmem:[%s6544_s11 + $0x28] sm:$0xff]   ;;  %v1869_v3 = vor.u32 %v1868_v9, %v1864_v54  ;;  %v2205_v24 = vshll.u32 %v7062_v48, 16 }
  0xbe   : > { %v1091_v27 = vld [vmem:[#allocation5 + $0x38] sm:$0x1]  ;;  %v1089_v28 = vsel %vm6772_vm9, 0, %v1088_v17  ;;  %1580 = vrot.lane.b32.xlu0 %v6303_v12, %s6442_s16  ;;  %1911 = vrot.lane.b32.xlu1 %v1855_v22, %s6443_s17  ;;  %v1871_v12 = vshrl.u32 %v7049_v34, 16  ;;  %v2204_v17 = vrot.slane %v2202_v10, 7  ;;  %v7119_v43 = vld [vmem:[%s6544_s11 + $0x30] sm:$0xff]  }
  0xbf   : > { %v1092_v35 = vsel %vm6772_vm9, 0, %v1091_v27  ;;  %1090 = vst [vmem:[#allocation5 + $0x30] sm:$0x1] %v1089_v28  ;;  %v2211_v28 = vrot.slane %v2209_v15, 7  ;;  %v1941_v46 = vld [vmem:[#allocation5] sm:$0xff]  ;;  %v2692_v54 = vshrl.u32 %v7095_v8, 16 }
  0xc0   : > { %1093 = vst [vmem:[#allocation5 + $0x38] sm:$0x1] %v1092_v35  ;;  %v678_v38 = vpop.permute.xlu0 %677  ;;  %v680_v39 = vpop.permute.xlu1 %679  ;;  %v1876_v35 = vor.u32 %v1875_v40, %v1871_v12  ;;  %v2207_v41 = vor.u32 %v2205_v24, %v2204_v17  ;;  %v6320_v12 = vld [vmem:[%s6544_s11 + $0x50] sm:$0xff]   ;;  %v2699_v15 = vshrl.u32 %v7119_v43, 16  ;;  %v7165_v24 = vld [vmem:[%s6544_s11 + $0x38] sm:$0xff]  }
  0xc1   : > { %711 = vst.msk [vmem:[#allocation5 + $0x60] sm:$0xff] %vm548_vm1, %v678_v38  ;;  %712 = vst.msk [vmem:[#allocation5 + $0x68] sm:$0xff] %vm548_vm1, %v680_v39  ;;  %v7113_v38 = vld [vmem:[%s6544_s11 + $0x70] sm:$0xff]  }
  0xc2   : > { %1913 = vrot.lane.b32.xlu0 %v1862_v29, %s6443_s17  ;;  %2262 = vrot.lane.b32.xlu1 %v2193_v37, %s6444_s23  ;;  %v2212_v29 = vshll.u32 %v7068_v55, 16  ;;  %v2694_v37 = vshll.u32 %v7095_v8, 16  ;;  %v1944_v48 = vld [vmem:[#allocation5 + $0x8] sm:$0xff]  ;;  %v1050_v7 = vld [vmem:[#allocation5 + $0x50] sm:$0xff]  ;;  %v969_v40 = vshrl.u32 %v7113_v38, 16 }
  0xc4   : > { %v1625_v50 = vld [vmem:[#allocation5 + $0x10] sm:$0x80]  ;;  %v990_v51 = vpop.permute.xlu0 %989  ;;  %v1628_v57 = vld [vmem:[#allocation5 + $0x18] sm:$0x80]  ;;  %v992_v59 = vpop.permute.xlu1 %991  ;;  %v2696_v55 = vrot.slane %v2694_v37, 1 }
  0xc5   : > { %v1626_v58 = vsel %vm6987_vm8, 0, %v1625_v50  ;;  %v1045_v62 = vsel %vm6863_vm14, %v990_v51, %v1044_v53  ;;  %v1629_v0 = vsel %vm6987_vm8, 0, %v1628_v57  ;;  %v1048_v1 = vsel %vm6863_vm14, %v992_v59, %v1047_v61  ;;  %v6317_v53 = vld [vmem:[%s6544_s11 + $0x48] sm:$0xff]   ;;  %v7135_v59 = vld [vmem:[%s6544_s11 + $0x58] sm:$0xff]  }
  0xc6   : > { %1627 = vst [vmem:[#allocation5 + $0x10] sm:$0x80] %v1626_v58  ;;  %1046 = vst [vmem:[#allocation5 + $0x40] sm:$0xff] %v1045_v62  ;;  %2264 = vrot.lane.b32.xlu0 %v2200_v45, %s6444_s23  ;;  %2461 = vrot.lane.b32.xlu1 %v6308_v44, %s6445_s25  ;;  %v7122_v44 = vld [vmem:[%s6544_s11 + $0x70] sm:$0xff]   ;;  %v2214_v50 = vor.u32 %v2212_v29, %v2211_v28  ;;  %v971_v57 = vshll.u32 %v7113_v38, 16  ;;  %v2701_v58 = vshll.u32 %v7119_v43, 16 }
  0xc7   : > { %1630 = vst [vmem:[#allocation5 + $0x18] sm:$0x80] %v1629_v0  ;;  %1049 = vst [vmem:[#allocation5 + $0x48] sm:$0xff] %v1048_v1  ;;  %v7139_v0 = vld [vmem:[%s6544_s11 + $0x60] sm:$0xff]   ;;  %v2219_v38 = vshll.u32 %v7135_v59, 16  ;;  %v6346_v43 = vld [vmem:[%s6544_s11 + $0x70] sm:$0xff]  }
  0xc8   : > { %v753_v2 = vld [vmem:[#allocation5 + $0x60] sm:$0x80]  ;;  %v1351_v13 = vpop.permute.xlu0 %1350  ;;  %v756_v16 = vld [vmem:[#allocation5 + $0x68] sm:$0x80]  ;;  %v1353_v19 = vpop.permute.xlu1 %1352  ;;  %v2223_v17 = vshrl.u32 %v7139_v0, 16 }
  0xc9   : > { %v754_v18 = vsel %vm6831_vm12, 0, %v753_v2  ;;  %v1405_v21 = vsel %vm6921_vm0, %v1351_v13, %v1404_v14  ;;  %v757_v22 = vsel %vm6831_vm12, 0, %v756_v16  ;;  %v1408_v23 = vsel %vm6921_vm0, %v1353_v19, %v1407_v20  ;;  %v1053_v20 = vld [vmem:[#allocation5 + $0x58] sm:$0xff]  ;;  %v7173_v29 = vld [vmem:[%s6544_s11 + $0x40] sm:$0xff]  }
  0xca   : > { %755 = vst [vmem:[#allocation5 + $0x60] sm:$0x80] %v754_v18  ;;  %1406 = vst [vmem:[#allocation5 + $0x20] sm:$0xff] %v1405_v21  ;;  %2463 = vrot.lane.b32.xlu0 %v6311_v5, %s6445_s25  ;;  %2772 = vrot.lane.b32.xlu1 %v2683_v63, %s6446_s26  ;;  %v1880_v63 = vshll.u32 %v7122_v44, 16  ;;  %v973_v2 = vrot.slane %v971_v57, 1  ;;  %v2697_v14 = vor.u32 %v2696_v55, %v2692_v54  ;;  %v2703_v16 = vrot.slane %v2701_v58, 1 }
  0xcb   : > { %758 = vst [vmem:[#allocation5 + $0x68] sm:$0x80] %v757_v22  ;;  %1409 = vst [vmem:[#allocation5 + $0x28] sm:$0xff] %v1408_v23  ;;  %v2216_v18 = vshrl.u32 %v7135_v59, 16  ;;  %v1878_v21 = vshrl.u32 %v7122_v44, 16  ;;  %v2708_v54 = vshll.u32 %v7165_v24, 16 }
  0xcc   : > { %v1561_v25 = vpop.permute.xlu0 %1560  ;;  %v1563_v27 = vpop.permute.xlu1 %1562  ;;  %v974_v28 = vor.u32 %v973_v2, %v969_v40  ;;  %v7192_v55 = vld [vmem:[%s6544_s11 + $0x68] sm:$0xff]   ;;  %v2715_v57 = vshll.u32 %v7173_v29, 16  ;;  %v7211_v2 = vld [vmem:[%s6544_s11 + $0x70] sm:$0xff]  }
  0xcd   : > { %v1094_v26 = vld [vmem:[#allocation5 + $0x40] sm:$0x1]  ;;  %1605 = vst.msk [vmem:[#allocation5 + $0x20] sm:$0xff] %vm1600_vm2, %v1561_v25  ;;  %1606 = vst.msk [vmem:[#allocation5 + $0x28] sm:$0xff] %vm1600_vm2, %v1563_v27  ;;  %v2218_v37 = vrot.slane %v2216_v18, 7 }
  0xce   : > { %v1097_v32 = vld [vmem:[#allocation5 + $0x48] sm:$0x1]  ;;  %v1095_v33 = vsel %vm6772_vm9, 0, %v1094_v26  ;;  %2774 = vrot.lane.b32.xlu0 %v2690_v56, %s6446_s26  ;;  %1915 = vrot.lane.b32.xlu1 %v1869_v3, %s6443_s17  ;;  %v1410_v56 = vld [vmem:[#allocation5 + $0x30] sm:$0xff]  ;;  %v1882_v3 = vrot.slane %v1880_v63, 1 }
  0xcf   : > { %v1098_v39 = vsel %vm6772_vm9, 0, %v1097_v32  ;;  %1096 = vst [vmem:[#allocation5 + $0x40] sm:$0x1] %v1095_v33  ;;  %v1413_v33 = vld [vmem:[#allocation5 + $0x38] sm:$0xff]  ;;  %v1947_v63 = vld [vmem:[#allocation5 + $0x10] sm:$0xff] }
  0xd0   : > { %1099 = vst [vmem:[#allocation5 + $0x48] sm:$0x1] %v1098_v39  ;;  %v1892_v45 = vpop.permute.xlu0 %1891  ;;  %v1894_v47 = vpop.permute.xlu1 %1893 }
  0xd1   : > { %v1942_v49 = vsel %vm7107_vm15, %v1892_v45, %v1941_v46  ;;  %v1945_v51 = vsel %vm7107_vm15, %v1894_v47, %v1944_v48  ;;  %v2225_v47 = vrot.slane %v2223_v17, 7  ;;  %v2226_v48 = vshll.u32 %v7139_v0, 16 }
  0xd2   : > { %1943 = vst [vmem:[#allocation5] sm:$0xff] %v1942_v49  ;;  %1917 = vrot.lane.b32.xlu0 %v1876_v35, %s6443_s17  ;;  %1946 = vst [vmem:[#allocation5 + $0x8] sm:$0xff] %v1945_v51  ;;  %2266 = vrot.lane.b32.xlu1 %v2207_v41, %s6444_s23  ;;  %v2704_v35 = vor.u32 %v2703_v16, %v2699_v15  ;;  %v272_v49 = vld [vmem:[#allocation5 + $0x78] sm:$0x1]  ;;  %v2710_v15 = vrot.slane %v2708_v54, 1  ;;  %v2230_v16 = vshrl.u32 %v7192_v55, 16 }
  0xd3   : > { %v273_v58 = vsel %vm6653_vm5, 0, %v272_v49  ;;  %v2228_v40 = vor.u32 %v2226_v48, %v2225_v47  ;;  %vm1990_vm5 = vcmask 228544  }
  0xd4   : > { %v1631_v61 = vld [vmem:[#allocation5 + $0x20] sm:$0x80]  ;;  %v682_v62 = vpop.permute.xlu0 %681  ;;  %v1634_v1 = vld [vmem:[#allocation5 + $0x28] sm:$0x80]  ;;  %v994_v6 = vpop.permute.xlu1 %993  ;;  %274 = vst [vmem:[#allocation5 + $0x78] sm:$0x1] %v273_v58 }
  0xd5   : > { %v1632_v5 = vsel %vm6987_vm8, 0, %v1631_v61  ;;  %713 = vst.msk [vmem:[#allocation5 + $0x70] sm:$0xff] %vm548_vm1, %v682_v62  ;;  %v1635_v9 = vsel %vm6987_vm8, 0, %v1634_v1  ;;  %v1051_v10 = vsel %vm6863_vm14, %v994_v6, %v1050_v7  ;;  %v2221_v61 = vor.u32 %v2219_v38, %v2218_v37  ;;  %v7234_v37 = vld [vmem:[%s6544_s11 + $0x48] sm:$0xff]   ;;  %v6335_v58 = vld [vmem:[%s6544_s11 + $0x78] sm:$0xff]  }
  0xd6   : > { %1633 = vst [vmem:[#allocation5 + $0x20] sm:$0x80] %v1632_v5  ;;  %2268 = vrot.lane.b32.xlu0 %v2214_v50, %s6444_s23  ;;  %1636 = vst [vmem:[#allocation5 + $0x28] sm:$0x80] %v1635_v9  ;;  %2465 = vrot.lane.b32.xlu1 %v6317_v53, %s6445_s25  ;;  %v6347_v50 = vld [vmem:[%s8823_s1] sm:$0xff]   ;;  %v1883_v53 = vor.u32 %v1882_v3, %v1878_v21  ;;  %v479_v62 = vshrl.u32 %v6346_v43, 16 }
  0xd7   : > { %1052 = vst [vmem:[#allocation5 + $0x50] sm:$0xff] %v1051_v10  ;;  %6069 = vmatprep.subr.bf16.mxu0 %v6347_v50  ;;  %v482_v1 = vshll.u32 %v6346_v43, 16  ;;  %v6348_v9 = vld [vmem:[%s8823_s1 + $0x8] sm:$0xff]   ;;  %v1950_v21 = vld [vmem:[#allocation5 + $0x18] sm:$0xff]  ;;  %v2713_v3 = vshrl.u32 %v7173_v29, 16 }
  0xd8   : > { %v996_v19 = vpop.permute.xlu0 %995  ;;  %v1355_v23 = vpop.permute.xlu1 %1354  ;;  %6070 = vmatpush3.bf16.msra.mxu0 %v6347_v50  ;;  %v481_v7 = vrot.slane %v479_v62, 7  ;;  %v1059_v43 = vld [vmem:[#allocation5 + $0x68] sm:$0xff] }
  0xd9   : > { %v1994_v22 = vld [vmem:[#allocation5] sm:$0x1]  ;;  %v1054_v8 = vsel %vm6863_vm14, %v996_v19, %v1053_v20  ;;  %v1997_v25 = vld [vmem:[#allocation5 + $0x8] sm:$0x1]  ;;  %v1411_v27 = vsel %vm6921_vm0, %v1355_v23, %v1410_v56  ;;  %6071 = vmatprep.subr.bf16.mxu0 %v6348_v9 }
  0xda   : > { %v1995_v26 = vsel %vm7153_vm11, 0, %v1994_v22  ;;  %1055 = vst [vmem:[#allocation5 + $0x58] sm:$0xff] %v1054_v8  ;;  %2467 = vrot.lane.b32.xlu0 %v6320_v12, %s6445_s25  ;;  %v1998_v32 = vsel %vm7153_vm11, 0, %v1997_v25  ;;  %1412 = vst [vmem:[#allocation5 + $0x30] sm:$0xff] %v1411_v27  ;;  %2776 = vrot.lane.b32.xlu1 %v2697_v14, %s6446_s26  ;;  %v2706_v14 = vshrl.u32 %v7165_v24, 16  ;;  %v484_v18 = vor.u32 %v482_v1, %v481_v7  ;;  %v1056_v56 = vld [vmem:[#allocation5 + $0x60] sm:$0xff] }
  0xdb   : > { %1996 = vst [vmem:[#allocation5] sm:$0x1] %v1995_v26  ;;  %1999 = vst [vmem:[#allocation5 + $0x8] sm:$0x1] %v1998_v32  ;;  %v6328_v26 = vld [vmem:[%s6544_s11 + $0x60] sm:$0xff]   ;;  %v2717_v27 = vrot.slane %v2715_v57, 1 }
  0xdc   : > { %v759_v39 = vld [vmem:[#allocation5 + $0x70] sm:$0x80]  ;;  %v1357_v41 = vpop.permute.xlu0 %1356  ;;  %v1565_v45 = vpop.permute.xlu1 %1564  ;;  %v6349_v19 = vld [vmem:[%s8823_s1 + $0x10] ss:$0 sps:$4 sm:$0x33]   ;;  %6072 = vmatpush3.bf16.msra.mxu0 %v6348_v9  ;;  %v545_v32 = vld [vmem:[#allocation5 + $0x78] sm:$0xff]  ;;  %v2711_v29 = vor.u32 %v2710_v15, %v2706_v14 }
  0xdd   : > { %v760_v44 = vsel %vm6831_vm12, 0, %v759_v39  ;;  %v1414_v46 = vsel %vm6921_vm0, %v1357_v41, %v1413_v33  ;;  %1607 = vst.msk [vmem:[#allocation5 + $0x30] sm:$0xff] %vm1600_vm2, %v1565_v45  ;;  %6149 = vmatprep.subr.msk.bf16.mxu0 %vm2945_vm3, %v6349_v19  ;;  %v2947_v17 = vsel %vm2945_vm3, %v6349_v19, 0  ;;  %v2232_v33 = vrot.slane %v2230_v16, 7  ;;  %v7259_v7 = vld [vmem:[%s6544_s11 + $0x78] sm:$0xff]  }
  0xde   : > { %v1100_v51 = vld [vmem:[#allocation5 + $0x50] sm:$0x1]  ;;  %761 = vst [vmem:[#allocation5 + $0x70] sm:$0x80] %v760_v44  ;;  %1415 = vst [vmem:[#allocation5 + $0x38] sm:$0xff] %v1414_v46  ;;  %1003 = vrot.lane.b32.xlu0 %v974_v28, %s6439_s14  ;;  %2778 = vrot.lane.b32.xlu1 %v2704_v35, %s6446_s26  ;;  %v2237_v28 = vshrl.u32 %v7211_v2, 16  ;;  %v546_v38 = vsel %vm6682_vm7, %v484_v18, %v545_v32  ;;  %v2718_v49 = vor.u32 %v2717_v27, %v2713_v3 }
  0xdf   : > { %v1101_v59 = vsel %vm6772_vm9, 0, %v1100_v51  ;;  %v2233_v35 = vshll.u32 %v7192_v55, 16  ;;  %547 = vst [vmem:[#allocation5 + $0x78] sm:$0xff] %v546_v38  ;;  %v1416_v46 = vld [vmem:[#allocation5 + $0x40] sm:$0xff]  ;;  %v2240_v51 = vshll.u32 %v7211_v2, 16  ;;  %v2722_v57 = vshll.u32 %v7234_v37, 16  ;;  %vm7277_vm7 = vmand %vm1990_vm5, %vm8828_vm6 }
  0xe0   : > { %1102 = vst [vmem:[#allocation5 + $0x50] sm:$0x1] %v1101_v59  ;;  %v1567_v0 = vpop.permute.xlu0 %1566  ;;  %v1896_v6 = vpop.permute.xlu1 %1895  ;;  %6074 = vmatpush3.bf16.msra.mxu0 %v2947_v17  ;;  %v2239_v50 = vrot.slane %v2237_v28, 7  ;;  %v1336_v2 = vshrl.u32 %v6335_v58, 16  ;;  %v1953_v18 = vld [vmem:[#allocation5 + $0x20] sm:$0xff]  ;;  %v1956_v27 = vld [vmem:[#allocation5 + $0x28] sm:$0xff] }
  0xe1   : > { %v1103_v5 = vld [vmem:[#allocation5 + $0x58] sm:$0x1]  ;;  %1608 = vst.msk [vmem:[#allocation5 + $0x38] sm:$0xff] %vm1600_vm2, %v1567_v0  ;;  %v1948_v12 = vsel %vm7107_vm15, %v1896_v6, %v1947_v63  ;;  %v2235_v55 = vor.u32 %v2233_v35, %v2232_v33  ;;  %v2247_v35 = vshll.u32 %v7259_v7, 16  ;;  %vm2342_vm3 = vcmask 261344  }
  0xe2   : > { %v1104_v10 = vsel %vm6772_vm9, 0, %v1103_v5  ;;  %1919 = vrot.lane.b32.xlu0 %v1883_v53, %s6443_s17  ;;  %1949 = vst [vmem:[#allocation5 + $0x10] sm:$0xff] %v1948_v12  ;;  %2270 = vrot.lane.b32.xlu1 %v2221_v61, %s6444_s23  ;;  %v6336_v53 = vld [vmem:[%s6544_s11 + $0x50] sm:$0xff]   ;;  %v1419_v61 = vld [vmem:[#allocation5 + $0x48] sm:$0xff]  ;;  %v2242_v6 = vor.u32 %v2240_v51, %v2239_v50  ;;  %v2720_v12 = vshrl.u32 %v7234_v37, 16  ;;  %v1338_v17 = vrot.slane %v1336_v2, 7 }
  0xe3   : > { %1105 = vst [vmem:[#allocation5 + $0x58] sm:$0x1] %v1104_v10  ;;  %v6331_v10 = vld [vmem:[%s6544_s11 + $0x68] sm:$0xff]   ;;  %v2727_v19 = vshrl.u32 %v6336_v53, 16  ;;  %vm2511_vm6 = vcmask 294151   ;;  %v6340_v2 = vld [vmem:[%s6544_s11 + $0x78] sm:$0xff]  }
  0xe4   : > { %v1898_v20 = vpop.permute.xlu0 %1897  ;;  %v1637_v22 = vld [vmem:[#allocation5 + $0x30] sm:$0x80]  ;;  %v998_v23 = vpop.permute.xlu1 %997  ;;  %v2300_v51 = vld [vmem:[#allocation5 + $0x8] sm:$0xff]  ;;  %vm7336_vm4 = vmand %vm2511_vm6, %vm8830_vm10  ;;  %vm2509_vm6 = vcmask 294144  }
  0xe5   : > { %v1951_v8 = vsel %vm7107_vm15, %v1898_v20, %v1950_v21  ;;  %v1638_v24 = vsel %vm6987_vm8, 0, %v1637_v22  ;;  %v1057_v25 = vsel %vm6863_vm14, %v998_v23, %v1056_v56  ;;  %v6334_v22 = vld [vmem:[%s6544_s11 + $0x70] sm:$0xff]   ;;  %v2244_v56 = vshrl.u32 %v7259_v7, 16  ;;  %vm7406_vm10 = vmand %vm2509_vm6, %vm1021_vm13 }
  0xe6   : > { %1952 = vst [vmem:[#allocation5 + $0x18] sm:$0xff] %v1951_v8  ;;  %2272 = vrot.lane.b32.xlu0 %v2228_v40, %s6444_s23  ;;  %1639 = vst [vmem:[#allocation5 + $0x30] sm:$0x80] %v1638_v24  ;;  %2469 = vrot.lane.b32.xlu1 %v6325_v4, %s6445_s25  ;;  %v2729_v4 = vshll.u32 %v6336_v53, 16  ;;  %v2724_v40 = vrot.slane %v2722_v57, 1  ;;  %v1339_v24 = vshll.u32 %v6335_v58, 16 }
  0xe7   : > { %1058 = vst [vmem:[#allocation5 + $0x60] sm:$0xff] %v1057_v25  ;;  %v7282_v25 = vld [vmem:[%s6544_s11 + $0x58] sm:$0xff]  }
  0xe8   : > { %v1640_v39 = vld [vmem:[#allocation5 + $0x38] sm:$0x80]  ;;  %v1000_v41 = vpop.permute.xlu0 %999  ;;  %v1359_v45 = vpop.permute.xlu1 %1358  ;;  %v2731_v23 = vrot.slane %v2729_v4, 1  ;;  %v2725_v3 = vor.u32 %v2724_v40, %v2720_v12 }
  0xe9   : > { %v1641_v44 = vsel %vm6987_vm8, 0, %v1640_v39  ;;  %v1060_v47 = vsel %vm6863_vm14, %v1000_v41, %v1059_v43  ;;  %v2000_v48 = vld [vmem:[#allocation5 + $0x10] sm:$0x1]  ;;  %v1417_v31 = vsel %vm6921_vm0, %v1359_v45, %v1416_v46  ;;  %v2246_v41 = vrot.slane %v2244_v56, 7  ;;  %v7293_v43 = vld [vmem:[%s6544_s11 + $0x60] sm:$0xff]   ;;  %v7298_v46 = vld [vmem:[%s6544_s11 + $0x68] sm:$0xff]  }
  0xea   : > { %1642 = vst [vmem:[#allocation5 + $0x38] sm:$0x80] %v1641_v44  ;;  %1061 = vst [vmem:[#allocation5 + $0x68] sm:$0xff] %v1060_v47  ;;  %2471 = vrot.lane.b32.xlu0 %v6328_v26, %s6445_s25  ;;  %v2001_v54 = vsel %vm7153_vm11, 0, %v2000_v48  ;;  %2780 = vrot.lane.b32.xlu1 %v2711_v29, %s6446_s26  ;;  %v2297_v29 = vld [vmem:[#allocation5] sm:$0xff]  ;;  %v2732_v39 = vor.u32 %v2731_v23, %v2727_v19  ;;  %v1341_v44 = vor.u32 %v1339_v24, %v1338_v17 }
  0xeb   : > { %1418 = vst [vmem:[#allocation5 + $0x40] sm:$0xff] %v1417_v31  ;;  %2002 = vst [vmem:[#allocation5 + $0x10] sm:$0x1] %v2001_v54  ;;  %v2736_v45 = vshll.u32 %v7282_v25, 16  ;;  %v1062_v31 = vld [vmem:[#allocation5 + $0x70] sm:$0xff]  ;;  %v2249_v58 = vor.u32 %v2247_v35, %v2246_v41  ;;  %v2748_v19 = vshrl.u32 %v7298_v46, 16 }
  0xec   : > { %v1361_v59 = vpop.permute.xlu0 %1360  ;;  %v1569_v63 = vpop.permute.xlu1 %1568  ;;  %v7305_v54 = vld [vmem:[%s6544_s11 + $0x70] sm:$0xff]  }
  0xed   : > { %v2003_v62 = vld [vmem:[#allocation5 + $0x18] sm:$0x1]  ;;  %v1420_v0 = vsel %vm6921_vm0, %v1361_v59, %v1419_v61  ;;  %1609 = vst.msk [vmem:[#allocation5 + $0x40] sm:$0xff] %vm1600_vm2, %v1569_v63  ;;  %v2743_v61 = vshll.u32 %v7293_v43, 16  ;;  %v2734_v63 = vshrl.u32 %v7282_v25, 16  ;;  %v2755_v17 = vshrl.u32 %v7305_v54, 16 }
  0xee   : > { %v1106_v1 = vld [vmem:[#allocation5 + $0x60] sm:$0x1]  ;;  %v2004_v5 = vsel %vm7153_vm11, 0, %v2003_v62  ;;  %1421 = vst [vmem:[#allocation5 + $0x48] sm:$0xff] %v1420_v0  ;;  %2782 = vrot.lane.b32.xlu0 %v2718_v49, %s6446_s26  ;;  %2274 = vrot.lane.b32.xlu1 %v2235_v55, %s6444_s23  ;;  %v6338_v59 = vld [vmem:[%s6544_s11 + $0x78] sm:$0xff]   ;;  %v2738_v0 = vrot.slane %v2736_v45, 1 }
  0xef   : > { %v1107_v9 = vsel %vm6772_vm9, 0, %v1106_v1  ;;  %2005 = vst [vmem:[#allocation5 + $0x18] sm:$0x1] %v2004_v5  ;;  %v2750_v1 = vshll.u32 %v7298_v46, 16  ;;  %v6344_v5 = vld [vmem:[%s6544_s11 + $0x78] sm:$0xff]  }
  0xf0   : > { %1108 = vst [vmem:[#allocation5 + $0x60] sm:$0x1] %v1107_v9  ;;  %v1571_v14 = vpop.permute.xlu0 %1570  ;;  %v1900_v16 = vpop.permute.xlu1 %1899  ;;  %v1422_v9 = vld [vmem:[#allocation5 + $0x50] sm:$0xff] }
  0xf1   : > { %v1109_v15 = vld [vmem:[#allocation5 + $0x68] sm:$0x1]  ;;  %1610 = vst.msk [vmem:[#allocation5 + $0x48] sm:$0xff] %vm1600_vm2, %v1571_v14  ;;  %v1954_v21 = vsel %vm7107_vm15, %v1900_v16, %v1953_v18  ;;  %v2741_v14 = vshrl.u32 %v7293_v43, 16  ;;  %v6345_v16 = vld [vmem:[%s6544_s11 + $0x78] sm:$0xff]   ;;  %v2739_v18 = vor.u32 %v2738_v0, %v2734_v63 }
  0xf2   : > { %v1110_v20 = vsel %vm6772_vm9, 0, %v1109_v15  ;;  %2276 = vrot.lane.b32.xlu0 %v2242_v6, %s6444_s23  ;;  %1955 = vst [vmem:[#allocation5 + $0x20] sm:$0xff] %v1954_v21  ;;  %2473 = vrot.lane.b32.xlu1 %v6331_v10, %s6445_s25  ;;  %v2757_v10 = vshll.u32 %v7305_v54, 16  ;;  %v2745_v15 = vrot.slane %v2743_v61, 1  ;;  %v1887_v21 = vshll.u32 %v6344_v5, 16 }
  0xf3   : > { %1111 = vst [vmem:[#allocation5 + $0x68] sm:$0x1] %v1110_v20  ;;  %v2752_v20 = vrot.slane %v2750_v1, 1 }
  0xf4   : > { %v1902_v26 = vpop.permute.xlu0 %1901  ;;  %v1643_v28 = vld [vmem:[#allocation5 + $0x40] sm:$0x80]  ;;  %v2251_v32 = vpop.permute.xlu1 %2250  ;;  %v2759_v24 = vrot.slane %v2757_v10, 1  ;;  %v1889_v35 = vrot.slane %v1887_v21, 1 }
  0xf5   : > { %v1957_v33 = vsel %vm7107_vm15, %v1902_v26, %v1956_v27  ;;  %v1644_v37 = vsel %vm6987_vm8, 0, %v1643_v28  ;;  %v2298_v38 = vsel %vm7277_vm7, %v2251_v32, %v2297_v29  ;;  %v2746_v28 = vor.u32 %v2745_v15, %v2741_v14 }
  0xf6   : > { %1958 = vst [vmem:[#allocation5 + $0x28] sm:$0xff] %v1957_v33  ;;  %2475 = vrot.lane.b32.xlu0 %v6334_v22, %s6445_s25  ;;  %1645 = vst [vmem:[#allocation5 + $0x40] sm:$0x80] %v1644_v37  ;;  %2784 = vrot.lane.b32.xlu1 %v2725_v3, %s6446_s26  ;;  %v1425_v3 = vld [vmem:[#allocation5 + $0x58] sm:$0xff]  ;;  %v2764_v32 = vshll.u32 %v6345_v16, 16  ;;  %v2753_v29 = vor.u32 %v2752_v20, %v2748_v19  ;;  %v1885_v33 = vshrl.u32 %v6344_v5, 16 }
  0xf7   : > { %2299 = vst [vmem:[#allocation5] sm:$0xff] %v2298_v38  ;;  %v2760_v43 = vor.u32 %v2759_v24, %v2755_v17  ;;  %v2306_v0 = vld [vmem:[#allocation5 + $0x18] sm:$0xff]  ;;  %v1428_v10 = vld [vmem:[#allocation5 + $0x60] sm:$0xff] }
  0xf8   : > { %v1646_v47 = vld [vmem:[#allocation5 + $0x48] sm:$0x80]  ;;  %v1002_v48 = vpop.permute.xlu0 %1001  ;;  %v2253_v50 = vpop.permute.xlu1 %2252  ;;  %v2766_v45 = vrot.slane %v2764_v32, 1  ;;  %v1890_v46 = vor.u32 %v1889_v35, %v1885_v33 }
  0xf9   : > { %v1647_v49 = vsel %vm6987_vm8, 0, %v1646_v47  ;;  %v1063_v53 = vsel %vm6863_vm14, %v1002_v48, %v1062_v31  ;;  %v2006_v55 = vld [vmem:[#allocation5 + $0x20] sm:$0x1]  ;;  %v2301_v57 = vsel %vm7277_vm7, %v2253_v50, %v2300_v51  ;;  %v1959_v31 = vld [vmem:[#allocation5 + $0x30] sm:$0xff]  ;;  %v1962_v51 = vld [vmem:[#allocation5 + $0x38] sm:$0xff] }
  0xfa   : > { %1648 = vst [vmem:[#allocation5 + $0x48] sm:$0x80] %v1647_v49  ;;  %1064 = vst [vmem:[#allocation5 + $0x70] sm:$0xff] %v1063_v53  ;;  %2786 = vrot.lane.b32.xlu0 %v2732_v39, %s6446_s26  ;;  %v2007_v62 = vsel %vm7153_vm11, 0, %v2006_v55  ;;  %1372 = vrot.lane.b32.xlu1 %v1341_v44, %s6440_s15  ;;  %v2762_v44 = vshrl.u32 %v6345_v16, 16 }
  0xfb   : > { %2302 = vst [vmem:[#allocation5 + $0x8] sm:$0xff] %v2301_v57  ;;  %2008 = vst [vmem:[#allocation5 + $0x20] sm:$0x1] %v2007_v62 }
  0xfc   : > { %v2450_v6 = vpop.permute.xlu0 %2449  ;;  %v1363_v7 = vpop.permute.xlu1 %1362  ;;  %v2767_v55 = vor.u32 %v2766_v45, %v2762_v44 }
  0xfd   : > { %v2009_v4 = vld [vmem:[#allocation5 + $0x28] sm:$0x1]  ;;  %2494 = vst.msk [vmem:[#allocation5] sm:$0xff] %vm2342_vm3, %v2450_v6  ;;  %v1423_v40 = vsel %vm6921_vm0, %v1363_v7, %v1422_v9  ;;  %v1965_v17 = vld [vmem:[#allocation5 + $0x40] sm:$0xff] }
  0xfe   : > { %v2010_v12 = vsel %vm7153_vm11, 0, %v2009_v4  ;;  %1582 = vrot.lane.b32.xlu0 %v6338_v59, %s6442_s16  ;;  %1424 = vst [vmem:[#allocation5 + $0x50] sm:$0xff] %v1423_v40  ;;  %2278 = vrot.lane.b32.xlu1 %v2249_v58, %s6444_s23  ;;  %v2303_v59 = vld [vmem:[#allocation5 + $0x10] sm:$0xff] }
  0xff   : > { %2011 = vst [vmem:[#allocation5 + $0x28] sm:$0x1] %v2010_v12 }
 0x100   : > { %v2452_v22 = vpop.permute.xlu0 %2451  ;;  %v1365_v56 = vpop.permute.xlu1 %1364 }
 0x101   : > { %v1112_v23 = vld [vmem:[#allocation5 + $0x70] sm:$0x1]  ;;  %2495 = vst.msk [vmem:[#allocation5 + $0x8] sm:$0xff] %vm2342_vm3, %v2452_v22  ;;  %v1426_v27 = vsel %vm6921_vm0, %v1365_v56, %v1425_v3 }
 0x102   : > { %v1113_v25 = vsel %vm6772_vm9, 0, %v1112_v23  ;;  %2477 = vrot.lane.b32.xlu0 %v6340_v2, %s6445_s25  ;;  %1427 = vst [vmem:[#allocation5 + $0x58] sm:$0xff] %v1426_v27  ;;  %2788 = vrot.lane.b32.xlu1 %v2739_v18, %s6446_s26  ;;  %v1431_v18 = vld [vmem:[#allocation5 + $0x68] sm:$0xff]  ;;  %v2309_v35 = vld [vmem:[#allocation5 + $0x20] sm:$0xff] }
 0x103   : > { %1114 = vst [vmem:[#allocation5 + $0x70] sm:$0x1] %v1113_v25  ;;  %v1968_v27 = vld [vmem:[#allocation5 + $0x48] sm:$0xff] }
 0x104   : > { %v2513_v37 = vld [vmem:[#allocation5] sm:$0x80]  ;;  %v1573_v38 = vpop.permute.xlu0 %1572  ;;  %v1575_v41 = vpop.permute.xlu1 %1574 }
 0x105   : > { %v2514_v39 = vsel %vm7336_vm4, 0, %v2513_v37  ;;  %1611 = vst.msk [vmem:[#allocation5 + $0x50] sm:$0xff] %vm1600_vm2, %v1573_v38  ;;  %1612 = vst.msk [vmem:[#allocation5 + $0x58] sm:$0xff] %vm1600_vm2, %v1575_v41 }
 0x106   : > { %2515 = vst [vmem:[#allocation5] sm:$0x80] %v2514_v39  ;;  %2790 = vrot.lane.b32.xlu0 %v2746_v28, %s6446_s26  ;;  %2792 = vrot.lane.b32.xlu1 %v2753_v29, %s6446_s26  ;;  %v2312_v41 = vld [vmem:[#allocation5 + $0x28] sm:$0xff] }
 0x108   : > { %v2516_v47 = vld [vmem:[#allocation5 + $0x8] sm:$0x80]  ;;  %v1904_v48 = vpop.permute.xlu0 %1903  ;;  %v1906_v50 = vpop.permute.xlu1 %1905 }
 0x109   : > { %v2517_v49 = vsel %vm7336_vm4, 0, %v2516_v47  ;;  %v1960_v53 = vsel %vm7107_vm15, %v1904_v48, %v1959_v31  ;;  %v1963_v54 = vsel %vm7107_vm15, %v1906_v50, %v1962_v51 }
 0x10a   : > { %2518 = vst [vmem:[#allocation5 + $0x8] sm:$0x80] %v2517_v49  ;;  %1961 = vst [vmem:[#allocation5 + $0x30] sm:$0xff] %v1960_v53  ;;  %2794 = vrot.lane.b32.xlu0 %v2760_v43, %s6446_s26  ;;  %1921 = vrot.lane.b32.xlu1 %v1890_v46, %s6443_s17  ;;  %v1434_v53 = vld [vmem:[#allocation5 + $0x70] sm:$0xff] }
 0x10b   : > { %1964 = vst [vmem:[#allocation5 + $0x38] sm:$0xff] %v1963_v54 }
 0x10c   : > { %v1649_v57 = vld [vmem:[#allocation5 + $0x50] sm:$0x80]  ;;  %v2255_v58 = vpop.permute.xlu0 %2254  ;;  %v1652_v61 = vld [vmem:[#allocation5 + $0x58] sm:$0x80]  ;;  %v2257_v63 = vpop.permute.xlu1 %2256 }
 0x10d   : > { %v1650_v62 = vsel %vm6987_vm8, 0, %v1649_v57  ;;  %v2304_v1 = vsel %vm7277_vm7, %v2255_v58, %v2303_v59  ;;  %v1653_v5 = vsel %vm6987_vm8, 0, %v1652_v61  ;;  %v2307_v6 = vsel %vm7277_vm7, %v2257_v63, %v2306_v0  ;;  %v2815_v61 = vld [vmem:[#allocation5] sm:$0xff] }
 0x10e   : > { %1651 = vst [vmem:[#allocation5 + $0x50] sm:$0x80] %v1650_v62  ;;  %2305 = vst [vmem:[#allocation5 + $0x10] sm:$0xff] %v2304_v1  ;;  %2796 = vrot.lane.b32.xlu0 %v2767_v55, %s6446_s26 }
 0x10f   : > { %1654 = vst [vmem:[#allocation5 + $0x58] sm:$0x80] %v1653_v5  ;;  %2308 = vst [vmem:[#allocation5 + $0x18] sm:$0xff] %v2307_v6 }
 0x110   : > { %v2454_v4 = vpop.permute.xlu0 %2453  ;;  %v1367_v9 = vpop.permute.xlu1 %1366 }
 0x111   : > { %v2012_v7 = vld [vmem:[#allocation5 + $0x30] sm:$0x1]  ;;  %2496 = vst.msk [vmem:[#allocation5 + $0x10] sm:$0xff] %vm2342_vm3, %v2454_v4  ;;  %v1429_v2 = vsel %vm6921_vm0, %v1367_v9, %v1428_v10  ;;  %v2818_v1 = vld [vmem:[#allocation5 + $0x8] sm:$0xff] }
 0x112   : > { %v2015_v12 = vld [vmem:[#allocation5 + $0x38] sm:$0x1]  ;;  %v2013_v40 = vsel %vm7153_vm11, 0, %v2012_v7  ;;  %1430 = vst [vmem:[#allocation5 + $0x60] sm:$0xff] %v1429_v2 }
 0x113   : > { %v2016_v14 = vsel %vm7153_vm11, 0, %v2015_v12  ;;  %2014 = vst [vmem:[#allocation5 + $0x30] sm:$0x1] %v2013_v40 }
 0x114   : > { %2017 = vst [vmem:[#allocation5 + $0x38] sm:$0x1] %v2016_v14  ;;  %v2456_v15 = vpop.permute.xlu0 %2455  ;;  %v1369_v16 = vpop.permute.xlu1 %1368 }
 0x115   : > { %2497 = vst.msk [vmem:[#allocation5 + $0x18] sm:$0xff] %vm2342_vm3, %v2456_v15  ;;  %v1432_v19 = vsel %vm6921_vm0, %v1369_v16, %v1431_v18  ;;  %v1971_v12 = vld [vmem:[#allocation5 + $0x50] sm:$0xff] }
 0x116   : > { %1433 = vst [vmem:[#allocation5 + $0x68] sm:$0xff] %v1432_v19  ;;  %v1974_v14 = vld [vmem:[#allocation5 + $0x58] sm:$0xff] }
 0x118   : > { %v2519_v20 = vld [vmem:[#allocation5 + $0x10] sm:$0x80]  ;;  %v1577_v21 = vpop.permute.xlu0 %1576  ;;  %v1579_v23 = vpop.permute.xlu1 %1578 }
 0x119   : > { %v2520_v22 = vsel %vm7336_vm4, 0, %v2519_v20  ;;  %1613 = vst.msk [vmem:[#allocation5 + $0x60] sm:$0xff] %vm1600_vm2, %v1577_v21  ;;  %1614 = vst.msk [vmem:[#allocation5 + $0x68] sm:$0xff] %vm1600_vm2, %v1579_v23 }
 0x11a   : > { %2521 = vst [vmem:[#allocation5 + $0x10] sm:$0x80] %v2520_v22  ;;  %v2315_v16 = vld [vmem:[#allocation5 + $0x30] sm:$0xff] }
 0x11b   : > { %v2318_v22 = vld [vmem:[#allocation5 + $0x38] sm:$0xff] }
 0x11c   : > { %v2522_v56 = vld [vmem:[#allocation5 + $0x18] sm:$0x80]  ;;  %v1908_v3 = vpop.permute.xlu0 %1907  ;;  %v1910_v25 = vpop.permute.xlu1 %1909 }
 0x11d   : > { %v2523_v24 = vsel %vm7336_vm4, 0, %v2522_v56  ;;  %v1966_v28 = vsel %vm7107_vm15, %v1908_v3, %v1965_v17  ;;  %v1969_v32 = vsel %vm7107_vm15, %v1910_v25, %v1968_v27 }
 0x11e   : > { %2524 = vst [vmem:[#allocation5 + $0x18] sm:$0x80] %v2523_v24  ;;  %1967 = vst [vmem:[#allocation5 + $0x40] sm:$0xff] %v1966_v28 }
 0x11f   : > { %1970 = vst [vmem:[#allocation5 + $0x48] sm:$0xff] %v1969_v32 }
 0x120   : > { %v1655_v29 = vld [vmem:[#allocation5 + $0x60] sm:$0x80]  ;;  %v2259_v33 = vpop.permute.xlu0 %2258  ;;  %v1658_v37 = vld [vmem:[#allocation5 + $0x68] sm:$0x80]  ;;  %v2261_v39 = vpop.permute.xlu1 %2260 }
 0x121   : > { %v1656_v38 = vsel %vm6987_vm8, 0, %v1655_v29  ;;  %v2310_v43 = vsel %vm7277_vm7, %v2259_v33, %v2309_v35  ;;  %v1659_v44 = vsel %vm6987_vm8, 0, %v1658_v37  ;;  %v2313_v45 = vsel %vm7277_vm7, %v2261_v39, %v2312_v41  ;;  %v2821_v32 = vld [vmem:[#allocation5 + $0x10] sm:$0xff] }
 0x122   : > { %1657 = vst [vmem:[#allocation5 + $0x60] sm:$0x80] %v1656_v38  ;;  %2311 = vst [vmem:[#allocation5 + $0x20] sm:$0xff] %v2310_v43 }
 0x123   : > { %1660 = vst [vmem:[#allocation5 + $0x68] sm:$0x80] %v1659_v44  ;;  %2314 = vst [vmem:[#allocation5 + $0x28] sm:$0xff] %v2313_v45 }
 0x124   : > { %v2458_v46 = vpop.permute.xlu0 %2457  ;;  %v684_v48 = vpop.permute.xlu1 %683 }
 0x125   : > { %v2018_v47 = vld [vmem:[#allocation5 + $0x40] sm:$0x1]  ;;  %2498 = vst.msk [vmem:[#allocation5 + $0x20] sm:$0xff] %vm2342_vm3, %v2458_v46  ;;  %v2824_v37 = vld [vmem:[#allocation5 + $0x18] sm:$0xff] }
 0x126   : > { %v2021_v31 = vld [vmem:[#allocation5 + $0x48] sm:$0x1]  ;;  %v2019_v49 = vsel %vm7153_vm11, 0, %v2018_v47  ;;  %714 = vst.msk [vmem:[#allocation5 + $0x78] sm:$0xff] %vm548_vm1, %v684_v48  ;;  %vm2896_vm1 = vcmask 293888  }
 0x127   : > { %v2022_v50 = vsel %vm7153_vm11, 0, %v2021_v31  ;;  %2020 = vst [vmem:[#allocation5 + $0x40] sm:$0x1] %v2019_v49 }
 0x128   : > { %2023 = vst [vmem:[#allocation5 + $0x48] sm:$0x1] %v2022_v50  ;;  %v1371_v51 = vpop.permute.xlu0 %1370  ;;  %v2460_v54 = vpop.permute.xlu1 %2459 }
 0x129   : > { %v1435_v55 = vsel %vm6921_vm0, %v1371_v51, %v1434_v53  ;;  %2499 = vst.msk [vmem:[#allocation5 + $0x28] sm:$0xff] %vm2342_vm3, %v2460_v54  ;;  %v1977_v41 = vld [vmem:[#allocation5 + $0x60] sm:$0xff] }
 0x12a   : > { %1436 = vst [vmem:[#allocation5 + $0x70] sm:$0xff] %v1435_v55  ;;  %v1980_v48 = vld [vmem:[#allocation5 + $0x68] sm:$0xff] }
 0x12c   : > { %v2525_v58 = vld [vmem:[#allocation5 + $0x20] sm:$0x80]  ;;  %v2769_v59 = vpop.permute.xlu0 %2768  ;;  %v2771_v0 = vpop.permute.xlu1 %2770 }
 0x12d   : > { %v762_v62 = vld [vmem:[#allocation5 + $0x78] sm:$0x80]  ;;  %v2526_v63 = vsel %vm7336_vm4, 0, %v2525_v58  ;;  %v2816_v5 = vsel %vm7406_vm10, %v2769_v59, %v2815_v61  ;;  %v2819_v4 = vsel %vm7406_vm10, %v2771_v0, %v2818_v1 }
 0x12e   : > { %v763_v6 = vsel %vm6831_vm12, 0, %v762_v62  ;;  %2527 = vst [vmem:[#allocation5 + $0x20] sm:$0x80] %v2526_v63  ;;  %2817 = vst [vmem:[#allocation5] sm:$0xff] %v2816_v5  ;;  %6075 = vmatprep.mubr.msk.bf16.mxu0 %vm2896_vm1, %v2816_v5  ;;  %v2321_v50 = vld [vmem:[#allocation5 + $0x40] sm:$0xff] }
 0x12f   : > { %764 = vst [vmem:[#allocation5 + $0x78] sm:$0x80] %v763_v6  ;;  %2820 = vst [vmem:[#allocation5 + $0x8] sm:$0xff] %v2819_v4  ;;  %6076 = vmatmul.mubr.msk.bf16.vlgmr.msra.gmra.mrb[0].mxu0 %vm2896_vm1, %v2819_v4  ;;  %v2324_v55 = vld [vmem:[#allocation5 + $0x48] sm:$0xff] }
 0x130   : > { %v1581_v7 = vpop.permute.xlu0 %1580  ;;  %v2528_v9 = vld [vmem:[#allocation5 + $0x28] sm:$0x80]  ;;  %v1912_v10 = vpop.permute.xlu1 %1911 }
 0x131   : > { %1615 = vst.msk [vmem:[#allocation5 + $0x70] sm:$0xff] %vm1600_vm2, %v1581_v7  ;;  %v2529_v60 = vsel %vm7336_vm4, 0, %v2528_v9  ;;  %v1972_v40 = vsel %vm7107_vm15, %v1912_v10, %v1971_v12 }
 0x132   : > { %2530 = vst [vmem:[#allocation5 + $0x28] sm:$0x80] %v2529_v60  ;;  %1973 = vst [vmem:[#allocation5 + $0x50] sm:$0xff] %v1972_v40 }
 0x134   : > { %v1914_v2 = vpop.permute.xlu0 %1913  ;;  %v2263_v15 = vpop.permute.xlu1 %2262 }
 0x135   : > { %v1975_v18 = vsel %vm7107_vm15, %v1914_v2, %v1974_v14  ;;  %v2316_v19 = vsel %vm7277_vm7, %v2263_v15, %v2315_v16  ;;  %v2827_v5 = vld [vmem:[#allocation5 + $0x20] sm:$0xff] }
 0x136   : > { %1976 = vst [vmem:[#allocation5 + $0x58] sm:$0xff] %v1975_v18  ;;  %2317 = vst [vmem:[#allocation5 + $0x30] sm:$0xff] %v2316_v19  ;;  %v1065_v9 = vld [vmem:[#allocation5 + $0x78] sm:$0xff] }
 0x138   : > { %v1661_v20 = vld [vmem:[#allocation5 + $0x70] sm:$0x80]  ;;  %v2265_v21 = vpop.permute.xlu0 %2264  ;;  %v2462_v56 = vpop.permute.xlu1 %2461 }
 0x139   : > { %v1662_v23 = vsel %vm6987_vm8, 0, %v1661_v20  ;;  %v2319_v3 = vsel %vm7277_vm7, %v2265_v21, %v2318_v22  ;;  %v2024_v17 = vld [vmem:[#allocation5 + $0x50] sm:$0x1]  ;;  %2500 = vst.msk [vmem:[#allocation5 + $0x30] sm:$0xff] %vm2342_vm3, %v2462_v56  ;;  %v2830_v60 = vld [vmem:[#allocation5 + $0x28] sm:$0xff] }
 0x13a   : > { %1663 = vst [vmem:[#allocation5 + $0x70] sm:$0x80] %v1662_v23  ;;  %2320 = vst [vmem:[#allocation5 + $0x38] sm:$0xff] %v2319_v3  ;;  %v2025_v24 = vsel %vm7153_vm11, 0, %v2024_v17 }
 0x13b   : > { %2026 = vst [vmem:[#allocation5 + $0x50] sm:$0x1] %v2025_v24 }
 0x13c   : > { %v2464_v25 = vpop.permute.xlu0 %2463  ;;  %v2773_v28 = vpop.permute.xlu1 %2772 }
 0x13d   : > { %v2027_v27 = vld [vmem:[#allocation5 + $0x58] sm:$0x1]  ;;  %2501 = vst.msk [vmem:[#allocation5 + $0x38] sm:$0xff] %vm2342_vm3, %v2464_v25  ;;  %v2822_v33 = vsel %vm7406_vm10, %v2773_v28, %v2821_v32 }
 0x13e   : > { %v2028_v29 = vsel %vm7153_vm11, 0, %v2027_v27  ;;  %2823 = vst [vmem:[#allocation5 + $0x10] sm:$0xff] %v2822_v33  ;;  %6079 = vmatprep.mubr.msk.bf16.mxu0 %vm2896_vm1, %v2822_v33 }
 0x13f   : > { %2029 = vst [vmem:[#allocation5 + $0x58] sm:$0x1] %v2028_v29 }
 0x140   : > { %v2775_v35 = vpop.permute.xlu0 %2774  ;;  %v2531_v38 = vld [vmem:[#allocation5 + $0x30] sm:$0x80]  ;;  %v1916_v39 = vpop.permute.xlu1 %1915 }
 0x141   : > { %v2825_v43 = vsel %vm7406_vm10, %v2775_v35, %v2824_v37  ;;  %v2532_v44 = vsel %vm7336_vm4, 0, %v2531_v38  ;;  %v1978_v45 = vsel %vm7107_vm15, %v1916_v39, %v1977_v41  ;;  %v1983_v18 = vld [vmem:[#allocation5 + $0x70] sm:$0xff] }
 0x142   : > { %2826 = vst [vmem:[#allocation5 + $0x18] sm:$0xff] %v2825_v43  ;;  %6080 = vmatmul.mubr.msk.bf16.gmra.mrb[4].mxu0 %vm2896_vm1, %v2825_v43  ;;  %2533 = vst [vmem:[#allocation5 + $0x30] sm:$0x80] %v2532_v44  ;;  %v2327_v42 = vld [vmem:[#allocation5 + $0x50] sm:$0xff] }
 0x143   : > { %1979 = vst [vmem:[#allocation5 + $0x60] sm:$0xff] %v1978_v45 }
 0x144   : > { %v2534_v46 = vld [vmem:[#allocation5 + $0x38] sm:$0x80]  ;;  %v1918_v47 = vpop.permute.xlu0 %1917  ;;  %v2267_v49 = vpop.permute.xlu1 %2266 }
 0x145   : > { %v2535_v31 = vsel %vm7336_vm4, 0, %v2534_v46  ;;  %v1981_v51 = vsel %vm7107_vm15, %v1918_v47, %v1980_v48  ;;  %v2322_v53 = vsel %vm7277_vm7, %v2267_v49, %v2321_v50 }
 0x146   : > { %2536 = vst [vmem:[#allocation5 + $0x38] sm:$0x80] %v2535_v31  ;;  %1982 = vst [vmem:[#allocation5 + $0x68] sm:$0xff] %v1981_v51  ;;  %v2330_v56 = vld [vmem:[#allocation5 + $0x58] sm:$0xff] }
 0x147   : > { %2323 = vst [vmem:[#allocation5 + $0x40] sm:$0xff] %v2322_v53 }
 0x148   : > { %v2269_v54 = vpop.permute.xlu0 %2268  ;;  %v2466_v58 = vpop.permute.xlu1 %2465 }
 0x149   : > { %v2325_v59 = vsel %vm7277_vm7, %v2269_v54, %v2324_v55  ;;  %2502 = vst.msk [vmem:[#allocation5 + $0x40] sm:$0xff] %vm2342_vm3, %v2466_v58  ;;  %v2833_v29 = vld [vmem:[#allocation5 + $0x30] sm:$0xff] }
 0x14a   : > { %v2030_v61 = vld [vmem:[#allocation5 + $0x60] sm:$0x1]  ;;  %2326 = vst [vmem:[#allocation5 + $0x48] sm:$0xff] %v2325_v59 }
 0x14b   : > { %v2031_v62 = vsel %vm7153_vm11, 0, %v2030_v61 }
 0x14c   : > { %2032 = vst [vmem:[#allocation5 + $0x60] sm:$0x1] %v2031_v62  ;;  %v2468_v63 = vpop.permute.xlu0 %2467  ;;  %v2777_v1 = vpop.permute.xlu1 %2776 }
 0x14d   : > { %v2033_v0 = vld [vmem:[#allocation5 + $0x68] sm:$0x1]  ;;  %2503 = vst.msk [vmem:[#allocation5 + $0x48] sm:$0xff] %vm2342_vm3, %v2468_v63  ;;  %v2828_v4 = vsel %vm7406_vm10, %v2777_v1, %v2827_v5  ;;  %v2836_v37 = vld [vmem:[#allocation5 + $0x38] sm:$0xff] }
 0x14e   : > { %v2034_v6 = vsel %vm7153_vm11, 0, %v2033_v0  ;;  %2829 = vst [vmem:[#allocation5 + $0x20] sm:$0xff] %v2828_v4  ;;  %6083 = vmatprep.mubr.msk.bf16.mxu0 %vm2896_vm1, %v2828_v4 }
 0x14f   : > { %2035 = vst [vmem:[#allocation5 + $0x68] sm:$0x1] %v2034_v6 }
 0x150   : > { %v1004_v7 = vpop.permute.xlu0 %1003  ;;  %v2537_v10 = vld [vmem:[#allocation5 + $0x40] sm:$0x80]  ;;  %v2779_v12 = vpop.permute.xlu1 %2778 }
 0x151   : > { %v1066_v40 = vsel %vm6863_vm14, %v1004_v7, %v1065_v9  ;;  %v2538_v2 = vsel %vm7336_vm4, 0, %v2537_v10  ;;  %v2831_v14 = vsel %vm7406_vm10, %v2779_v12, %v2830_v60 }
 0x152   : > { %1067 = vst [vmem:[#allocation5 + $0x78] sm:$0xff] %v1066_v40  ;;  %2539 = vst [vmem:[#allocation5 + $0x40] sm:$0x80] %v2538_v2  ;;  %6084 = vmatmul.mubr.msk.bf16.gmra.mrb[8].mxu0 %vm2896_vm1, %v2831_v14 }
 0x153   : > { %2832 = vst [vmem:[#allocation5 + $0x28] sm:$0xff] %v2831_v14  ;;  %v2333_v41 = vld [vmem:[#allocation5 + $0x60] sm:$0xff] }
 0x154   : > { %v2540_v15 = vld [vmem:[#allocation5 + $0x48] sm:$0x80]  ;;  %v1920_v16 = vpop.permute.xlu0 %1919  ;;  %v2271_v20 = vpop.permute.xlu1 %2270 }
 0x155   : > { %v2541_v19 = vsel %vm7336_vm4, 0, %v2540_v15  ;;  %v1984_v21 = vsel %vm7107_vm15, %v1920_v16, %v1983_v18  ;;  %v2328_v22 = vsel %vm7277_vm7, %v2271_v20, %v2327_v42 }
 0x156   : > { %2542 = vst [vmem:[#allocation5 + $0x48] sm:$0x80] %v2541_v19  ;;  %1985 = vst [vmem:[#allocation5 + $0x70] sm:$0xff] %v1984_v21  ;;  %v2336_v47 = vld [vmem:[#allocation5 + $0x68] sm:$0xff] }
 0x157   : > { %2329 = vst [vmem:[#allocation5 + $0x50] sm:$0xff] %v2328_v22 }
 0x158   : > { %v2273_v23 = vpop.permute.xlu0 %2272  ;;  %v2470_v17 = vpop.permute.xlu1 %2469 }
 0x159   : > { %v1115_v3 = vld [vmem:[#allocation5 + $0x78] sm:$0x1]  ;;  %v2331_v24 = vsel %vm7277_vm7, %v2273_v23, %v2330_v56  ;;  %2504 = vst.msk [vmem:[#allocation5 + $0x50] sm:$0xff] %vm2342_vm3, %v2470_v17  ;;  %v2839_v53 = vld [vmem:[#allocation5 + $0x40] sm:$0xff] }
 0x15a   : > { %v1116_v25 = vsel %vm6772_vm9, 0, %v1115_v3  ;;  %2332 = vst [vmem:[#allocation5 + $0x58] sm:$0xff] %v2331_v24 }
 0x15b   : > { %1117 = vst [vmem:[#allocation5 + $0x78] sm:$0x1] %v1116_v25 }
 0x15c   : > { %v2472_v27 = vpop.permute.xlu0 %2471  ;;  %v2781_v32 = vpop.permute.xlu1 %2780 }
 0x15d   : > { %v2036_v28 = vld [vmem:[#allocation5 + $0x70] sm:$0x1]  ;;  %2505 = vst.msk [vmem:[#allocation5 + $0x58] sm:$0xff] %vm2342_vm3, %v2472_v27  ;;  %v2834_v35 = vsel %vm7406_vm10, %v2781_v32, %v2833_v29  ;;  %v2842_v58 = vld [vmem:[#allocation5 + $0x48] sm:$0xff]  ;;  %v7550_v27 = vld [vmem:[%s8824_s2] ss:$0 sm:$0xff] }
 0x15e   : > { %v2037_v33 = vsel %vm7153_vm11, 0, %v2036_v28  ;;  %2835 = vst [vmem:[#allocation5 + $0x30] sm:$0xff] %v2834_v35  ;;  %6087 = vmatprep.mubr.msk.bf16.mxu0 %vm2896_vm1, %v2834_v35  ;;  %v7555_v32 = vld [vmem:[%s8824_s2 + $0x1] ss:$0 sm:$0xff] }
 0x15f   : > { %2038 = vst [vmem:[#allocation5 + $0x70] sm:$0x1] %v2037_v33 }
 0x160   : > { %v2783_v11 = vpop.permute.xlu0 %2782  ;;  %v2543_v38 = vld [vmem:[#allocation5 + $0x50] sm:$0x80]  ;;  %v2275_v39 = vpop.permute.xlu1 %2274 }
 0x161   : > { %v2837_v43 = vsel %vm7406_vm10, %v2783_v11, %v2836_v37  ;;  %v2544_v44 = vsel %vm7336_vm4, 0, %v2543_v38  ;;  %v2334_v13 = vsel %vm7277_vm7, %v2275_v39, %v2333_v41 }
 0x162   : > { %2838 = vst [vmem:[#allocation5 + $0x38] sm:$0xff] %v2837_v43  ;;  %6088 = vmatmul.mubr.msk.bf16.gmra.mrb[12].mxu0 %vm2896_vm1, %v2837_v43  ;;  %2545 = vst [vmem:[#allocation5 + $0x50] sm:$0x80] %v2544_v44  ;;  %v1437_v62 = vld [vmem:[#allocation5 + $0x78] sm:$0xff] }
 0x163   : > { %2335 = vst [vmem:[#allocation5 + $0x60] sm:$0xff] %v2334_v13 }
 0x164   : > { %v2546_v45 = vld [vmem:[#allocation5 + $0x58] sm:$0x80]  ;;  %v2277_v46 = vpop.permute.xlu0 %2276  ;;  %v2474_v31 = vpop.permute.xlu1 %2473 }
 0x165   : > { %v2547_v48 = vsel %vm7336_vm4, 0, %v2546_v45  ;;  %v2337_v49 = vsel %vm7277_vm7, %v2277_v46, %v2336_v47  ;;  %2506 = vst.msk [vmem:[#allocation5 + $0x60] sm:$0xff] %vm2342_vm3, %v2474_v31 }
 0x166   : > { %2548 = vst [vmem:[#allocation5 + $0x58] sm:$0x80] %v2547_v48  ;;  %2338 = vst [vmem:[#allocation5 + $0x68] sm:$0xff] %v2337_v49  ;;  %v2339_v9 = vld [vmem:[#allocation5 + $0x70] sm:$0xff] }
 0x168   : > { %v2476_v50 = vpop.permute.xlu0 %2475  ;;  %v2785_v51 = vpop.permute.xlu1 %2784 }
 0x169   : > { %2507 = vst.msk [vmem:[#allocation5 + $0x68] sm:$0xff] %vm2342_vm3, %v2476_v50  ;;  %v2840_v54 = vsel %vm7406_vm10, %v2785_v51, %v2839_v53  ;;  %v2845_v60 = vld [vmem:[#allocation5 + $0x50] sm:$0xff] }
 0x16a   : > { %2841 = vst [vmem:[#allocation5 + $0x40] sm:$0xff] %v2840_v54  ;;  %6091 = vmatprep.mubr.msk.bf16.mxu0 %vm2896_vm1, %v2840_v54 }
 0x16c   : > { %v2787_v55 = vpop.permute.xlu0 %2786  ;;  %v2549_v59 = vld [vmem:[#allocation5 + $0x60] sm:$0x80]  ;;  %v1373_v61 = vpop.permute.xlu1 %1372 }
 0x16d   : > { %v2843_v63 = vsel %vm7406_vm10, %v2787_v55, %v2842_v58  ;;  %v2550_v0 = vsel %vm7336_vm4, 0, %v2549_v59  ;;  %v1438_v1 = vsel %vm6921_vm0, %v1373_v61, %v1437_v62  ;;  %v2848_v15 = vld [vmem:[#allocation5 + $0x58] sm:$0xff] }
 0x16e   : > { %2844 = vst [vmem:[#allocation5 + $0x48] sm:$0xff] %v2843_v63  ;;  %6092 = vmatmul.mubr.msk.bf16.gmra.mrb[16].mxu0 %vm2896_vm1, %v2843_v63  ;;  %2551 = vst [vmem:[#allocation5 + $0x60] sm:$0x80] %v2550_v0 }
 0x16f   : > { %1439 = vst [vmem:[#allocation5 + $0x78] sm:$0xff] %v1438_v1 }
 0x170   : > { %v2552_v5 = vld [vmem:[#allocation5 + $0x68] sm:$0x80]  ;;  %v1583_v6 = vpop.permute.xlu0 %1582  ;;  %v2279_v7 = vpop.permute.xlu1 %2278 }
 0x171   : > { %v2553_v4 = vsel %vm7336_vm4, 0, %v2552_v5  ;;  %1616 = vst.msk [vmem:[#allocation5 + $0x78] sm:$0xff] %vm1600_vm2, %v1583_v6  ;;  %v2340_v10 = vsel %vm7277_vm7, %v2279_v7, %v2339_v9 }
 0x172   : > { %2554 = vst [vmem:[#allocation5 + $0x68] sm:$0x80] %v2553_v4  ;;  %2341 = vst [vmem:[#allocation5 + $0x70] sm:$0xff] %v2340_v10 }
 0x174   : > { %v2478_v30 = vpop.permute.xlu0 %2477  ;;  %v2789_v12 = vpop.permute.xlu1 %2788 }
 0x175   : > { %2508 = vst.msk [vmem:[#allocation5 + $0x70] sm:$0xff] %vm2342_vm3, %v2478_v30  ;;  %v2846_v40 = vsel %vm7406_vm10, %v2789_v12, %v2845_v60  ;;  %v2851_v18 = vld [vmem:[#allocation5 + $0x60] sm:$0xff] }
 0x176   : > { %2847 = vst [vmem:[#allocation5 + $0x50] sm:$0xff] %v2846_v40  ;;  %6095 = vmatprep.mubr.msk.bf16.mxu0 %vm2896_vm1, %v2846_v40 }
 0x178   : > { %v1664_v2 = vld [vmem:[#allocation5 + $0x78] sm:$0x80]  ;;  %v2791_v14 = vpop.permute.xlu0 %2790  ;;  %v2793_v8 = vpop.permute.xlu1 %2792 }
 0x179   : > { %v1665_v16 = vsel %vm6987_vm8, 0, %v1664_v2  ;;  %v2849_v19 = vsel %vm7406_vm10, %v2791_v14, %v2848_v15  ;;  %v2852_v20 = vsel %vm7406_vm10, %v2793_v8, %v2851_v18  ;;  %v2854_v22 = vld [vmem:[#allocation5 + $0x68] sm:$0xff] }
 0x17a   : > { %1666 = vst [vmem:[#allocation5 + $0x78] sm:$0x80] %v1665_v16  ;;  %2850 = vst [vmem:[#allocation5 + $0x58] sm:$0xff] %v2849_v19  ;;  %6096 = vmatmul.mubr.msk.bf16.gmra.mrb[20].mxu0 %vm2896_vm1, %v2849_v19 }
 0x17b   : > { %2853 = vst [vmem:[#allocation5 + $0x60] sm:$0xff] %v2852_v20  ;;  %6099 = vmatprep.mubr.msk.bf16.mxu0 %vm2896_vm1, %v2852_v20 }
 0x17c   : > { %v2555_v42 = vld [vmem:[#allocation5 + $0x70] sm:$0x80]  ;;  %v2795_v21 = vpop.permute.xlu0 %2794  ;;  %v1922_v56 = vpop.permute.xlu1 %1921 }
 0x17d   : > { %v2556_v36 = vsel %vm7336_vm4, 0, %v2555_v42  ;;  %v2855_v23 = vsel %vm7406_vm10, %v2795_v21, %v2854_v22  ;;  %vm3232_vm4 = vcmask 64512  }
 0x17e   : > { %2557 = vst [vmem:[#allocation5 + $0x70] sm:$0x80] %v2556_v36  ;;  %2856 = vst [vmem:[#allocation5 + $0x68] sm:$0xff] %v2855_v23 }
 0x180   : > { %v2797_v24 = vpop.permute.xlu0 %2796 }
 0x181   : > { %v1986_v3 = vld [vmem:[#allocation5 + $0x78] sm:$0xff] }
 0x182   : > { %v1987_v17 = vsel %vm7107_vm15, %v1922_v56, %v1986_v3  ;;  %6100 = vmatmul.mubr.msk.bf16.gmra.mrb[24].mxu0 %vm2896_vm1, %v2855_v23 }
 0x183   : > { %1988 = vst [vmem:[#allocation5 + $0x78] sm:$0xff] %v1987_v17 }
 0x184   : > { %1991 = vst.msk [vmem:[#allocation5 + $0x78] sm:$0xff] %vm1990_vm5, %v6441_v52 }
 0x185   : > { %2343 = vst.msk [vmem:[#allocation5 + $0x78] sm:$0xff] %vm2342_vm3, %v6441_v52  ;;  %v2857_v26 = vld [vmem:[#allocation5 + $0x70] sm:$0xff] }
 0x186   : > { %2510 = vst.msk [vmem:[#allocation5 + $0x78] sm:$0xff] %vm2509_vm6, %v6441_v52  ;;  %v2858_v25 = vsel %vm7406_vm10, %v2797_v24, %v2857_v26 }
 0x187   : > { %2859 = vst [vmem:[#allocation5 + $0x70] sm:$0xff] %v2858_v25  ;;  %6103 = vmatprep.mubr.msk.bf16.mxu0 %vm2896_vm1, %v2858_v25 }
 0x18d   : > { %v2875_v34 = vld [vmem:[#allocation5 + $0x78] sm:$0xff] }
 0x18e   : > { %6104 = vmatmul.mubr.msk.bf16.gmra.mrb[28].mxu0 %vm2896_vm1, %v2875_v34 }
 0x202   : > { %v6077_v28 = vpop.f32.mrb[0].mxu0 }
 0x203   : > { %v3117_v52 = vmul.f32 %v6077_v28, %v7550_v27  ;;  %v2983_v57 = vpop.f32.mrb[1].mxu0 }
 0x204   : > { %v3115_v29 = vmul.f32 %v7550_v27, %v2983_v57  ;;  %v6078_v33 = vpop.f32.mrb[2].mxu0 }
 0x205   : > { %v3154_v35 = vadd.f32 %v7555_v32, %v3117_v52  ;;  %v3118_v11 = vmul.f32 %v6078_v33, %v7550_v27  ;;  %v2986_v37 = vpop.f32.mrb[3].mxu0 }
 0x206   : > { %v3152_v38 = vadd.f32 %v7555_v32, %v3115_v29  ;;  %v3116_v39 = vmul.f32 %v7550_v27, %v2986_v37 }
 0x207   : > { %v3155_v41 = vadd.f32 %v7555_v32, %v3118_v11  ;;  %v3186_v44 = vmax.f32 %v3154_v35, 0.0 }
 0x208   : > { %v3153_v43 = vadd.f32 %v7555_v32, %v3116_v39  ;;  %v3184_v45 = vmax.f32 %v3152_v38, 0.0 }
 0x209   : > { %v3187_v13 = vmax.f32 %v3155_v41, 0.0 }
 0x20a   : > { %v3185_v46 = vmax.f32 %v3153_v43, 0.0 }
 0x20b   : > { %v3217_v47 = vpack.c.bf16 %v3187_v13, %v3186_v44 }
 0x20c   : > { %v3216_v48 = vpack.c.bf16 %v3185_v46, %v3184_v45 }
 0x20d   : > { %3234 = vst.msk [vmem:[#allocation2 + $0x8] sm:$0xff] %vm3232_vm4, %v3217_v47 }
 0x20e   : > { %3233 = vst.msk [vmem:[#allocation2] sm:$0xff] %vm3232_vm4, %v3216_v48 }
 0x215   : > { %v6081_v31 = vpop.f32.mrb[4].mxu0 }
 0x216   : > { %v3121_v49 = vmul.f32 %v6081_v31, %v7550_v27  ;;  %v2999_v50 = vpop.f32.mrb[5].mxu0 }
 0x217   : > { %v3119_v51 = vmul.f32 %v7550_v27, %v2999_v50  ;;  %v6082_v53 = vpop.f32.mrb[6].mxu0 }
 0x218   : > { %v3158_v54 = vadd.f32 %v7555_v32, %v3121_v49  ;;  %v3122_v55 = vmul.f32 %v6082_v53, %v7550_v27  ;;  %v3002_v58 = vpop.f32.mrb[7].mxu0 }
 0x219   : > { %v3156_v59 = vadd.f32 %v7555_v32, %v3119_v51  ;;  %v3120_v61 = vmul.f32 %v7550_v27, %v3002_v58 }
 0x21a   : > { %v3159_v62 = vadd.f32 %v7555_v32, %v3122_v55  ;;  %v3190_v0 = vmax.f32 %v3158_v54, 0.0 }
 0x21b   : > { %v3157_v63 = vadd.f32 %v7555_v32, %v3120_v61  ;;  %v3188_v5 = vmax.f32 %v3156_v59, 0.0 }
 0x21c   : > { %v3191_v1 = vmax.f32 %v3159_v62, 0.0 }
 0x21d   : > { %v3189_v6 = vmax.f32 %v3157_v63, 0.0 }
 0x21e   : > { %v3219_v4 = vpack.c.bf16 %v3191_v1, %v3190_v0 }
 0x21f   : > { %v3218_v7 = vpack.c.bf16 %v3189_v6, %v3188_v5 }
 0x220   : > { %3236 = vst.msk [vmem:[#allocation2 + $0x18] sm:$0xff] %vm3232_vm4, %v3219_v4 }
 0x221   : > { %3235 = vst.msk [vmem:[#allocation2 + $0x10] sm:$0xff] %vm3232_vm4, %v3218_v7 }
 0x225   : > { %v6085_v9 = vpop.f32.mrb[8].mxu0 }
 0x226   : > { %v3125_v10 = vmul.f32 %v6085_v9, %v7550_v27  ;;  %v3015_v30 = vpop.f32.mrb[9].mxu0 }
 0x227   : > { %v3123_v12 = vmul.f32 %v7550_v27, %v3015_v30  ;;  %v6086_v60 = vpop.f32.mrb[10].mxu0 }
 0x228   : > { %v3162_v40 = vadd.f32 %v7555_v32, %v3125_v10  ;;  %v3126_v2 = vmul.f32 %v6086_v60, %v7550_v27  ;;  %v3018_v14 = vpop.f32.mrb[11].mxu0 }
 0x229   : > { %v3160_v15 = vadd.f32 %v7555_v32, %v3123_v12  ;;  %v3124_v16 = vmul.f32 %v7550_v27, %v3018_v14 }
 0x22a   : > { %v3163_v8 = vadd.f32 %v7555_v32, %v3126_v2  ;;  %v3194_v19 = vmax.f32 %v3162_v40, 0.0 }
 0x22b   : > { %v3161_v18 = vadd.f32 %v7555_v32, %v3124_v16  ;;  %v3192_v42 = vmax.f32 %v3160_v15, 0.0 }
 0x22c   : > { %v3195_v20 = vmax.f32 %v3163_v8, 0.0 }
 0x22d   : > { %v3193_v21 = vmax.f32 %v3161_v18, 0.0 }
 0x22e   : > { %v3221_v22 = vpack.c.bf16 %v3195_v20, %v3194_v19 }
 0x22f   : > { %v3220_v36 = vpack.c.bf16 %v3193_v21, %v3192_v42 }
 0x230   : > { %3238 = vst.msk [vmem:[#allocation2 + $0x28] sm:$0xff] %vm3232_vm4, %v3221_v22 }
 0x231   : > { %3237 = vst.msk [vmem:[#allocation2 + $0x20] sm:$0xff] %vm3232_vm4, %v3220_v36 }
 0x235   : > { %v6089_v23 = vpop.f32.mrb[12].mxu0 }
 0x236   : > { %v3129_v56 = vmul.f32 %v6089_v23, %v7550_v27  ;;  %v3031_v3 = vpop.f32.mrb[13].mxu0 }
 0x237   : > { %v3127_v17 = vmul.f32 %v7550_v27, %v3031_v3  ;;  %v6090_v24 = vpop.f32.mrb[14].mxu0 }
 0x238   : > { %v3166_v26 = vadd.f32 %v7555_v32, %v3129_v56  ;;  %v3130_v25 = vmul.f32 %v6090_v24, %v7550_v27  ;;  %v3034_v34 = vpop.f32.mrb[15].mxu0 }
 0x239   : > { %v3164_v28 = vadd.f32 %v7555_v32, %v3127_v17  ;;  %v3128_v52 = vmul.f32 %v7550_v27, %v3034_v34 }
 0x23a   : > { %v3167_v57 = vadd.f32 %v7555_v32, %v3130_v25  ;;  %v3198_v33 = vmax.f32 %v3166_v26, 0.0 }
 0x23b   : > { %v3165_v29 = vadd.f32 %v7555_v32, %v3128_v52  ;;  %v3196_v11 = vmax.f32 %v3164_v28, 0.0 }
 0x23c   : > { %v3199_v35 = vmax.f32 %v3167_v57, 0.0 }
 0x23d   : > { %v3197_v37 = vmax.f32 %v3165_v29, 0.0 }
 0x23e   : > { %v3223_v38 = vpack.c.bf16 %v3199_v35, %v3198_v33 }
 0x23f   : > { %v3222_v39 = vpack.c.bf16 %v3197_v37, %v3196_v11 }
 0x240   : > { %3240 = vst.msk [vmem:[#allocation2 + $0x38] sm:$0xff] %vm3232_vm4, %v3223_v38 }
 0x241   : > { %3239 = vst.msk [vmem:[#allocation2 + $0x30] sm:$0xff] %vm3232_vm4, %v3222_v39  ;;  %v6093_v41 = vpop.f32.mrb[16].mxu0 }
 0x242   : > { %v3133_v43 = vmul.f32 %v6093_v41, %v7550_v27  ;;  %v3047_v44 = vpop.f32.mrb[17].mxu0 }
 0x243   : > { %v3131_v13 = vmul.f32 %v7550_v27, %v3047_v44  ;;  %v6094_v45 = vpop.f32.mrb[18].mxu0 }
 0x244   : > { %v3170_v46 = vadd.f32 %v7555_v32, %v3133_v43  ;;  %v3134_v47 = vmul.f32 %v6094_v45, %v7550_v27  ;;  %v3050_v48 = vpop.f32.mrb[19].mxu0 }
 0x245   : > { %v3168_v31 = vadd.f32 %v7555_v32, %v3131_v13  ;;  %v3132_v49 = vmul.f32 %v7550_v27, %v3050_v48 }
 0x246   : > { %v3171_v50 = vadd.f32 %v7555_v32, %v3134_v47  ;;  %v3202_v53 = vmax.f32 %v3170_v46, 0.0 }
 0x247   : > { %v3169_v51 = vadd.f32 %v7555_v32, %v3132_v49  ;;  %v3200_v55 = vmax.f32 %v3168_v31, 0.0 }
 0x248   : > { %v3203_v54 = vmax.f32 %v3171_v50, 0.0 }
 0x249   : > { %v3201_v58 = vmax.f32 %v3169_v51, 0.0 }
 0x24a   : > { %v3225_v59 = vpack.c.bf16 %v3203_v54, %v3202_v53 }
 0x24b   : > { %v3224_v61 = vpack.c.bf16 %v3201_v58, %v3200_v55 }
 0x24c   : > { %3242 = vst.msk [vmem:[#allocation2 + $0x48] sm:$0xff] %vm3232_vm4, %v3225_v59 }
 0x24d   : > { %3241 = vst.msk [vmem:[#allocation2 + $0x40] sm:$0xff] %vm3232_vm4, %v3224_v61  ;;  %v6097_v62 = vpop.f32.mrb[20].mxu0 }
 0x24e   : > { %v3137_v63 = vmul.f32 %v6097_v62, %v7550_v27  ;;  %v3063_v0 = vpop.f32.mrb[21].mxu0 }
 0x24f   : > { %v3135_v1 = vmul.f32 %v7550_v27, %v3063_v0  ;;  %v6098_v5 = vpop.f32.mrb[22].mxu0 }
 0x250   : > { %v3174_v6 = vadd.f32 %v7555_v32, %v3137_v63  ;;  %v3138_v4 = vmul.f32 %v6098_v5, %v7550_v27  ;;  %v3066_v7 = vpop.f32.mrb[23].mxu0 }
 0x251   : > { %v3172_v9 = vadd.f32 %v7555_v32, %v3135_v1  ;;  %v3136_v10 = vmul.f32 %v7550_v27, %v3066_v7 }
 0x252   : > { %v3175_v30 = vadd.f32 %v7555_v32, %v3138_v4  ;;  %v3206_v60 = vmax.f32 %v3174_v6, 0.0 }
 0x253   : > { %v3173_v12 = vadd.f32 %v7555_v32, %v3136_v10  ;;  %v3204_v2 = vmax.f32 %v3172_v9, 0.0 }
 0x254   : > { %v3207_v40 = vmax.f32 %v3175_v30, 0.0 }
 0x255   : > { %v3205_v14 = vmax.f32 %v3173_v12, 0.0  ;;  %v6101_v15 = vpop.f32.mrb[24].mxu0 }
 0x256   : > { %v3227_v16 = vpack.c.bf16 %v3207_v40, %v3206_v60  ;;  %v3141_v8 = vmul.f32 %v6101_v15, %v7550_v27  ;;  %v3079_v18 = vpop.f32.mrb[25].mxu0 }
 0x257   : > { %v3226_v19 = vpack.c.bf16 %v3205_v14, %v3204_v2  ;;  %v3139_v20 = vmul.f32 %v7550_v27, %v3079_v18  ;;  %v6102_v42 = vpop.f32.mrb[26].mxu0 }
 0x258   : > { %3244 = vst.msk [vmem:[#allocation2 + $0x58] sm:$0xff] %vm3232_vm4, %v3227_v16  ;;  %v3178_v21 = vadd.f32 %v7555_v32, %v3141_v8  ;;  %v3142_v22 = vmul.f32 %v6102_v42, %v7550_v27  ;;  %v3082_v36 = vpop.f32.mrb[27].mxu0 }
 0x259   : > { %3243 = vst.msk [vmem:[#allocation2 + $0x50] sm:$0xff] %vm3232_vm4, %v3226_v19  ;;  %v3176_v23 = vadd.f32 %v7555_v32, %v3139_v20  ;;  %v3140_v56 = vmul.f32 %v7550_v27, %v3082_v36 }
 0x25a   : > { %v3179_v3 = vadd.f32 %v7555_v32, %v3142_v22  ;;  %v3210_v24 = vmax.f32 %v3178_v21, 0.0 }
 0x25b   : > { %v3177_v17 = vadd.f32 %v7555_v32, %v3140_v56  ;;  %v3208_v25 = vmax.f32 %v3176_v23, 0.0 }
 0x25c   : > { %v3211_v26 = vmax.f32 %v3179_v3, 0.0 }
 0x25d   : > { %v3209_v34 = vmax.f32 %v3177_v17, 0.0 }
 0x25e   : > { %v3229_v28 = vpack.c.bf16 %v3211_v26, %v3210_v24 }
 0x25f   : > { %v3228_v52 = vpack.c.bf16 %v3209_v34, %v3208_v25 }
 0x260   : > { %3246 = vst.msk [vmem:[#allocation2 + $0x68] sm:$0xff] %vm3232_vm4, %v3229_v28 }
 0x261   : > { %3245 = vst.msk [vmem:[#allocation2 + $0x60] sm:$0xff] %vm3232_vm4, %v3228_v52  ;;  %v6105_v57 = vpop.f32.mrb[28].mxu0 }
 0x262   : > { %v3145_v29 = vmul.f32 %v6105_v57, %v7550_v27  ;;  %v3095_v33 = vpop.f32.mrb[29].mxu0 }
 0x263   : > { %v3143_v35 = vmul.f32 %v7550_v27, %v3095_v33  ;;  %v6106_v11 = vpop.f32.mrb[30].mxu0 }
 0x264   : > { %v3182_v37 = vadd.f32 %v7555_v32, %v3145_v29  ;;  %v3146_v38 = vmul.f32 %v6106_v11, %v7550_v27  ;;  %v3098_v39 = vpop.f32.mrb[31].mxu0 }
 0x265   : > { %v3180_v41 = vadd.f32 %v7555_v32, %v3143_v35  ;;  %v3144_v43 = vmul.f32 %v7550_v27, %v3098_v39 }
 0x266   : > { %v3183_v44 = vadd.f32 %v7555_v32, %v3146_v38  ;;  %v3214_v45 = vmax.f32 %v3182_v37, 0.0 }
 0x267   : > { %v3181_v13 = vadd.f32 %v7555_v32, %v3144_v43  ;;  %v3212_v47 = vmax.f32 %v3180_v41, 0.0 }
 0x268   : > { %v3215_v46 = vmax.f32 %v3183_v44, 0.0 }
 0x269   : > { %v3213_v48 = vmax.f32 %v3181_v13, 0.0 }
 0x26a   : > { %v3231_v31 = vpack.c.bf16 %v3215_v46, %v3214_v45 }
 0x26b   : > { %v3230_v49 = vpack.c.bf16 %v3213_v48, %v3212_v47 }
 0x26c   : > { %3248 = vst.msk [vmem:[#allocation2 + $0x78] sm:$0xff] %vm3232_vm4, %v3231_v31 }
 0x26d   : > { %3247 = vst.msk [vmem:[#allocation2 + $0x70] sm:$0xff] %vm3232_vm4, %v3230_v49 }
 0x26e   : > { %v7637_v50 = vld [vmem:[#allocation2 + $0x10] sm:$0xff]  ;;  %v7639_v51 = vld [vmem:[#allocation2] sm:$0xff]  ;;  %s6447_s23 = smov 8   ;;  %v7647_v53 = vld [vmem:[#allocation2 + $0x18] sm:$0xff]  ;;  %s6448_s25 = smov 16   ;;  %vm3252_vm9 = vcmask 57344  }
 0x26f   : > { %3519 = vrot.lane.b32.xlu1 %v7637_v50, %s6447_s23  ;;  %3515 = vrot.lane.b32.xlu0 %v7639_v51, %s6447_s23  ;;  %v3641_v27 = vshrl.u32 %v7639_v51, 16  ;;  %v3643_v32 = vshll.u32 %v7639_v51, 16  ;;  %v7649_v54 = vld [vmem:[#allocation2 + $0x8] sm:$0xff]  ;;  %v3657_v59 = vshll.u32 %v7637_v50, 16  ;;  %v7661_v62 = vld [vmem:[#allocation2 + $0x20] sm:$0xff]  ;;  %v3655_v63 = vshrl.u32 %v7637_v50, 16 }
 0x270   : > { %v3650_v61 = vshll.u32 %v7649_v54, 16  ;;  %v3648_v1 = vshrl.u32 %v7649_v54, 16  ;;  %v7669_v6 = vld [vmem:[#allocation2 + $0x30] sm:$0xff]  ;;  %v7671_v4 = vld [vmem:[#allocation2 + $0x28] sm:$0xff]  ;;  %v3671_v7 = vshll.u32 %v7661_v62, 16  ;;  %v3664_v30 = vshll.u32 %v7647_v53, 16 }
 0x271   : > { %v3645_v55 = vrot.slane %v3643_v32, 1  ;;  %v3659_v0 = vrot.slane %v3657_v59, 1  ;;  %v3669_v12 = vshrl.u32 %v7661_v62, 16  ;;  %v3662_v60 = vshrl.u32 %v7647_v53, 16  ;;  %v7685_v40 = vld [vmem:[#allocation2 + $0x40] sm:$0xff]  ;;  %v7687_v2 = vld [vmem:[#allocation2 + $0x38] sm:$0xff] }
 0x272   : > { %v3652_v5 = vrot.slane %v3650_v61, 1  ;;  %v3673_v14 = vrot.slane %v3671_v7, 1  ;;  %v3914_v15 = vrot.slane %v3648_v1, 7  ;;  %v3907_v16 = vrot.slane %v3641_v27, 7  ;;  %v7691_v8 = vld [vmem:[#allocation2 + $0x50] sm:$0xff]  ;;  %s6449_s26 = smov 24  }
 0x273   : > { %3521 = vrot.lane.b32.xlu1 %v7647_v53, %s6447_s23  ;;  %3517 = vrot.lane.b32.xlu0 %v7649_v54, %s6447_s23  ;;  %v7657_v58 = vor.u32 %v3645_v55, %v3641_v27  ;;  %v7678_v9 = vor.u32 %v3659_v0, %v3655_v63  ;;  %v3666_v18 = vrot.slane %v3664_v30, 1  ;;  %v3683_v19 = vshrl.u32 %v7669_v6, 16  ;;  %v3261_v22 = vld [vmem:[#allocation6 + $0x18] sm:$0x1]  ;;  %v3255_v36 = vld [vmem:[#allocation6 + $0x8] sm:$0x1] }
 0x274   : > { %v7680_v10 = vor.u32 %v3652_v5, %v3648_v1  ;;  %v3685_v20 = vshll.u32 %v7669_v6, 16  ;;  %v3711_v42 = vshrl.u32 %v7691_v8, 16  ;;  %v4563_v21 = vrot.slane %v3655_v63, 7  ;;  %v3264_v23 = vld [vmem:[#allocation6 + $0x20] sm:$0x1]  ;;  %s6450_s6 = smov 32  }
 0x275   : > { %v3713_v56 = vshll.u32 %v7691_v8, 16  ;;  %v7701_v3 = vor.u32 %v3914_v15, %v3650_v61  ;;  %v3258_v26 = vld [vmem:[#allocation6 + $0x10] sm:$0x1]  ;;  %v7711_v25 = vor.u32 %v3673_v14, %v3669_v12  ;;  %v7713_v34 = vor.u32 %v3666_v18, %v3662_v60  ;;  %v3267_v52 = vld [vmem:[#allocation6 + $0x28] sm:$0x1]  ;;  %s6452_s7 = smov 40  }
 0x276   : > { %v7703_v17 = vor.u32 %v4563_v21, %v3657_v59  ;;  %v3977_v24 = vrot.slane %v3711_v42, 7  ;;  %v3676_v28 = vshrl.u32 %v7671_v4, 16  ;;  %v3273_v57 = vld [vmem:[#allocation6 + $0x38] sm:$0x1]  ;;  %v3678_v29 = vshll.u32 %v7671_v4, 16  ;;  %v7786_v21 = vld [vmem:[#allocation2 + $0x48] sm:$0xff] }
 0x277   : > { %3745 = vrot.lane.b32.xlu1 %v7657_v58, %s6448_s25  ;;  %3523 = vrot.lane.b32.xlu0 %v7661_v62, %s6447_s23  ;;  %vm8857_vm10 = vsmask.f32 256  ;;  %v3270_v11 = vld [vmem:[#allocation6 + $0x30] sm:$0x1]  ;;  %v7728_v37 = vrot.slane %v3685_v20, 1  ;;  %v3910_v43 = vor.u32 %v3907_v16, %v3643_v32  ;;  %v3339_v44 = vrot.slane %v3662_v60, 7 }
 0x278   : > { %v7719_v33 = vor.u32 %v3977_v24, %v3713_v56  ;;  %vm7722_vm12 = vmand %vm3252_vm9, %vm8857_vm10  ;;  %v3697_v13 = vshrl.u32 %v7685_v40, 16  ;;  %v3699_v45 = vshll.u32 %v7685_v40, 16  ;;  %v3279_v31 = vld [vmem:[#allocation6 + $0x48] sm:$0x1]  ;;  %v3276_v49 = vld [vmem:[#allocation6 + $0x40] sm:$0x1] }
 0x279   : > { %v3262_v38 = vsel %vm7722_vm12, 0, %v3261_v22  ;;  %v3256_v39 = vsel %vm7722_vm12, 0, %v3255_v36  ;;  %v3265_v41 = vsel %vm7722_vm12, 0, %v3264_v23  ;;  %v3259_v46 = vsel %vm7722_vm12, 0, %v3258_v26  ;;  %v3285_v23 = vld [vmem:[#allocation6 + $0x58] sm:$0x1]  ;;  %vm8863_vm11 = vmmov %vm8857_vm10 }
 0x27a   : > { %3263 = vst [vmem:[#allocation6 + $0x18] sm:$0x1] %v3262_v38  ;;  %3257 = vst [vmem:[#allocation6 + $0x8] sm:$0x1] %v3256_v39  ;;  %v3268_v47 = vsel %vm7722_vm12, 0, %v3267_v52  ;;  %v3274_v48 = vsel %vm7722_vm12, 0, %v3273_v57  ;;  %v7756_v61 = vor.u32 %v3664_v30, %v3339_v44 }
 0x27b   : > { %3527 = vrot.lane.b32.xlu1 %v7669_v6, %s6447_s23  ;;  %3525 = vrot.lane.b32.xlu0 %v7671_v4, %s6447_s23  ;;  %3266 = vst [vmem:[#allocation6 + $0x20] sm:$0x1] %v3265_v41  ;;  %3260 = vst [vmem:[#allocation6 + $0x10] sm:$0x1] %v3259_v46  ;;  %v3346_v27 = vrot.slane %v3669_v12, 7  ;;  %v3360_v32 = vrot.slane %v3683_v19, 7 }
 0x27c   : > { %3269 = vst [vmem:[#allocation6 + $0x28] sm:$0x1] %v3268_v47  ;;  %3275 = vst [vmem:[#allocation6 + $0x38] sm:$0x1] %v3274_v48  ;;  %v3271_v55 = vsel %vm7722_vm12, 0, %v3270_v11  ;;  %v3353_v59 = vrot.slane %v3676_v28, 7 }
 0x27d   : > { %3272 = vst [vmem:[#allocation6 + $0x30] sm:$0x1] %v3271_v55  ;;  %v3690_v63 = vshrl.u32 %v7687_v2, 16  ;;  %vm8860_vm14 = vsmask.f32 7938  ;;  %vm3575_vm2 = vcmask 195712   ;;  %v7772_v5 = vor.u32 %v3671_v7, %v3346_v27 }
 0x27e   : > { %vm7764_vm0 = vmand %vm3232_vm4, %vm8860_vm14  ;;  %v3280_v1 = vsel %vm7722_vm12, 0, %v3279_v31  ;;  %v3374_v30 = vrot.slane %v3697_v13, 7  ;;  %v3277_v12 = vsel %vm7722_vm12, 0, %v3276_v49  ;;  %v7780_v16 = vor.u32 %v3685_v20, %v3360_v32  ;;  %s6453_s8 = smov 48   ;;  %s6454_s9 = smov 56  }
 0x27f   : > { %3749 = vrot.lane.b32.xlu1 %v7678_v9, %s6448_s25  ;;  %3747 = vrot.lane.b32.xlu0 %v7680_v10, %s6448_s25  ;;  %3281 = vst [vmem:[#allocation6 + $0x48] sm:$0x1] %v3280_v1  ;;  %v7782_v18 = vor.u32 %v3678_v29, %v3353_v59  ;;  %3278 = vst [vmem:[#allocation6 + $0x40] sm:$0x1] %v3277_v12  ;;  %v3367_v7 = vrot.slane %v3690_v63, 7  ;;  %v3680_v24 = vrot.slane %v3678_v29, 1 }
 0x280   : > { %v3692_v26 = vshll.u32 %v7687_v2, 16  ;;  %vm3483_vm8 = vcmask 130112   ;;  %v6451_v57 = vmov 0   ;;  %v3282_v29 = vld [vmem:[#allocation6 + $0x50] sm:$0x1]  ;;  %v3286_v47 = vsel %vm7722_vm12, 0, %v3285_v23  ;;  %vm8062_vm1 = vmand %vm3575_vm2, %vm1021_vm13 }
 0x281   : > { %v3444_v60 = vld [vmem:[#allocation6 + $0x18] sm:$0xff]  ;;  %v3438_v14 = vld [vmem:[#allocation6 + $0x8] sm:$0xff]  ;;  %3250 = vst.msk [vmem:[#allocation6] sm:$0xff] %vm3232_vm4, %v6451_v57  ;;  %v3704_v48 = vshrl.u32 %v7786_v21, 16  ;;  %vm3838_vm15 = vcmask 254144   ;;  %v7837_v49 = vor.u32 %v7728_v37, %v3683_v19  ;;  %v7841_v27 = vor.u32 %v3680_v24, %v3676_v28  ;;  %v7850_v37 = vld [vmem:[#allocation2 + $0x60] sm:$0xff] }
 0x282   : > { %v3447_v15 = vld [vmem:[#allocation6 + $0x20] sm:$0xff]  ;;  %v3445_v22 = vsel %vm7764_vm0, %v7703_v17, %v3444_v60  ;;  %v3439_v36 = vsel %vm7764_vm0, %v3910_v43, %v3438_v14  ;;  %v3441_v52 = vld [vmem:[#allocation6 + $0x10] sm:$0xff]  ;;  %3484 = vst.msk [vmem:[#allocation6] sm:$0xff] %vm3483_vm8, %v6451_v57  ;;  %v7820_v46 = vor.u32 %v3692_v26, %v3367_v7  ;;  %3287 = vst [vmem:[#allocation6 + $0x58] sm:$0x1] %v3286_v47  ;;  %v3283_v55 = vsel %vm7722_vm12, 0, %v3282_v29 }
 0x283   : > { %3531 = vrot.lane.b32.xlu1 %v7685_v40, %s6447_s23  ;;  %3529 = vrot.lane.b32.xlu0 %v7687_v2, %s6447_s23  ;;  %v3448_v20 = vsel %vm7764_vm0, %v7756_v61, %v3447_v15  ;;  %3446 = vst [vmem:[#allocation6 + $0x18] sm:$0xff] %v3445_v22  ;;  %3440 = vst [vmem:[#allocation6 + $0x8] sm:$0xff] %v3439_v36  ;;  %v3442_v11 = vsel %vm7764_vm0, %v7701_v3, %v3441_v52  ;;  %v3450_v38 = vld [vmem:[#allocation6 + $0x28] sm:$0xff]  ;;  %v3456_v39 = vld [vmem:[#allocation6 + $0x38] sm:$0xff]  ;;  %v3381_v19 = vrot.slane %v3704_v48, 7  ;;  %vm3577_vm7 = vcmask 195719  }
 0x284   : > { %3449 = vst [vmem:[#allocation6 + $0x20] sm:$0xff] %v3448_v20  ;;  %3443 = vst [vmem:[#allocation6 + $0x10] sm:$0xff] %v3442_v11  ;;  %v3451_v41 = vsel %vm7764_vm0, %v7772_v5, %v3450_v38  ;;  %v3453_v44 = vld [vmem:[#allocation6 + $0x30] sm:$0xff]  ;;  %v3291_v59 = vld [vmem:[#allocation6 + $0x68] sm:$0x1]  ;;  %v3706_v14 = vshll.u32 %v7786_v21, 16 }
 0x285   : > { %3576 = vst.msk [vmem:[#allocation6] sm:$0xff] %vm3575_vm2, %v6451_v57  ;;  %3452 = vst [vmem:[#allocation6 + $0x28] sm:$0xff] %v3451_v41  ;;  %v3454_v31 = vsel %vm7764_vm0, %v7782_v18, %v3453_v44  ;;  %v3288_v1 = vld [vmem:[#allocation6 + $0x60] sm:$0x1]  ;;  %v7855_v60 = vld [vmem:[#allocation2 + $0x58] sm:$0xff]  ;;  %v3292_v7 = vsel %vm7722_vm12, 0, %v3291_v59 }
 0x286   : > { %3455 = vst [vmem:[#allocation6 + $0x30] sm:$0xff] %v3454_v31  ;;  %v3462_v32 = vld [vmem:[#allocation6 + $0x48] sm:$0xff]  ;;  %v3459_v12 = vld [vmem:[#allocation6 + $0x40] sm:$0xff]  ;;  %3284 = vst [vmem:[#allocation6 + $0x50] sm:$0x1] %v3283_v55  ;;  %v3400_v22 = vshrl.u32 %v7850_v37, 16  ;;  %v7874_v24 = vor.u32 %v3706_v14, %v3381_v19 }
 0x287   : > { %3753 = vrot.lane.b32.xlu1 %v7711_v25, %s6448_s25  ;;  %3751 = vrot.lane.b32.xlu0 %v7713_v34, %s6448_s25  ;;  %v3460_v28 = vsel %vm7764_vm0, %v7820_v46, %v3459_v12  ;;  %vm7860_vm5 = vmand %vm3838_vm15, %vm8863_vm11  ;;  %3293 = vst [vmem:[#allocation6 + $0x68] sm:$0x1] %v3292_v7  ;;  %v3403_v36 = vshll.u32 %v7850_v37, 16  ;;  %v3289_v20 = vsel %vm7722_vm12, 0, %v3288_v1  ;;  %v3393_v52 = vshrl.u32 %v7855_v60, 16  ;;  %v7906_v1 = vld [vmem:[#allocation2 + $0x60] sm:$0xff] }
 0x288   : > { %3461 = vst [vmem:[#allocation6 + $0x40] sm:$0xff] %v3460_v28  ;;  %3290 = vst [vmem:[#allocation6 + $0x60] sm:$0x1] %v3289_v20  ;;  %v3396_v11 = vshll.u32 %v7855_v60, 16  ;;  %v3402_v29 = vrot.slane %v3400_v22, 7  ;;  %v3694_v12 = vrot.slane %v3692_v26, 1 }
 0x289   : > { %v3294_v59 = vld [vmem:[#allocation6 + $0x70] sm:$0x1]  ;;  %v7915_v7 = vld [vmem:[#allocation2 + $0x58] sm:$0xff]  ;;  %vm8866_vm3 = vsmask.f32 7966  ;;  %vm4064_vm4 = vcmask 261312   ;;  %vm8871_vm9 = vmmov %vm8860_vm14 }
 0x28a   : > { %v7893_v47 = vor.u32 %v3403_v36, %v3402_v29  ;;  %vm8031_vm6 = vmand %vm3577_vm7, %vm8866_vm3  ;;  %vm4211_vm14 = vcmask 392519   ;;  %s6455_s15 = smov 64   ;;  %vm5391_vm15 = vcmask 1045504   ;;  %s6456_s16 = smov 72   ;;  %vm4437_vm11 = vcmask 392512  }
 0x28b   : > { %4018 = vrot.lane.b32.xlu1 %v7701_v3, %s6449_s26  ;;  %4016 = vrot.lane.b32.xlu0 %v3910_v43, %s6449_s26  ;;  %v3457_v43 = vsel %vm7764_vm0, %v7780_v16, %v3456_v39  ;;  %v3468_v39 = vld [vmem:[#allocation6 + $0x58] sm:$0xff]  ;;  %vm8103_vm10 = vmand %vm4064_vm4, %vm8871_vm9  ;;  %vm8879_vm4 = vsmask.f32 256  ;;  %s5655_s17 = scalar_lea.sflag [#allocation4], %s215_s30  ;;  %s6457_s10 = smov [#allocation3]  }
 0x28c   : > { %3458 = vst [vmem:[#allocation6 + $0x38] sm:$0xff] %v3457_v43  ;;  %v3840_v23 = vld [vmem:[#allocation6] sm:$0x1]  ;;  %v3469_v41 = vsel %vm7764_vm0, %v7719_v33, %v3468_v39  ;;  %v3395_v43 = vrot.slane %v3393_v52, 7  ;;  %v7935_v39 = vor.u32 %v3694_v12, %v3690_v63  ;;  %vm8289_vm7 = vmand %vm4437_vm11, %vm1021_vm13  ;;  %vm4750_vm11 = vcmask 523712   ;;  %s6378_s13 = sshll.u32 %s6457_s10, 4  ;;  %s6379_s13 = int_to_ptr.vmem [resolvable:$false] %s6378_s13 }
 0x28d   : > { %v3841_v38 = vsel %vm7860_vm5, 0, %v3840_v23  ;;  %3470 = vst [vmem:[#allocation6 + $0x58] sm:$0xff] %v3469_v41  ;;  %v3465_v44 = vld [vmem:[#allocation6 + $0x50] sm:$0xff]  ;;  %v3295_v23 = vsel %vm7722_vm12, 0, %v3294_v59  ;;  %s6380_s14 = scalar_lea.vmem %s6379_s13, 512 }
 0x28e   : > { %3842 = vst [vmem:[#allocation6] sm:$0x1] %v3841_v38  ;;  %v3466_v31 = vsel %vm7764_vm0, %v7874_v24, %v3465_v44  ;;  %v3474_v55 = vld [vmem:[#allocation6 + $0x68] sm:$0xff]  ;;  %3296 = vst [vmem:[#allocation6 + $0x70] sm:$0x1] %v3295_v23  ;;  %v3708_v44 = vrot.slane %v3706_v14, 1 }
 0x28f   : > { %4148 = vrot.lane.b32.xlu1 %v7649_v54, %s6450_s6  ;;  %4146 = vrot.lane.b32.xlu0 %v7639_v51, %s6450_s6  ;;  %v7808_v51 = vor.u32 %v3699_v45, %v3374_v30  ;;  %3467 = vst [vmem:[#allocation6 + $0x50] sm:$0xff] %v3466_v31  ;;  %v3475_v19 = vsel %vm7764_vm0, %v7893_v47, %v3474_v55  ;;  %v3471_v28 = vld [vmem:[#allocation6 + $0x60] sm:$0xff]  ;;  %v3715_v31 = vrot.slane %v3713_v56, 1  ;;  %v7969_v55 = vld [vmem:[#allocation2 + $0x68] sm:$0xff] }
 0x290   : > { %3476 = vst [vmem:[#allocation6 + $0x68] sm:$0xff] %v3475_v19 }
 0x291   : > { %v3463_v30 = vsel %vm7764_vm0, %v7808_v51, %v3462_v32  ;;  %v7900_v32 = vor.u32 %v3396_v11, %v3395_v43 }
 0x292   : > { %3464 = vst [vmem:[#allocation6 + $0x48] sm:$0xff] %v3463_v30  ;;  %v3701_v30 = vrot.slane %v3699_v45, 1  ;;  %v7922_v45 = vld [vmem:[#allocation2 + $0x68] sm:$0xff] }
 0x293   : > { %3535 = vrot.lane.b32.xlu1 %v7691_v8, %s6447_s23  ;;  %3533 = vrot.lane.b32.xlu0 %v7786_v21, %s6447_s23  ;;  %v3472_v20 = vsel %vm7764_vm0, %v7900_v32, %v3471_v28  ;;  %v3407_v26 = vshrl.u32 %v7922_v45, 16  ;;  %v3410_v41 = vshll.u32 %v7922_v45, 16 }
 0x294   : > { %3473 = vst [vmem:[#allocation6 + $0x60] sm:$0xff] %v3472_v20  ;;  %v7931_v38 = vor.u32 %v3701_v30, %v3697_v13 }
 0x295   : > { %v3409_v29 = vrot.slane %v3407_v26, 7  ;;  %v3477_v13 = vld [vmem:[#allocation6 + $0x70] sm:$0xff] }
 0x297   : > { %3757 = vrot.lane.b32.xlu1 %v7837_v49, %s6448_s25  ;;  %3755 = vrot.lane.b32.xlu0 %v7841_v27, %s6448_s25  ;;  %v7942_v43 = vor.u32 %v3410_v41, %v3409_v29  ;;  %v3297_v29 = vld [vmem:[#allocation6 + $0x78] sm:$0x1] }
 0x299   : > { %v3478_v63 = vsel %vm7764_vm0, %v7942_v43, %v3477_v13 }
 0x29a   : > { %3479 = vst [vmem:[#allocation6 + $0x70] sm:$0xff] %v3478_v63  ;;  %v3298_v63 = vsel %vm7722_vm12, 0, %v3297_v29  ;;  %v4066_v29 = vld [vmem:[#allocation6] sm:$0xff]  ;;  %vm4194_vm12 = vcmask 326912  }
 0x29b   : > { %4022 = vrot.lane.b32.xlu1 %v7756_v61, %s6449_s26  ;;  %4020 = vrot.lane.b32.xlu0 %v7703_v17, %s6449_s26  ;;  %3299 = vst [vmem:[#allocation6 + $0x78] sm:$0x1] %v3298_v63 }
 0x29f   : > { %4152 = vrot.lane.b32.xlu1 %v7647_v53, %s6450_s6  ;;  %4150 = vrot.lane.b32.xlu0 %v7637_v50, %s6450_s6 }
 0x2a3   : > { %3539 = vrot.lane.b32.xlu1 %v7906_v1, %s6447_s23  ;;  %3537 = vrot.lane.b32.xlu0 %v7915_v7, %s6447_s23 }
 0x2a7   : > { %3761 = vrot.lane.b32.xlu1 %v7931_v38, %s6448_s25  ;;  %3759 = vrot.lane.b32.xlu0 %v7935_v39, %s6448_s25 }
 0x2ab   : > { %4026 = vrot.lane.b32.xlu1 %v7782_v18, %s6449_s26  ;;  %4024 = vrot.lane.b32.xlu0 %v7772_v5, %s6449_s26  ;;  %v7965_v18 = vor.u32 %v3708_v44, %v3704_v48  ;;  %v3727_v48 = vshll.u32 %v7906_v1, 16 }
 0x2af   : > { %4156 = vrot.lane.b32.xlu1 %v7671_v4, %s6450_s6  ;;  %4154 = vrot.lane.b32.xlu0 %v7661_v62, %s6450_s6  ;;  %v3716_v4 = vor.u32 %v3715_v31, %v3711_v42 }
 0x2b3   : > { %4391 = vrot.lane.b32.xlu1 %v7680_v10, %s6452_s7  ;;  %4389 = vrot.lane.b32.xlu0 %v7657_v58, %s6452_s7  ;;  %v3720_v58 = vshll.u32 %v7915_v7, 16  ;;  %v3718_v10 = vshrl.u32 %v7915_v7, 16 }
 0x2b5   : > { %v3722_v56 = vrot.slane %v3720_v58, 1 }
 0x2b7   : > { %3763 = vrot.lane.b32.xlu1 %v7965_v18, %s6448_s25  ;;  %3541 = vrot.lane.b32.xlu0 %v7969_v55, %s6447_s23  ;;  %v3723_v42 = vor.u32 %v3722_v56, %v3718_v10 }
 0x2bb   : > { %4028 = vrot.lane.b32.xlu1 %v7780_v16, %s6449_s26  ;;  %3765 = vrot.lane.b32.xlu0 %v3716_v4, %s6448_s25  ;;  %v3725_v16 = vshrl.u32 %v7906_v1, 16  ;;  %v4904_v4 = vld [vmem:[#allocation2 + $0x70] sm:$0xff] }
 0x2bc   : > { %v5000_v56 = vshll.u32 %v4904_v4, 16 }
 0x2bf   : > { %4158 = vrot.lane.b32.xlu1 %v7669_v6, %s6450_s6  ;;  %4030 = vrot.lane.b32.xlu0 %v7820_v46, %s6449_s26  ;;  %v3729_v6 = vrot.slane %v3727_v48, 1 }
 0x2c1   : > { %v3730_v46 = vor.u32 %v3729_v6, %v3725_v16  ;;  %v4998_v6 = vshrl.u32 %v4904_v4, 16 }
 0x2c3   : > { %4393 = vrot.lane.b32.xlu1 %v7678_v9, %s6452_s7  ;;  %4160 = vrot.lane.b32.xlu0 %v7687_v2, %s6450_s6  ;;  %v3734_v9 = vshll.u32 %v7969_v55, 16  ;;  %v3732_v2 = vshrl.u32 %v7969_v55, 16 }
 0x2c7   : > { %3767 = vrot.lane.b32.xlu1 %v3723_v42, %s6448_s25  ;;  %4395 = vrot.lane.b32.xlu0 %v7713_v34, %s6452_s7  ;;  %v3736_v34 = vrot.slane %v3734_v9, 1 }
 0x2cb   : > { %4032 = vrot.lane.b32.xlu1 %v7808_v51, %s6449_s26  ;;  %3769 = vrot.lane.b32.xlu0 %v3730_v46, %s6448_s25  ;;  %v8081_v46 = vld [vmem:[#allocation2 + $0x28] sm:$0xff] }
 0x2cf   : > { %4162 = vrot.lane.b32.xlu1 %v7685_v40, %s6450_s6  ;;  %4034 = vrot.lane.b32.xlu0 %v7874_v24, %s6449_s26  ;;  %v3737_v40 = vor.u32 %v3736_v34, %v3732_v2 }
 0x2d3   : > { %4397 = vrot.lane.b32.xlu1 %v7711_v25, %s6452_s7  ;;  %4164 = vrot.lane.b32.xlu0 %v7786_v21, %s6450_s6  ;;  %v3984_v25 = vrot.slane %v3718_v10, 7 }
 0x2d5   : > { %v3987_v21 = vor.u32 %v3984_v25, %v3720_v58 }
 0x2d7   : > { %4658 = vrot.lane.b32.xlu1 %v7701_v3, %s6453_s8  ;;  %4399 = vrot.lane.b32.xlu0 %v7841_v27, %s6452_s7 }
 0x2db   : > { %4660 = vrot.lane.b32.xlu1 %v7703_v17, %s6453_s8  ;;  %3771 = vrot.lane.b32.xlu0 %v3737_v40, %s6448_s25 }
 0x2df   : > { %4036 = vrot.lane.b32.xlu1 %v7719_v33, %s6449_s26  ;;  %4782 = vrot.lane.b32.xlu0 %v7649_v54, %s6454_s9 }
 0x2e1   : > { %v3520_v51 = vpop.permute.xlu1 %3519  ;;  %v3516_v3 = vpop.permute.xlu0 %3515 }
 0x2e2   : > { %3562 = vst.msk [vmem:[#allocation6 + $0x18] sm:$0xff] %vm3483_vm8, %v3520_v51  ;;  %3560 = vst.msk [vmem:[#allocation6 + $0x8] sm:$0xff] %vm3483_vm8, %v3516_v3  ;;  %v3416_v51 = vrot.slane %v4998_v6, 7 }
 0x2e3   : > { %4038 = vrot.lane.b32.xlu1 %v3987_v21, %s6449_s26  ;;  %4784 = vrot.lane.b32.xlu0 %v7637_v50, %s6454_s9 }
 0x2e5   : > { %v3522_v17 = vpop.permute.xlu1 %3521  ;;  %v3518_v27 = vpop.permute.xlu0 %3517 }
 0x2e6   : > { %3563 = vst.msk [vmem:[#allocation6 + $0x20] sm:$0xff] %vm3483_vm8, %v3522_v17  ;;  %3561 = vst.msk [vmem:[#allocation6 + $0x10] sm:$0xff] %vm3483_vm8, %v3518_v27 }
 0x2e7   : > { %4168 = vrot.lane.b32.xlu1 %v7915_v7, %s6450_s6  ;;  %4166 = vrot.lane.b32.xlu0 %v7691_v8, %s6450_s6  ;;  %v3991_v8 = vrot.slane %v3725_v16, 7  ;;  %v8079_v16 = vld [vmem:[#allocation2 + $0x30] sm:$0xff] }
 0x2e8   : > { %v4589_v17 = vshrl.u32 %v8079_v16, 16 }
 0x2e9   : > { %v3586_v33 = vld [vmem:[#allocation6 + $0x18] sm:$0x80]  ;;  %v3580_v50 = vld [vmem:[#allocation6 + $0x8] sm:$0x80]  ;;  %v3746_v14 = vpop.permute.xlu1 %3745  ;;  %v3524_v24 = vpop.permute.xlu0 %3523 }
 0x2ea   : > { %v3587_v59 = vsel %vm8031_vm6, 0, %v3586_v33  ;;  %v3581_v30 = vsel %vm8031_vm6, 0, %v3580_v50  ;;  %3564 = vst.msk [vmem:[#allocation6 + $0x28] sm:$0xff] %vm3483_vm8, %v3524_v24  ;;  %v4582_v50 = vshrl.u32 %v8081_v46, 16  ;;  %v3480_v24 = vld [vmem:[#allocation6 + $0x78] sm:$0xff] }
 0x2eb   : > { %3588 = vst [vmem:[#allocation6 + $0x18] sm:$0x80] %v3587_v59  ;;  %3582 = vst [vmem:[#allocation6 + $0x8] sm:$0x80] %v3581_v30  ;;  %4403 = vrot.lane.b32.xlu1 %v7935_v39, %s6452_s7  ;;  %4401 = vrot.lane.b32.xlu0 %v7837_v49, %s6452_s7  ;;  %v3994_v49 = vor.u32 %v3991_v8, %v3727_v48  ;;  %v3998_v39 = vrot.slane %v3732_v2, 7  ;;  %v5002_v2 = vrot.slane %v5000_v56, 1 }
 0x2ec   : > { %v4584_v63 = vrot.slane %v4582_v50, 7 }
 0x2ed   : > { %v3589_v12 = vld [vmem:[#allocation6 + $0x20] sm:$0x80]  ;;  %v3583_v19 = vld [vmem:[#allocation6 + $0x10] sm:$0x80]  ;;  %v3528_v28 = vpop.permute.xlu1 %3527  ;;  %v3526_v7 = vpop.permute.xlu0 %3525  ;;  %v4001_v35 = vor.u32 %v3998_v39, %v3734_v9  ;;  %v8090_v27 = vor.u32 %v5002_v2, %v4998_v6 }
 0x2ee   : > { %v3590_v20 = vsel %vm8031_vm6, 0, %v3589_v12  ;;  %v3584_v23 = vsel %vm8031_vm6, 0, %v3583_v19  ;;  %3566 = vst.msk [vmem:[#allocation6 + $0x38] sm:$0xff] %vm3483_vm8, %v3528_v28  ;;  %3565 = vst.msk [vmem:[#allocation6 + $0x30] sm:$0xff] %vm3483_vm8, %v3526_v7 }
 0x2ef   : > { %3591 = vst [vmem:[#allocation6 + $0x20] sm:$0x80] %v3590_v20  ;;  %3585 = vst [vmem:[#allocation6 + $0x10] sm:$0x80] %v3584_v23  ;;  %4664 = vrot.lane.b32.xlu1 %v7772_v5, %s6453_s8  ;;  %4662 = vrot.lane.b32.xlu0 %v7756_v61, %s6453_s8  ;;  %v4592_v20 = vshll.u32 %v8079_v16, 16  ;;  %v4585_v23 = vshll.u32 %v8081_v46, 16 }
 0x2f1   : > { %v3592_v44 = vld [vmem:[#allocation6 + $0x28] sm:$0x80]  ;;  %v3750_v31 = vpop.permute.xlu1 %3749  ;;  %v3748_v5 = vpop.permute.xlu0 %3747  ;;  %v4587_v6 = vor.u32 %v4585_v23, %v4584_v63 }
 0x2f2   : > { %v3793_v61 = vld [vmem:[#allocation6 + $0x8] sm:$0xff]  ;;  %v3593_v58 = vsel %vm8031_vm6, 0, %v3592_v44  ;;  %v3799_v10 = vld [vmem:[#allocation6 + $0x18] sm:$0xff] }
 0x2f3   : > { %v3794_v48 = vsel %vm8062_vm1, %v3746_v14, %v3793_v61  ;;  %3594 = vst [vmem:[#allocation6 + $0x28] sm:$0x80] %v3593_v58  ;;  %v3800_v42 = vsel %vm8062_vm1, %v3750_v31, %v3799_v10  ;;  %4040 = vrot.lane.b32.xlu1 %v3994_v49, %s6449_s26  ;;  %4786 = vrot.lane.b32.xlu0 %v7647_v53, %s6454_s9 }
 0x2f4   : > { %3795 = vst [vmem:[#allocation6 + $0x8] sm:$0xff] %v3794_v48  ;;  %3801 = vst [vmem:[#allocation6 + $0x18] sm:$0xff] %v3800_v42  ;;  %v3419_v14 = vor.u32 %v5000_v56, %v3416_v51 }
 0x2f5   : > { %v3598_v34 = vld [vmem:[#allocation6 + $0x38] sm:$0x80]  ;;  %v3595_v40 = vld [vmem:[#allocation6 + $0x30] sm:$0x80]  ;;  %v3532_v25 = vpop.permute.xlu1 %3531  ;;  %v3530_v21 = vpop.permute.xlu0 %3529 }
 0x2f6   : > { %v3599_v3 = vsel %vm8031_vm6, 0, %v3598_v34  ;;  %v3596_v53 = vsel %vm8031_vm6, 0, %v3595_v40  ;;  %v3796_v9 = vld [vmem:[#allocation6 + $0x10] sm:$0xff]  ;;  %3568 = vst.msk [vmem:[#allocation6 + $0x48] sm:$0xff] %vm3483_vm8, %v3532_v25  ;;  %3567 = vst.msk [vmem:[#allocation6 + $0x40] sm:$0xff] %vm3483_vm8, %v3530_v21  ;;  %v3802_v8 = vld [vmem:[#allocation6 + $0x20] sm:$0xff]  ;;  %v3481_v12 = vsel %vm7764_vm0, %v3419_v14, %v3480_v24 }
 0x2f7   : > { %3600 = vst [vmem:[#allocation6 + $0x38] sm:$0x80] %v3599_v3  ;;  %3597 = vst [vmem:[#allocation6 + $0x30] sm:$0x80] %v3596_v53  ;;  %v3797_v33 = vsel %vm8062_vm1, %v3748_v5, %v3796_v9  ;;  %4042 = vrot.lane.b32.xlu1 %v4001_v35, %s6449_s26  ;;  %4788 = vrot.lane.b32.xlu0 %v7661_v62, %s6454_s9  ;;  %v4591_v62 = vrot.slane %v4589_v17, 7  ;;  %v8123_v5 = vld [vmem:[#allocation2 + $0x70] sm:$0xff] }
 0x2f8   : > { %3798 = vst [vmem:[#allocation6 + $0x10] sm:$0xff] %v3797_v33  ;;  %3482 = vst [vmem:[#allocation6 + $0x78] sm:$0xff] %v3481_v12  ;;  %v4003_v2 = vshrl.u32 %v8123_v5, 16  ;;  %v4892_v40 = vld [vmem:[#allocation2 + $0x10] sm:$0xff]  ;;  %v4891_v25 = vld [vmem:[#allocation2 + $0x8] sm:$0xff]  ;;  %v4006_v3 = vshll.u32 %v8123_v5, 16 }
 0x2f9   : > { %v3754_v59 = vpop.permute.xlu1 %3753  ;;  %v3752_v30 = vpop.permute.xlu0 %3751  ;;  %v4594_v35 = vor.u32 %v4592_v20, %v4591_v62  ;;  %v4916_v14 = vshll.u32 %v4892_v40, 16  ;;  %v4909_v24 = vshll.u32 %v4891_v25, 16  ;;  %v4914_v62 = vshrl.u32 %v4892_v40, 16  ;;  %vm8874_vm0 = vmmov %vm8866_vm3 }
 0x2fa   : > { %v3805_v19 = vld [vmem:[#allocation6 + $0x28] sm:$0xff]  ;;  %v3803_v28 = vsel %vm8062_vm1, %v3752_v30, %v3802_v8  ;;  %v4005_v33 = vrot.slane %v4003_v2, 7  ;;  %vm8166_vm2 = vmand %vm4211_vm14, %vm8874_vm0  ;;  %vm4490_vm3 = vcmask 450944   ;;  %vm4488_vm14 = vcmask 458112  }
 0x2fb   : > { %v3843_v49 = vld [vmem:[#allocation6 + $0x8] sm:$0x1]  ;;  %v3849_v0 = vld [vmem:[#allocation6 + $0x18] sm:$0x1]  ;;  %v3806_v39 = vsel %vm8062_vm1, %v3754_v59, %v3805_v19  ;;  %3804 = vst [vmem:[#allocation6 + $0x20] sm:$0xff] %v3803_v28  ;;  %4172 = vrot.lane.b32.xlu1 %v7969_v55, %s6450_s6  ;;  %4170 = vrot.lane.b32.xlu0 %v7906_v1, %s6450_s6  ;;  %v6364_v1 = vld [vmem:[%s8825_s3] sm:$0xff]  }
 0x2fc   : > { %v3844_v44 = vsel %vm7860_vm5, 0, %v3843_v49  ;;  %v3850_v31 = vsel %vm7860_vm5, 0, %v3849_v0  ;;  %3807 = vst [vmem:[#allocation6 + $0x28] sm:$0xff] %v3806_v39  ;;  %6107 = vmatprep.subr.bf16.mxu1 %v6364_v1  ;;  %v6366_v28 = vld [vmem:[%s8825_s3 + $0x10] sm:$0xff]   ;;  %v8177_v0 = vor.u32 %v4006_v3, %v4005_v33  ;;  %v4918_v39 = vrot.slane %v4916_v14, 1  ;;  %vm8333_vm9 = vmand %vm4490_vm3, %vm8879_vm4 }
 0x2fd   : > { %3845 = vst [vmem:[#allocation6 + $0x8] sm:$0x1] %v3844_v44  ;;  %3851 = vst [vmem:[#allocation6 + $0x18] sm:$0x1] %v3850_v31  ;;  %v3604_v4 = vld [vmem:[#allocation6 + $0x48] sm:$0x80]  ;;  %v4019_v61 = vpop.permute.xlu1 %4018  ;;  %v4017_v58 = vpop.permute.xlu0 %4016  ;;  %6108 = vmatpush3.bf16.msra.mxu1 %v6364_v1 }
 0x2fe   : > { %v3601_v55 = vld [vmem:[#allocation6 + $0x40] sm:$0x80]  ;;  %v3605_v10 = vsel %vm8031_vm6, 0, %v3604_v4  ;;  %v4067_v48 = vsel %vm8103_vm10, %v4017_v58, %v4066_v29  ;;  %v4907_v29 = vshrl.u32 %v4891_v25, 16  ;;  %v4911_v63 = vrot.slane %v4909_v24, 1  ;;  %v3811_v44 = vld [vmem:[#allocation6 + $0x38] sm:$0xff] }
 0x2ff   : > { %v3602_v56 = vsel %vm8031_vm6, 0, %v3601_v55  ;;  %v3846_v42 = vld [vmem:[#allocation6 + $0x10] sm:$0x1]  ;;  %3606 = vst [vmem:[#allocation6 + $0x48] sm:$0x80] %v3605_v10  ;;  %4068 = vst [vmem:[#allocation6] sm:$0xff] %v4067_v48  ;;  %4407 = vrot.lane.b32.xlu1 %v7965_v18, %s6452_s7  ;;  %4405 = vrot.lane.b32.xlu0 %v7931_v38, %s6452_s7 }
 0x300   : > { %3603 = vst [vmem:[#allocation6 + $0x40] sm:$0x80] %v3602_v56  ;;  %v3847_v34 = vsel %vm7860_vm5, 0, %v3846_v42  ;;  %v6365_v38 = vld [vmem:[%s8825_s3 + $0x8] sm:$0xff]   ;;  %v8179_v31 = vld [vmem:[#allocation2 + $0x50] sm:$0xff]  ;;  %v6367_v1 = vld [vmem:[%s8825_s3 + $0x18] sm:$0xff]   ;;  %v4919_v42 = vor.u32 %v4918_v39, %v4914_v62 }
 0x301   : > { %3848 = vst [vmem:[#allocation6 + $0x10] sm:$0x1] %v3847_v34  ;;  %v4149_v18 = vpop.permute.xlu1 %4148  ;;  %v4147_v21 = vpop.permute.xlu0 %4146  ;;  %6109 = vmatprep.subr.bf16.mxu1 %v6365_v38  ;;  %v3808_v58 = vld [vmem:[#allocation6 + $0x30] sm:$0xff]  ;;  %v4348_v25 = vshrl.u32 %v8179_v31, 16  ;;  %v8217_v62 = vld [vmem:[#allocation2 + $0x40] sm:$0xff]  ;;  %vm4844_vm3 = vcmask 589319  }
 0x302   : > { %v3852_v51 = vld [vmem:[#allocation6 + $0x20] sm:$0x1]  ;;  %4195 = vst.msk [vmem:[#allocation6] sm:$0xff] %vm4194_vm12, %v4147_v21  ;;  %6110 = vmatpush3.bf16.msra.mxu1 %v6365_v38  ;;  %vm8882_vm0 = vsmask.f32 7938 }
 0x303   : > { %v3855_v53 = vld [vmem:[#allocation6 + $0x28] sm:$0x1]  ;;  %v3853_v9 = vsel %vm7860_vm5, 0, %v3852_v51  ;;  %4668 = vrot.lane.b32.xlu1 %v4594_v35, %s6453_s8  ;;  %4666 = vrot.lane.b32.xlu0 %v4587_v6, %s6453_s8  ;;  %v4912_v35 = vor.u32 %v4911_v63, %v4907_v29  ;;  %v4350_v6 = vshll.u32 %v8179_v31, 16  ;;  %vm8885_vm4 = vsmask.f32 7966 }
 0x304   : > { %v3856_v59 = vsel %vm7860_vm5, 0, %v3855_v53  ;;  %3854 = vst [vmem:[#allocation6 + $0x20] sm:$0x1] %v3853_v9  ;;  %v4069_v30 = vld [vmem:[#allocation6 + $0x8] sm:$0xff]  ;;  %6111 = vmatprep.subr.bf16.mxu1 %v6366_v28  ;;  %v4075_v34 = vld [vmem:[#allocation6 + $0x18] sm:$0xff] }
 0x305   : > { %3857 = vst [vmem:[#allocation6 + $0x28] sm:$0x1] %v3856_v59  ;;  %v4070_v8 = vsel %vm8103_vm10, %v4019_v61, %v4069_v30  ;;  %v3536_v12 = vpop.permute.xlu1 %3535  ;;  %v3534_v19 = vpop.permute.xlu0 %3533  ;;  %v6368_v9 = vld [vmem:[%s8825_s3 + $0x20] sm:$0x3f]  }
 0x306   : > { %4071 = vst [vmem:[#allocation6 + $0x8] sm:$0xff] %v4070_v8  ;;  %3570 = vst.msk [vmem:[#allocation6 + $0x58] sm:$0xff] %vm3483_vm8, %v3536_v12  ;;  %6112 = vmatpush3.bf16.msra.mxu1 %v6366_v28  ;;  %v6350_v12 = vld [vmem:[%s6544_s11] sm:$0xff]   ;;  %v5393_v39 = vsel %vm5391_vm15, %v6368_v9, 0 }
 0x307   : > { %3569 = vst.msk [vmem:[#allocation6 + $0x50] sm:$0xff] %vm3483_vm8, %v3534_v19  ;;  %3543 = vrot.lane.b32.xlu1 %v8123_v5, %s6447_s23  ;;  %4790 = vrot.lane.b32.xlu0 %v8081_v46, %s6454_s9  ;;  %v4352_v19 = vrot.slane %v4350_v6, 1 }
 0x308   : > { %4196 = vst.msk [vmem:[#allocation6 + $0x8] sm:$0xff] %vm4194_vm12, %v4149_v18  ;;  %v4072_v40 = vld [vmem:[#allocation6 + $0x10] sm:$0xff]  ;;  %v8196_v18 = vld [vmem:[#allocation2 + $0x38] sm:$0xff]  ;;  %6113 = vmatprep.subr.bf16.mxu1 %v6367_v1 }
 0x309   : > { %v4213_v4 = vld [vmem:[#allocation6] sm:$0x80]  ;;  %v3758_v55 = vpop.permute.xlu1 %3757  ;;  %v3756_v61 = vpop.permute.xlu0 %3755  ;;  %v4596_v28 = vshrl.u32 %v8196_v18, 16 }
 0x30a   : > { %v4214_v10 = vsel %vm8166_vm2, 0, %v4213_v4  ;;  %v3812_v56 = vsel %vm8062_vm1, %v3758_v55, %v3811_v44  ;;  %v3809_v48 = vsel %vm8062_vm1, %v3756_v61, %v3808_v58  ;;  %6114 = vmatpush3.bf16.msra.mxu1 %v6367_v1  ;;  %v4599_v44 = vshll.u32 %v8196_v18, 16 }
 0x30b   : > { %4215 = vst [vmem:[#allocation6] sm:$0x80] %v4214_v10  ;;  %3813 = vst [vmem:[#allocation6 + $0x38] sm:$0xff] %v3812_v56  ;;  %4792 = vrot.lane.b32.xlu1 %v8079_v16, %s6454_s9  ;;  %4044 = vrot.lane.b32.xlu0 %v8177_v0, %s6449_s26  ;;  %v4359_v61 = vrot.slane %v3396_v11, 1  ;;  %v4603_v58 = vshrl.u32 %v8217_v62, 16  ;;  %v6351_v56 = vld [vmem:[%s6544_s11 + $0x8] sm:$0xff]  }
 0x30c   : > { %3810 = vst [vmem:[#allocation6 + $0x30] sm:$0xff] %v3809_v48  ;;  %6150 = vmatprep.subr.msk.bf16.mxu1 %vm5391_vm15, %v6368_v9  ;;  %v8235_v48 = vor.u32 %v4352_v19, %v4348_v25  ;;  %v4598_v11 = vrot.slane %v4596_v28, 7  ;;  %vm8422_vm15 = vmand %vm4488_vm14, %vm8882_vm0 }
 0x30d   : > { %v3610_v21 = vld [vmem:[#allocation6 + $0x58] sm:$0x80]  ;;  %v4023_v51 = vpop.permute.xlu1 %4022  ;;  %v4021_v53 = vpop.permute.xlu0 %4020  ;;  %vm8470_vm0 = vmand %vm4844_vm3, %vm8885_vm4  ;;  %vm4842_vm3 = vcmask 589312  }
 0x30e   : > { %v3607_v38 = vld [vmem:[#allocation6 + $0x50] sm:$0x80]  ;;  %v3611_v14 = vsel %vm8031_vm6, 0, %v3610_v21  ;;  %v4076_v59 = vsel %vm8103_vm10, %v4023_v51, %v4075_v34  ;;  %v4073_v30 = vsel %vm8103_vm10, %v4021_v53, %v4072_v40  ;;  %6116 = vmatpush3.bf16.msra.mxu1 %v5393_v39  ;;  %v4606_v40 = vshll.u32 %v8217_v62, 16  ;;  %v4894_v21 = vld [vmem:[#allocation2 + $0x20] sm:$0xff] }
 0x30f   : > { %v4216_v33 = vld [vmem:[#allocation6 + $0x8] sm:$0x80]  ;;  %v3608_v24 = vsel %vm8031_vm6, 0, %v3607_v38  ;;  %3612 = vst [vmem:[#allocation6 + $0x58] sm:$0x80] %v3611_v14  ;;  %4077 = vst [vmem:[#allocation6 + $0x18] sm:$0xff] %v4076_v59  ;;  %5013 = vrot.lane.b32.xlu1 %v4919_v42, %s6455_s15  ;;  %5011 = vrot.lane.b32.xlu0 %v4912_v35, %s6455_s15  ;;  %v4601_v38 = vor.u32 %v4599_v44, %v4598_v11  ;;  %v8249_v51 = vor.u32 %v4359_v61, %v3393_v52 }
 0x310   : > { %v4217_v8 = vsel %vm8166_vm2, 0, %v4216_v33  ;;  %3609 = vst [vmem:[#allocation6 + $0x50] sm:$0x80] %v3608_v24  ;;  %4074 = vst [vmem:[#allocation6 + $0x10] sm:$0xff] %v4073_v30  ;;  %v4893_v42 = vld [vmem:[#allocation2 + $0x18] sm:$0xff]  ;;  %v4605_v53 = vrot.slane %v4603_v58, 7 }
 0x311   : > { %4218 = vst [vmem:[#allocation6 + $0x8] sm:$0x80] %v4217_v8  ;;  %v4153_v29 = vpop.permute.xlu1 %4152  ;;  %v4151_v63 = vpop.permute.xlu0 %4150  ;;  %v4923_v9 = vshll.u32 %v4893_v42, 16  ;;  %v3817_v33 = vld [vmem:[#allocation6 + $0x48] sm:$0xff]  ;;  %v3814_v8 = vld [vmem:[#allocation6 + $0x40] sm:$0xff]  ;;  %v4928_v61 = vshrl.u32 %v4894_v21, 16 }
 0x312   : > { %v3861_v4 = vld [vmem:[#allocation6 + $0x38] sm:$0x1]  ;;  %4198 = vst.msk [vmem:[#allocation6 + $0x18] sm:$0xff] %vm4194_vm12, %v4153_v29  ;;  %4197 = vst.msk [vmem:[#allocation6 + $0x10] sm:$0xff] %vm4194_vm12, %v4151_v63  ;;  %v4608_v29 = vor.u32 %v4606_v40, %v4605_v53  ;;  %v4921_v63 = vshrl.u32 %v4893_v42, 16  ;;  %v4081_v11 = vld [vmem:[#allocation6 + $0x28] sm:$0xff] }
 0x313   : > { %v3858_v55 = vld [vmem:[#allocation6 + $0x30] sm:$0x1]  ;;  %v3862_v1 = vsel %vm7860_vm5, 0, %v3861_v4  ;;  %5215 = vrot.lane.b32.xlu1 %v6350_v12, %s6456_s16  ;;  %4174 = vrot.lane.b32.xlu0 %v8123_v5, %s6450_s6  ;;  %v4930_v12 = vshll.u32 %v4894_v21, 16  ;;  %v4925_v4 = vrot.slane %v4923_v9, 1  ;;  %v8277_v53 = vld [vmem:[#allocation2 + $0x48] sm:$0xff] }
 0x314   : > { %v3859_v10 = vsel %vm7860_vm5, 0, %v3858_v55  ;;  %3863 = vst [vmem:[#allocation6 + $0x38] sm:$0x1] %v3862_v1  ;;  %v4078_v55 = vld [vmem:[#allocation6 + $0x20] sm:$0xff] }
 0x315   : > { %3860 = vst [vmem:[#allocation6 + $0x30] sm:$0x1] %v3859_v10  ;;  %v3540_v35 = vpop.permute.xlu1 %3539  ;;  %v3538_v34 = vpop.permute.xlu0 %3537  ;;  %v4926_v21 = vor.u32 %v4925_v4, %v4921_v63 }
 0x316   : > { %3572 = vst.msk [vmem:[#allocation6 + $0x68] sm:$0xff] %vm3483_vm8, %v3540_v35  ;;  %3571 = vst.msk [vmem:[#allocation6 + $0x60] sm:$0xff] %vm3483_vm8, %v3538_v34  ;;  %v4932_v34 = vrot.slane %v4930_v12, 1 }
 0x317   : > { %5217 = vrot.lane.b32.xlu1 %v6351_v56, %s6456_s16  ;;  %4409 = vrot.lane.b32.xlu0 %v8235_v48, %s6452_s7 }
 0x318   : > { %v4442_v4 = vld [vmem:[#allocation6 + $0x8] sm:$0xff] }
 0x319   : > { %v4222_v14 = vld [vmem:[#allocation6 + $0x18] sm:$0x80]  ;;  %v4219_v24 = vld [vmem:[#allocation6 + $0x10] sm:$0x80]  ;;  %v3762_v59 = vpop.permute.xlu1 %3761  ;;  %v3760_v30 = vpop.permute.xlu0 %3759 }
 0x31a   : > { %v4223_v19 = vsel %vm8166_vm2, 0, %v4222_v14  ;;  %v4220_v39 = vsel %vm8166_vm2, 0, %v4219_v24  ;;  %v3818_v60 = vsel %vm8062_vm1, %v3762_v59, %v3817_v33  ;;  %v3815_v52 = vsel %vm8062_vm1, %v3760_v30, %v3814_v8 }
 0x31b   : > { %4224 = vst [vmem:[#allocation6 + $0x18] sm:$0x80] %v4223_v19  ;;  %4221 = vst [vmem:[#allocation6 + $0x10] sm:$0x80] %v4220_v39  ;;  %4670 = vrot.lane.b32.xlu1 %v4601_v38, %s6453_s8  ;;  %4411 = vrot.lane.b32.xlu0 %v8249_v51, %s6452_s7  ;;  %v4933_v8 = vor.u32 %v4932_v34, %v4928_v61  ;;  %v4439_v61 = vld [vmem:[#allocation6] sm:$0xff]  ;;  %v4373_v34 = vrot.slane %v3410_v41, 1 }
 0x31c   : > { %3819 = vst [vmem:[#allocation6 + $0x48] sm:$0xff] %v3818_v60  ;;  %3816 = vst [vmem:[#allocation6 + $0x40] sm:$0xff] %v3815_v52  ;;  %v6352_v60 = vld [vmem:[%s6544_s11 + $0x10] sm:$0xff]   ;;  %v4366_v52 = vrot.slane %v3403_v36, 1  ;;  %v6353_v36 = vld [vmem:[%s6544_s11 + $0x18] sm:$0xff]  }
 0x31d   : > { %v3616_v1 = vld [vmem:[#allocation6 + $0x68] sm:$0x80]  ;;  %v3613_v10 = vld [vmem:[#allocation6 + $0x60] sm:$0x80]  ;;  %v4027_v56 = vpop.permute.xlu1 %4026  ;;  %v4025_v35 = vpop.permute.xlu0 %4024 }
 0x31e   : > { %v3617_v33 = vsel %vm8031_vm6, 0, %v3616_v1  ;;  %v3614_v38 = vsel %vm8031_vm6, 0, %v3613_v10  ;;  %v4082_v14 = vsel %vm8103_vm10, %v4027_v56, %v4081_v11  ;;  %v4079_v42 = vsel %vm8103_vm10, %v4025_v35, %v4078_v55 }
 0x31f   : > { %3618 = vst [vmem:[#allocation6 + $0x68] sm:$0x80] %v3617_v33  ;;  %3615 = vst [vmem:[#allocation6 + $0x60] sm:$0x80] %v3614_v38  ;;  %4794 = vrot.lane.b32.xlu1 %v8196_v18, %s6454_s9  ;;  %4672 = vrot.lane.b32.xlu0 %v4608_v29, %s6453_s8  ;;  %v4610_v29 = vshrl.u32 %v8277_v53, 16  ;;  %v8306_v56 = vor.u32 %v4366_v52, %v3400_v22  ;;  %v4613_v35 = vshll.u32 %v8277_v53, 16 }
 0x320   : > { %4083 = vst [vmem:[#allocation6 + $0x28] sm:$0xff] %v4082_v14  ;;  %4080 = vst [vmem:[#allocation6 + $0x20] sm:$0xff] %v4079_v42  ;;  %v3820_v42 = vld [vmem:[#allocation6 + $0x50] sm:$0xff] }
 0x321   : > { %v4157_v9 = vpop.permute.xlu1 %4156  ;;  %v4155_v24 = vpop.permute.xlu0 %4154  ;;  %v4612_v11 = vrot.slane %v4610_v29, 7 }
 0x322   : > { %4200 = vst.msk [vmem:[#allocation6 + $0x28] sm:$0xff] %vm4194_vm12, %v4157_v9  ;;  %4199 = vst.msk [vmem:[#allocation6 + $0x20] sm:$0xff] %vm4194_vm12, %v4155_v24  ;;  %v8327_v24 = vor.u32 %v4373_v34, %v3407_v26 }
 0x323   : > { %v3867_v59 = vld [vmem:[#allocation6 + $0x48] sm:$0x1]  ;;  %v3864_v30 = vld [vmem:[#allocation6 + $0x40] sm:$0x1]  ;;  %5015 = vrot.lane.b32.xlu1 %v4926_v21, %s6455_s15  ;;  %4796 = vrot.lane.b32.xlu0 %v8217_v62, %s6454_s9  ;;  %v4615_v41 = vor.u32 %v4613_v35, %v4612_v11  ;;  %v4087_v11 = vld [vmem:[#allocation6 + $0x38] sm:$0xff] }
 0x324   : > { %v3868_v12 = vsel %vm7860_vm5, 0, %v3867_v59  ;;  %v3865_v19 = vsel %vm7860_vm5, 0, %v3864_v30  ;;  %v4619_v59 = vrot.slane %v4348_v25, 7 }
 0x325   : > { %3869 = vst [vmem:[#allocation6 + $0x48] sm:$0x1] %v3868_v12  ;;  %3866 = vst [vmem:[#allocation6 + $0x40] sm:$0x1] %v3865_v19  ;;  %v4392_v63 = vpop.permute.xlu1 %4391  ;;  %v4390_v55 = vpop.permute.xlu0 %4389  ;;  %v4084_v12 = vld [vmem:[#allocation6 + $0x30] sm:$0xff] }
 0x326   : > { %v4443_v1 = vsel %vm8289_vm7, %v4392_v63, %v4442_v4  ;;  %v4440_v10 = vsel %vm8289_vm7, %v4390_v55, %v4439_v61  ;;  %v4622_v55 = vor.u32 %v4619_v59, %v4350_v6  ;;  %v4939_v61 = vrot.slane %v4585_v23, 1 }
 0x327   : > { %4444 = vst [vmem:[#allocation6 + $0x8] sm:$0xff] %v4443_v1  ;;  %4441 = vst [vmem:[#allocation6] sm:$0xff] %v4440_v10  ;;  %5219 = vrot.lane.b32.xlu1 %v6352_v60, %s6456_s16  ;;  %5017 = vrot.lane.b32.xlu0 %v4933_v8, %s6455_s15  ;;  %v3823_v60 = vld [vmem:[#allocation6 + $0x58] sm:$0xff] }
 0x328   : > { %v4940_v23 = vor.u32 %v4939_v61, %v4582_v50 }
 0x329   : > { %v4228_v33 = vld [vmem:[#allocation6 + $0x28] sm:$0x80]  ;;  %v4225_v38 = vld [vmem:[#allocation6 + $0x20] sm:$0x80]  ;;  %v3764_v14 = vpop.permute.xlu1 %3763  ;;  %v3542_v21 = vpop.permute.xlu0 %3541 }
 0x32a   : > { %v4229_v9 = vsel %vm8166_vm2, 0, %v4228_v33  ;;  %v4226_v37 = vsel %vm8166_vm2, 0, %v4225_v38  ;;  %v3821_v22 = vsel %vm8062_vm1, %v3764_v14, %v3820_v42  ;;  %3573 = vst.msk [vmem:[#allocation6 + $0x70] sm:$0xff] %vm3483_vm8, %v3542_v21  ;;  %v4946_v14 = vrot.slane %v4592_v20, 1 }
 0x32b   : > { %4230 = vst [vmem:[#allocation6 + $0x28] sm:$0x80] %v4229_v9  ;;  %4227 = vst [vmem:[#allocation6 + $0x20] sm:$0x80] %v4226_v37  ;;  %5221 = vrot.lane.b32.xlu1 %v6353_v36, %s6456_s16  ;;  %4413 = vrot.lane.b32.xlu0 %v8306_v56, %s6452_s7  ;;  %v3743_v42 = vrot.slane %v4006_v3, 1  ;;  %v4445_v9 = vld [vmem:[#allocation6 + $0x10] sm:$0xff] }
 0x32c   : > { %3822 = vst [vmem:[#allocation6 + $0x50] sm:$0xff] %v3821_v22  ;;  %v4947_v50 = vor.u32 %v4946_v14, %v4589_v17  ;;  %v6354_v17 = vld [vmem:[%s6544_s11 + $0x20] sm:$0xff]  }
 0x32d   : > { %v4029_v8 = vpop.permute.xlu1 %4028  ;;  %v3766_v19 = vpop.permute.xlu0 %3765  ;;  %v3744_v20 = vor.u32 %v4003_v2, %v3743_v42  ;;  %v4953_v42 = vrot.slane %v4599_v44, 1 }
 0x32e   : > { %v4495_v52 = vld [vmem:[#allocation6 + $0x8] sm:$0x1]  ;;  %v4492_v63 = vld [vmem:[#allocation6] sm:$0x1]  ;;  %v4085_v45 = vsel %vm8103_vm10, %v4029_v8, %v4084_v12  ;;  %v3824_v26 = vsel %vm8062_vm1, %v3766_v19, %v3823_v60  ;;  %v4448_v19 = vld [vmem:[#allocation6 + $0x18] sm:$0xff] }
 0x32f   : > { %v4496_v25 = vsel %vm8333_vm9, 0, %v4495_v52  ;;  %v4493_v4 = vsel %vm8333_vm9, 0, %v4492_v63  ;;  %4086 = vst [vmem:[#allocation6 + $0x30] sm:$0xff] %v4085_v45  ;;  %3825 = vst [vmem:[#allocation6 + $0x58] sm:$0xff] %v3824_v26  ;;  %4674 = vrot.lane.b32.xlu1 %v4615_v41, %s6453_s8  ;;  %4415 = vrot.lane.b32.xlu0 %v8327_v24, %s6452_s7  ;;  %v3826_v8 = vld [vmem:[#allocation6 + $0x60] sm:$0xff]  ;;  %v3829_v26 = vld [vmem:[#allocation6 + $0x68] sm:$0xff] }
 0x330   : > { %4497 = vst [vmem:[#allocation6 + $0x8] sm:$0x1] %v4496_v25  ;;  %4494 = vst [vmem:[#allocation6] sm:$0x1] %v4493_v4  ;;  %v4090_v63 = vld [vmem:[#allocation6 + $0x40] sm:$0xff] }
 0x331   : > { %v3619_v1 = vld [vmem:[#allocation6 + $0x70] sm:$0x80]  ;;  %v4159_v10 = vpop.permute.xlu1 %4158  ;;  %v4031_v36 = vpop.permute.xlu0 %4030 }
 0x332   : > { %v3620_v33 = vsel %vm8031_vm6, 0, %v3619_v1  ;;  %4201 = vst.msk [vmem:[#allocation6 + $0x30] sm:$0xff] %vm4194_vm12, %v4159_v10  ;;  %v4088_v38 = vsel %vm8103_vm10, %v4031_v36, %v4087_v11  ;;  %v6355_v10 = vld [vmem:[%s6544_s11 + $0x28] sm:$0xff]  }
 0x333   : > { %v3870_v34 = vld [vmem:[#allocation6 + $0x50] sm:$0x1]  ;;  %3621 = vst [vmem:[#allocation6 + $0x70] sm:$0x80] %v3620_v33  ;;  %4089 = vst [vmem:[#allocation6 + $0x38] sm:$0xff] %v4088_v38  ;;  %4798 = vrot.lane.b32.xlu1 %v8277_v53, %s6454_s9  ;;  %4676 = vrot.lane.b32.xlu0 %v4622_v55, %s6453_s8 }
 0x334   : > { %v3871_v6 = vsel %vm7860_vm5, 0, %v3870_v34  ;;  %v4093_v34 = vld [vmem:[#allocation6 + $0x48] sm:$0xff] }
 0x335   : > { %3872 = vst [vmem:[#allocation6 + $0x50] sm:$0x1] %v3871_v6  ;;  %v4394_v21 = vpop.permute.xlu1 %4393  ;;  %v4161_v37 = vpop.permute.xlu0 %4160 }
 0x336   : > { %v3873_v22 = vld [vmem:[#allocation6 + $0x58] sm:$0x1]  ;;  %v4446_v41 = vsel %vm8289_vm7, %v4394_v21, %v4445_v9  ;;  %4202 = vst.msk [vmem:[#allocation6 + $0x38] sm:$0xff] %vm4194_vm12, %v4161_v37  ;;  %v4451_v9 = vld [vmem:[#allocation6 + $0x20] sm:$0xff] }
 0x337   : > { %v3874_v46 = vsel %vm7860_vm5, 0, %v3873_v22  ;;  %4447 = vst [vmem:[#allocation6 + $0x10] sm:$0xff] %v4446_v41  ;;  %5019 = vrot.lane.b32.xlu1 %v4940_v23, %s6455_s15  ;;  %4800 = vrot.lane.b32.xlu0 %v8179_v31, %s6454_s9 }
 0x338   : > { %3875 = vst [vmem:[#allocation6 + $0x58] sm:$0x1] %v3874_v46  ;;  %v6371_v46 = vld [vmem:[#allocation2 + $0x58] sm:$0xff] }
 0x339   : > { %v4231_v3 = vld [vmem:[#allocation6 + $0x30] sm:$0x80]  ;;  %v3768_v59 = vpop.permute.xlu1 %3767  ;;  %v4396_v12 = vpop.permute.xlu0 %4395 }
 0x33a   : > { %v4232_v60 = vsel %vm8166_vm2, 0, %v4231_v3  ;;  %v3827_v52 = vsel %vm8062_vm1, %v3768_v59, %v3826_v8  ;;  %v4449_v16 = vsel %vm8289_vm7, %v4396_v12, %v4448_v19  ;;  %v4705_v8 = vld [vmem:[#allocation6] sm:$0xff]  ;;  %v4454_v19 = vld [vmem:[#allocation6 + $0x28] sm:$0xff] }
 0x33b   : > { %4233 = vst [vmem:[#allocation6 + $0x30] sm:$0x80] %v4232_v60  ;;  %3828 = vst [vmem:[#allocation6 + $0x60] sm:$0xff] %v3827_v52  ;;  %5021 = vrot.lane.b32.xlu1 %v4947_v50, %s6455_s15  ;;  %3773 = vrot.lane.b32.xlu0 %v3744_v20, %s6448_s25  ;;  %v4954_v50 = vor.u32 %v4953_v42, %v4596_v28  ;;  %v6372_v28 = vld [vmem:[#allocation2 + $0x60] sm:$0xff] }
 0x33c   : > { %4450 = vst [vmem:[#allocation6 + $0x18] sm:$0xff] %v4449_v16 }
 0x33d   : > { %v4234_v2 = vld [vmem:[#allocation6 + $0x38] sm:$0x80]  ;;  %v4033_v31 = vpop.permute.xlu1 %4032  ;;  %v3770_v45 = vpop.permute.xlu0 %3769 }
 0x33e   : > { %v4498_v25 = vld [vmem:[#allocation6 + $0x10] sm:$0x1]  ;;  %v4235_v4 = vsel %vm8166_vm2, 0, %v4234_v2  ;;  %v4091_v55 = vsel %vm8103_vm10, %v4033_v31, %v4090_v63  ;;  %v3830_v61 = vsel %vm8062_vm1, %v3770_v45, %v3829_v26  ;;  %v4708_v2 = vld [vmem:[#allocation6 + $0x8] sm:$0xff] }
 0x33f   : > { %v4499_v1 = vsel %vm8333_vm9, 0, %v4498_v25  ;;  %4236 = vst [vmem:[#allocation6 + $0x38] sm:$0x80] %v4235_v4  ;;  %4092 = vst [vmem:[#allocation6 + $0x40] sm:$0xff] %v4091_v55  ;;  %4417 = vrot.lane.b32.xlu1 %v3744_v20, %s6452_s7  ;;  %5223 = vrot.lane.b32.xlu0 %v6354_v17, %s6456_s16  ;;  %v4960_v20 = vrot.slane %v4606_v40, 1  ;;  %v6356_v40 = vld [vmem:[%s6544_s11 + $0x30] sm:$0xff]  }
 0x340   : > { %3831 = vst [vmem:[#allocation6 + $0x68] sm:$0xff] %v3830_v61  ;;  %4500 = vst [vmem:[#allocation6 + $0x10] sm:$0x1] %v4499_v1  ;;  %v3832_v63 = vld [vmem:[#allocation6 + $0x70] sm:$0xff] }
 0x341   : > { %v4163_v36 = vpop.permute.xlu1 %4162  ;;  %v4035_v11 = vpop.permute.xlu0 %4034  ;;  %v4961_v52 = vor.u32 %v4960_v20, %v4603_v58  ;;  %v6357_v58 = vld [vmem:[%s6544_s11 + $0x38] sm:$0xff]   ;;  %v4096_v61 = vld [vmem:[#allocation6 + $0x50] sm:$0xff] }
 0x342   : > { %v3876_v33 = vld [vmem:[#allocation6 + $0x60] sm:$0x1]  ;;  %4203 = vst.msk [vmem:[#allocation6 + $0x40] sm:$0xff] %vm4194_vm12, %v4163_v36  ;;  %v4094_v6 = vsel %vm8103_vm10, %v4035_v11, %v4093_v34  ;;  %v4967_v34 = vrot.slane %v4613_v35, 1  ;;  %v6373_v35 = vld [vmem:[#allocation2 + $0x68] sm:$0xff] }
 0x343   : > { %v4501_v38 = vld [vmem:[#allocation6 + $0x18] sm:$0x1]  ;;  %v3877_v23 = vsel %vm7860_vm5, 0, %v3876_v33  ;;  %4095 = vst [vmem:[#allocation6 + $0x48] sm:$0xff] %v4094_v6  ;;  %4678 = vrot.lane.b32.xlu1 %v7900_v32, %s6453_s8  ;;  %5225 = vrot.lane.b32.xlu0 %v6355_v10, %s6456_s16 }
 0x344   : > { %v4502_v14 = vsel %vm8333_vm9, 0, %v4501_v38  ;;  %3878 = vst [vmem:[#allocation6 + $0x60] sm:$0x1] %v3877_v23  ;;  %v8462_v33 = vld [vmem:[#allocation2 + $0x78] sm:$0xff] }
 0x345   : > { %4503 = vst [vmem:[#allocation6 + $0x18] sm:$0x1] %v4502_v14  ;;  %v4398_v21 = vpop.permute.xlu1 %4397  ;;  %v4165_v37 = vpop.permute.xlu0 %4164  ;;  %v4099_v6 = vld [vmem:[#allocation6 + $0x58] sm:$0xff] }
 0x346   : > { %v4452_v41 = vsel %vm8289_vm7, %v4398_v21, %v4451_v9  ;;  %4204 = vst.msk [vmem:[#allocation6 + $0x48] sm:$0xff] %vm4194_vm12, %v4165_v37  ;;  %v4968_v9 = vor.u32 %v4967_v34, %v4610_v29  ;;  %v4010_v37 = vshrl.u32 %v8462_v33, 16  ;;  %v4013_v29 = vshll.u32 %v8462_v33, 16  ;;  %v6360_v34 = vld [vmem:[%s6544_s11 + $0x50] sm:$0xff]  }
 0x347   : > { %v3879_v22 = vld [vmem:[#allocation6 + $0x68] sm:$0x1]  ;;  %4453 = vst [vmem:[#allocation6 + $0x20] sm:$0xff] %v4452_v41  ;;  %4802 = vrot.lane.b32.xlu1 %v6371_v46, %s6454_s9  ;;  %4680 = vrot.lane.b32.xlu0 %v7893_v47, %s6453_s8 }
 0x348   : > { %v3880_v32 = vsel %vm7860_vm5, 0, %v3879_v22  ;;  %v4012_v53 = vrot.slane %v4010_v37, 7 }
 0x349   : > { %3881 = vst [vmem:[#allocation6 + $0x68] sm:$0x1] %v3880_v32  ;;  %v4237_v3 = vld [vmem:[#allocation6 + $0x40] sm:$0x80]  ;;  %v4659_v59 = vpop.permute.xlu1 %4658  ;;  %v4400_v12 = vpop.permute.xlu0 %4399 }
 0x34a   : > { %v4238_v47 = vsel %vm8166_vm2, 0, %v4237_v3  ;;  %v4706_v60 = vsel %vm8422_vm15, %v4659_v59, %v4705_v8  ;;  %v4455_v18 = vsel %vm8289_vm7, %v4400_v12, %v4454_v19  ;;  %v4460_v3 = vld [vmem:[#allocation6 + $0x38] sm:$0xff]  ;;  %v4457_v8 = vld [vmem:[#allocation6 + $0x30] sm:$0xff] }
 0x34b   : > { %4239 = vst [vmem:[#allocation6 + $0x40] sm:$0x80] %v4238_v47  ;;  %4707 = vst [vmem:[#allocation6] sm:$0xff] %v4706_v60  ;;  %5023 = vrot.lane.b32.xlu1 %v4954_v50, %s6455_s15  ;;  %4804 = vrot.lane.b32.xlu0 %v6372_v28, %s6454_s9  ;;  %v6359_v47 = vld [vmem:[%s6544_s11 + $0x48] sm:$0xff]   ;;  %v4015_v60 = vor.u32 %v4013_v29, %v4012_v53 }
 0x34c   : > { %4456 = vst [vmem:[#allocation6 + $0x28] sm:$0xff] %v4455_v18  ;;  %v4711_v18 = vld [vmem:[#allocation6 + $0x10] sm:$0xff] }
 0x34d   : > { %v4240_v16 = vld [vmem:[#allocation6 + $0x48] sm:$0x80]  ;;  %v4661_v17 = vpop.permute.xlu1 %4660  ;;  %v3772_v31 = vpop.permute.xlu0 %3771 }
 0x34e   : > { %v4504_v45 = vld [vmem:[#allocation6 + $0x20] sm:$0x1]  ;;  %v4241_v26 = vsel %vm8166_vm2, 0, %v4240_v16  ;;  %v4709_v25 = vsel %vm8422_vm15, %v4661_v17, %v4708_v2  ;;  %v3833_v4 = vsel %vm8062_vm1, %v3772_v31, %v3832_v63  ;;  %v4714_v16 = vld [vmem:[#allocation6 + $0x18] sm:$0xff] }
 0x34f   : > { %v4505_v62 = vsel %vm8333_vm9, 0, %v4504_v45  ;;  %4242 = vst [vmem:[#allocation6 + $0x48] sm:$0x80] %v4241_v26  ;;  %4710 = vst [vmem:[#allocation6 + $0x8] sm:$0xff] %v4709_v25  ;;  %5227 = vrot.lane.b32.xlu1 %v6356_v40, %s6456_s16  ;;  %5025 = vrot.lane.b32.xlu0 %v4961_v52, %s6455_s15  ;;  %v4102_v26 = vld [vmem:[#allocation6 + $0x60] sm:$0xff] }
 0x350   : > { %3834 = vst [vmem:[#allocation6 + $0x70] sm:$0xff] %v3833_v4  ;;  %4506 = vst [vmem:[#allocation6 + $0x20] sm:$0x1] %v4505_v62 }
 0x351   : > { %v4037_v55 = vpop.permute.xlu1 %4036  ;;  %v4783_v1 = vpop.permute.xlu0 %4782 }
 0x352   : > { %v4097_v36 = vsel %vm8103_vm10, %v4037_v55, %v4096_v61  ;;  %4827 = vst.msk [vmem:[#allocation6] sm:$0xff] %vm4750_vm11, %v4783_v1 }
 0x353   : > { %v4507_v10 = vld [vmem:[#allocation6 + $0x28] sm:$0x1]  ;;  %4098 = vst [vmem:[#allocation6 + $0x50] sm:$0xff] %v4097_v36  ;;  %4682 = vrot.lane.b32.xlu1 %v7942_v43, %s6453_s8  ;;  %5229 = vrot.lane.b32.xlu0 %v6357_v58, %s6456_s16 }
 0x354   : > { %v4508_v11 = vsel %vm8333_vm9, 0, %v4507_v10  ;;  %v4105_v10 = vld [vmem:[#allocation6 + $0x68] sm:$0xff] }
 0x355   : > { %4509 = vst [vmem:[#allocation6 + $0x28] sm:$0x1] %v4508_v11  ;;  %v4039_v38 = vpop.permute.xlu1 %4038  ;;  %v4785_v23 = vpop.permute.xlu0 %4784 }
 0x356   : > { %v4100_v42 = vsel %vm8103_vm10, %v4039_v38, %v4099_v6  ;;  %4828 = vst.msk [vmem:[#allocation6 + $0x8] sm:$0xff] %vm4750_vm11, %v4785_v23 }
 0x357   : > { %v3882_v14 = vld [vmem:[#allocation6 + $0x70] sm:$0x1]  ;;  %4101 = vst [vmem:[#allocation6 + $0x58] sm:$0xff] %v4100_v42  ;;  %4806 = vrot.lane.b32.xlu1 %v6373_v35, %s6454_s9  ;;  %4684 = vrot.lane.b32.xlu0 %v8177_v0, %s6453_s8  ;;  %v6358_v0 = vld [vmem:[%s6544_s11 + $0x40] sm:$0xff]   ;;  %v4466_v35 = vld [vmem:[#allocation6 + $0x48] sm:$0xff] }
 0x358   : > { %v3883_v43 = vsel %vm7860_vm5, 0, %v3882_v14  ;;  %v4717_v53 = vld [vmem:[#allocation6 + $0x20] sm:$0xff] }
 0x359   : > { %3884 = vst [vmem:[#allocation6 + $0x70] sm:$0x1] %v3883_v43  ;;  %v4846_v22 = vld [vmem:[#allocation6] sm:$0x80]  ;;  %v4169_v41 = vpop.permute.xlu1 %4168  ;;  %v4167_v32 = vpop.permute.xlu0 %4166 }
 0x35a   : > { %v4847_v46 = vsel %vm8470_vm0, 0, %v4846_v22  ;;  %4206 = vst.msk [vmem:[#allocation6 + $0x58] sm:$0xff] %vm4194_vm12, %v4169_v41  ;;  %4205 = vst.msk [vmem:[#allocation6 + $0x50] sm:$0xff] %vm4194_vm12, %v4167_v32  ;;  %v4463_v22 = vld [vmem:[#allocation6 + $0x40] sm:$0xff] }
 0x35b   : > { %4848 = vst [vmem:[#allocation6] sm:$0x80] %v4847_v46  ;;  %5027 = vrot.lane.b32.xlu1 %v4968_v9, %s6455_s15  ;;  %4808 = vrot.lane.b32.xlu0 %v8123_v5, %s6454_s9 }
 0x35d   : > { %v4849_v50 = vld [vmem:[#allocation6 + $0x8] sm:$0x80]  ;;  %v4404_v20 = vpop.permute.xlu1 %4403  ;;  %v4402_v59 = vpop.permute.xlu0 %4401 }
 0x35e   : > { %v4850_v12 = vsel %vm8470_vm0, 0, %v4849_v50  ;;  %v4461_v19 = vsel %vm8289_vm7, %v4404_v20, %v4460_v3  ;;  %v4458_v5 = vsel %vm8289_vm7, %v4402_v59, %v4457_v8  ;;  %v4720_v59 = vld [vmem:[#allocation6 + $0x28] sm:$0xff] }
 0x35f   : > { %4851 = vst [vmem:[#allocation6 + $0x8] sm:$0x80] %v4850_v12  ;;  %4462 = vst [vmem:[#allocation6 + $0x38] sm:$0xff] %v4461_v19  ;;  %5231 = vrot.lane.b32.xlu1 %v6358_v0, %s6456_s16  ;;  %5029 = vrot.lane.b32.xlu0 %v8235_v48, %s6455_s15  ;;  %v4387_v0 = vrot.slane %v4013_v29, 1 }
 0x360   : > { %4459 = vst [vmem:[#allocation6 + $0x30] sm:$0xff] %v4458_v5 }
 0x361   : > { %v4246_v28 = vld [vmem:[#allocation6 + $0x58] sm:$0x80]  ;;  %v4243_v40 = vld [vmem:[#allocation6 + $0x50] sm:$0x80]  ;;  %v4665_v52 = vpop.permute.xlu1 %4664  ;;  %v4663_v17 = vpop.permute.xlu0 %4662  ;;  %v4388_v29 = vor.u32 %v4387_v0, %v4010_v37 }
 0x362   : > { %v4247_v2 = vsel %vm8166_vm2, 0, %v4246_v28  ;;  %v4244_v31 = vsel %vm8166_vm2, 0, %v4243_v40  ;;  %v4715_v63 = vsel %vm8422_vm15, %v4665_v52, %v4714_v16  ;;  %v4712_v48 = vsel %vm8422_vm15, %v4663_v17, %v4711_v18  ;;  %v4108_v17 = vld [vmem:[#allocation6 + $0x70] sm:$0xff] }
 0x363   : > { %4248 = vst [vmem:[#allocation6 + $0x58] sm:$0x80] %v4247_v2  ;;  %4245 = vst [vmem:[#allocation6 + $0x50] sm:$0x80] %v4244_v31  ;;  %5233 = vrot.lane.b32.xlu1 %v6359_v47, %s6456_s16  ;;  %4046 = vrot.lane.b32.xlu0 %v4015_v60, %s6449_s26  ;;  %v6363_v47 = vld [vmem:[%s6544_s11 + $0x68] sm:$0xff]   ;;  %s6028_s26 = sshll.u32 %s6509_s22, 8 }
 0x364   : > { %4716 = vst [vmem:[#allocation6 + $0x18] sm:$0xff] %v4715_v63  ;;  %4713 = vst [vmem:[#allocation6 + $0x10] sm:$0xff] %v4712_v48  ;;  %v6370_v63 = vld [vmem:[%s6544_s11 + $0x78] sm:$0xff]   ;;  %v5058_v48 = vld [vmem:[#allocation6] sm:$0xff] }
 0x365   : > { %v4041_v45 = vpop.permute.xlu1 %4040  ;;  %v4787_v25 = vpop.permute.xlu0 %4786 }
 0x366   : > { %v4513_v4 = vld [vmem:[#allocation6 + $0x38] sm:$0x1]  ;;  %v4103_v58 = vsel %vm8103_vm10, %v4041_v45, %v4102_v26  ;;  %4829 = vst.msk [vmem:[#allocation6 + $0x10] sm:$0xff] %vm4750_vm11, %v4787_v25 }
 0x367   : > { %v4510_v62 = vld [vmem:[#allocation6 + $0x30] sm:$0x1]  ;;  %v4514_v55 = vsel %vm8333_vm9, 0, %v4513_v4  ;;  %4104 = vst [vmem:[#allocation6 + $0x60] sm:$0xff] %v4103_v58  ;;  %4686 = vrot.lane.b32.xlu1 %v4015_v60, %s6453_s8  ;;  %4176 = vrot.lane.b32.xlu0 %v8462_v33, %s6450_s6  ;;  %v5061_v4 = vld [vmem:[#allocation6 + $0x8] sm:$0xff]  ;;  %s8783_s8 = scalar_lea.hbm %s8827_s5, %s6028_s26 }
 0x368   : > { %v4511_v61 = vsel %vm8333_vm9, 0, %v4510_v62  ;;  %4515 = vst [vmem:[#allocation6 + $0x38] sm:$0x1] %v4514_v55 }
 0x369   : > { %4512 = vst [vmem:[#allocation6 + $0x30] sm:$0x1] %v4511_v61  ;;  %v4043_v1 = vpop.permute.xlu1 %4042  ;;  %v4789_v36 = vpop.permute.xlu0 %4788 }
 0x36a   : > { %v4106_v11 = vsel %vm8103_vm10, %v4043_v1, %v4105_v10  ;;  %4830 = vst.msk [vmem:[#allocation6 + $0x18] sm:$0xff] %vm4750_vm11, %v4789_v36 }
 0x36b   : > { %4107 = vst [vmem:[#allocation6 + $0x68] sm:$0xff] %v4106_v11  ;;  %5031 = vrot.lane.b32.xlu1 %v8249_v51, %s6455_s15  ;;  %4810 = vrot.lane.b32.xlu0 %v8462_v33, %s6454_s9  ;;  %v6361_v51 = vld [vmem:[%s6544_s11 + $0x58] sm:$0xff]   ;;  %s5669_s9 = sshll.u32 %s6546_s12, 4  ;;  %s5670_s9 = int_to_ptr.vmem [resolvable:$true] %s5669_s9 }
 0x36c   : > { %s6374_s23 = scalar_lea.vmem %s5670_s9, 256  ;;  %p6381_p0 = scmp.lt.s32.totalorder %s5670_s9, %s6379_s13 }
 0x36d   : > { %v4852_v38 = vld [vmem:[#allocation6 + $0x10] sm:$0x80]  ;;  %v4173_v6 = vpop.permute.xlu1 %4172  ;;  %v4171_v23 = vpop.permute.xlu0 %4170  ;;  %p6375_p11 = scmp.ne.s32.totalorder %s5670_s9, %s6374_s23  ;;  %p6382_p1 = scmp.lt.s32.totalorder %s6380_s14, %s6374_s23 }
 0x36e   : > { %v4853_v14 = vsel %vm8470_vm0, 0, %v4852_v38  ;;  %4208 = vst.msk [vmem:[#allocation6 + $0x68] sm:$0xff] %vm4194_vm12, %v4173_v6  ;;  %4207 = vst.msk [vmem:[#allocation6 + $0x60] sm:$0xff] %vm4194_vm12, %v4171_v23  ;;  %v4469_v6 = vld [vmem:[#allocation6 + $0x50] sm:$0xff] }
 0x36f   : > { %4854 = vst [vmem:[#allocation6 + $0x10] sm:$0x80] %v4853_v14  ;;  %5235 = vrot.lane.b32.xlu1 %v6360_v34, %s6456_s16  ;;  %5033 = vrot.lane.b32.xlu0 %v8306_v56, %s6455_s15  ;;  %v6362_v56 = vld [vmem:[%s6544_s11 + $0x60] sm:$0xff]   ;;  %v4472_v14 = vld [vmem:[#allocation6 + $0x58] sm:$0xff]  ;;  %p6376_p12 = pnand %p6375_p11, %p6526_p5  ;;  %p6383_p2 = por %p6382_p1, %p6381_p0 }
 0x370   : > { %v4726_v0 = vld [vmem:[#allocation6 + $0x38] sm:$0xff] }
 0x371   : > { %v4855_v42 = vld [vmem:[#allocation6 + $0x18] sm:$0x80]  ;;  %v4408_v43 = vpop.permute.xlu1 %4407  ;;  %v4406_v9 = vpop.permute.xlu0 %4405  ;;  %p6377_p13 = pneg %p6376_p12 }
 0x372   : > { %v4856_v41 = vsel %vm8470_vm0, 0, %v4855_v42  ;;  %v4467_v32 = vsel %vm8289_vm7, %v4408_v43, %v4466_v35  ;;  %v4464_v46 = vsel %vm8289_vm7, %v4406_v9, %v4463_v22  ;;  %v4723_v43 = vld [vmem:[#allocation6 + $0x30] sm:$0xff] }
 0x373   : > { %4857 = vst [vmem:[#allocation6 + $0x18] sm:$0x80] %v4856_v41  ;;  %4468 = vst [vmem:[#allocation6 + $0x48] sm:$0xff] %v4467_v32  ;;  %5035 = vrot.lane.b32.xlu1 %v8327_v24, %s6455_s15  ;;  %5237 = vrot.lane.b32.xlu0 %v6361_v51, %s6456_s16  ;;  %p6384_p3 = pnand %p6383_p2, %p6377_p13 }
 0x374   : > { %4465 = vst [vmem:[#allocation6 + $0x40] sm:$0xff] %v4464_v46 }
 0x375   : > { %v4252_v50 = vld [vmem:[#allocation6 + $0x68] sm:$0x80]  ;;  %v4249_v20 = vld [vmem:[#allocation6 + $0x60] sm:$0x80]  ;;  %v4669_v3 = vpop.permute.xlu1 %4668  ;;  %v4667_v8 = vpop.permute.xlu0 %4666 }
 0x376   : > { %v4253_v12 = vsel %vm8166_vm2, 0, %v4252_v50  ;;  %v4250_v19 = vsel %vm8166_vm2, 0, %v4249_v20  ;;  %v4721_v24 = vsel %vm8422_vm15, %v4669_v3, %v4720_v59  ;;  %v4718_v5 = vsel %vm8422_vm15, %v4667_v8, %v4717_v53  ;;  %v5064_v8 = vld [vmem:[#allocation6 + $0x10] sm:$0xff] }
 0x377   : > { %4254 = vst [vmem:[#allocation6 + $0x68] sm:$0x80] %v4253_v12  ;;  %4251 = vst [vmem:[#allocation6 + $0x60] sm:$0x80] %v4250_v19  ;;  %5239 = vrot.lane.b32.xlu1 %v6362_v56, %s6456_s16  ;;  %5037 = vrot.lane.b32.xlu0 %v8090_v27, %s6455_s15  ;;  %v6369_v27 = vld [vmem:[%s6544_s11 + $0x70] sm:$0xff]  }
 0x378   : > { %4722 = vst [vmem:[#allocation6 + $0x28] sm:$0xff] %v4721_v24  ;;  %4719 = vst [vmem:[#allocation6 + $0x20] sm:$0xff] %v4718_v5 }
 0x379   : > { %v3544_v60 = vpop.permute.xlu1 %3543  ;;  %v4791_v18 = vpop.permute.xlu0 %4790 }
 0x37a   : > { %v4519_v28 = vld [vmem:[#allocation6 + $0x48] sm:$0x1]  ;;  %3574 = vst.msk [vmem:[#allocation6 + $0x78] sm:$0xff] %vm3483_vm8, %v3544_v60  ;;  %vm8580_vm8 = vmand %vm4842_vm3, %vm1021_vm13  ;;  %vm5263_vm13 = vcmask 622144  }
 0x37b   : > { %v4516_v40 = vld [vmem:[#allocation6 + $0x40] sm:$0x1]  ;;  %4831 = vst.msk [vmem:[#allocation6 + $0x20] sm:$0xff] %vm4750_vm11, %v4791_v18  ;;  %v4520_v52 = vsel %vm8333_vm9, 0, %v4519_v28  ;;  %4419 = vrot.lane.b32.xlu1 %v4388_v29, %s6452_s7  ;;  %5241 = vrot.lane.b32.xlu0 %v6363_v47, %s6456_s16  ;;  %v5067_v18 = vld [vmem:[#allocation6 + $0x18] sm:$0xff] }
 0x37c   : > { %v4517_v16 = vsel %vm8333_vm9, 0, %v4516_v40  ;;  %4521 = vst [vmem:[#allocation6 + $0x48] sm:$0x1] %v4520_v52 }
 0x37d   : > { %4518 = vst [vmem:[#allocation6 + $0x40] sm:$0x1] %v4517_v16  ;;  %v4793_v33 = vpop.permute.xlu1 %4792  ;;  %v4045_v37 = vpop.permute.xlu0 %4044 }
 0x37e   : > { %4832 = vst.msk [vmem:[#allocation6 + $0x28] sm:$0xff] %vm4750_vm11, %v4793_v33  ;;  %v4109_v2 = vsel %vm8103_vm10, %v4045_v37, %v4108_v17  ;;  %v4475_v33 = vld [vmem:[#allocation6 + $0x60] sm:$0xff] }
 0x37f   : > { %4110 = vst [vmem:[#allocation6 + $0x70] sm:$0xff] %v4109_v2  ;;  %5039 = vrot.lane.b32.xlu0 %v4388_v29, %s6455_s15  ;;  %5243 = vrot.lane.b32.xlu1 %v6369_v27, %s6456_s16 }
 0x381   : > { %v3622_v45 = vld [vmem:[#allocation6 + $0x78] sm:$0x80]  ;;  %v5014_v25 = vpop.permute.xlu1 %5013  ;;  %v5012_v62 = vpop.permute.xlu0 %5011 }
 0x382   : > { %v4858_v26 = vld [vmem:[#allocation6 + $0x20] sm:$0x80]  ;;  %v3623_v58 = vsel %vm8031_vm6, 0, %v3622_v45  ;;  %v5062_v61 = vsel %vm8580_vm8, %v5014_v25, %v5061_v4  ;;  %v5059_v1 = vsel %vm8580_vm8, %v5012_v62, %v5058_v48  ;;  %vm5342_vm6 = vcmask 621568   ;;  %v4478_v45 = vld [vmem:[#allocation6 + $0x68] sm:$0xff] }
 0x383   : > { %v4859_v55 = vsel %vm8470_vm0, 0, %v4858_v26  ;;  %3624 = vst [vmem:[#allocation6 + $0x78] sm:$0x80] %v3623_v58  ;;  %5063 = vst [vmem:[#allocation6 + $0x8] sm:$0xff] %v5062_v61  ;;  %5245 = vrot.lane.b32.xlu0 %v6370_v63, %s6456_s16 }
 0x384   : > { %4860 = vst [vmem:[#allocation6 + $0x20] sm:$0x80] %v4859_v55  ;;  %5060 = vst [vmem:[#allocation6] sm:$0xff] %v5059_v1  ;;  %v4729_v63 = vld [vmem:[#allocation6 + $0x40] sm:$0xff]  ;;  %v4732_v55 = vld [vmem:[#allocation6 + $0x48] sm:$0xff] }
 0x385   : > { %v4861_v10 = vld [vmem:[#allocation6 + $0x28] sm:$0x80]  ;;  %v5216_v36 = vpop.permute.xlu1 %5215  ;;  %v4175_v54 = vpop.permute.xlu0 %4174 }
 0x386   : > { %v4862_v11 = vsel %vm8470_vm0, 0, %v4861_v10  ;;  %5264 = vst.msk [vmem:[#allocation6] sm:$0xff] %vm5263_vm13, %v5216_v36 }
 0x387   : > { %4209 = vst.msk [vmem:[#allocation6 + $0x70] sm:$0xff] %vm4194_vm12, %v4175_v54  ;;  %4863 = vst [vmem:[#allocation6 + $0x28] sm:$0x80] %v4862_v11 }
 0x389   : > { %v5218_v34 = vpop.permute.xlu1 %5217  ;;  %v4410_v38 = vpop.permute.xlu0 %4409 }
 0x38a   : > { %5265 = vst.msk [vmem:[#allocation6 + $0x8] sm:$0xff] %vm5263_vm13, %v5218_v34  ;;  %v4470_v23 = vsel %vm8289_vm7, %v4410_v38, %v4469_v6 }
 0x38b   : > { %4471 = vst [vmem:[#allocation6 + $0x50] sm:$0xff] %v4470_v23  ;;  %v5070_v11 = vld [vmem:[#allocation6 + $0x20] sm:$0xff] }
 0x38d   : > { %v4671_v42 = vpop.permute.xlu1 %4670  ;;  %v4412_v35 = vpop.permute.xlu0 %4411  ;;  %v5280_v9 = vld [vmem:[#allocation6] sm:$0xff] }
 0x38e   : > { %v4255_v51 = vld [vmem:[#allocation6 + $0x70] sm:$0x80]  ;;  %v4724_v41 = vsel %vm8422_vm15, %v4671_v42, %v4723_v43  ;;  %v4473_v32 = vsel %vm8289_vm7, %v4412_v35, %v4472_v14  ;;  %6117 = vmatprep.mubr.msk.bf16.mxu1 %vm5342_vm6, %v5280_v9  ;;  %v5073_v42 = vld [vmem:[#allocation6 + $0x28] sm:$0xff]  ;;  %v3835_v35 = vld [vmem:[#allocation6 + $0x78] sm:$0xff] }
 0x38f   : > { %v4256_v22 = vsel %vm8166_vm2, 0, %v4255_v51  ;;  %4725 = vst [vmem:[#allocation6 + $0x30] sm:$0xff] %v4724_v41  ;;  %4474 = vst [vmem:[#allocation6 + $0x58] sm:$0xff] %v4473_v32 }
 0x390   : > { %4257 = vst [vmem:[#allocation6 + $0x70] sm:$0x80] %v4256_v22 }
 0x391   : > { %v4795_v46 = vpop.permute.xlu1 %4794  ;;  %v4673_v56 = vpop.permute.xlu0 %4672  ;;  %v5281_v53 = vld [vmem:[#allocation6 + $0x8] sm:$0xff] }
 0x392   : > { %v4522_v50 = vld [vmem:[#allocation6 + $0x50] sm:$0x1]  ;;  %4833 = vst.msk [vmem:[#allocation6 + $0x30] sm:$0xff] %vm4750_vm11, %v4795_v46  ;;  %v4727_v20 = vsel %vm8422_vm15, %v4673_v56, %v4726_v0  ;;  %6118 = vmatmul.mubr.msk.bf16.vlgmr.msra.gmra.mrb[0].mxu1 %vm5342_vm6, %v5281_v53 }
 0x393   : > { %v4523_v3 = vsel %vm8333_vm9, 0, %v4522_v50  ;;  %4728 = vst [vmem:[#allocation6 + $0x38] sm:$0xff] %v4727_v20 }
 0x394   : > { %4524 = vst [vmem:[#allocation6 + $0x50] sm:$0x1] %v4523_v3 }
 0x395   : > { %v5016_v59 = vpop.permute.xlu1 %5015  ;;  %v4797_v12 = vpop.permute.xlu0 %4796 }
 0x396   : > { %v4525_v19 = vld [vmem:[#allocation6 + $0x58] sm:$0x1]  ;;  %v5065_v24 = vsel %vm8580_vm8, %v5016_v59, %v5064_v8  ;;  %4834 = vst.msk [vmem:[#allocation6 + $0x38] sm:$0xff] %vm4750_vm11, %v4797_v12 }
 0x397   : > { %v4526_v5 = vsel %vm8333_vm9, 0, %v4525_v19  ;;  %5066 = vst [vmem:[#allocation6 + $0x10] sm:$0xff] %v5065_v24  ;;  %v4481_v56 = vld [vmem:[#allocation6 + $0x70] sm:$0xff] }
 0x398   : > { %4527 = vst [vmem:[#allocation6 + $0x58] sm:$0x1] %v4526_v5 }
 0x399   : > { %v4864_v29 = vld [vmem:[#allocation6 + $0x30] sm:$0x80]  ;;  %v5220_v47 = vpop.permute.xlu1 %5219  ;;  %v5018_v60 = vpop.permute.xlu0 %5017 }
 0x39a   : > { %v4865_v28 = vsel %vm8470_vm0, 0, %v4864_v29  ;;  %5266 = vst.msk [vmem:[#allocation6 + $0x10] sm:$0xff] %vm5263_vm13, %v5220_v47  ;;  %v5068_v40 = vsel %vm8580_vm8, %v5018_v60, %v5067_v18 }
 0x39b   : > { %4866 = vst [vmem:[#allocation6 + $0x30] sm:$0x80] %v4865_v28  ;;  %5069 = vst [vmem:[#allocation6 + $0x18] sm:$0xff] %v5068_v40  ;;  %v4735_v13 = vld [vmem:[#allocation6 + $0x50] sm:$0xff] }
 0x39d   : > { %v4867_v52 = vld [vmem:[#allocation6 + $0x38] sm:$0x80]  ;;  %v5222_v16 = vpop.permute.xlu1 %5221  ;;  %v4414_v27 = vpop.permute.xlu0 %4413 }
 0x39e   : > { %v4868_v37 = vsel %vm8470_vm0, 0, %v4867_v52  ;;  %5267 = vst.msk [vmem:[#allocation6 + $0x18] sm:$0xff] %vm5263_vm13, %v5222_v16  ;;  %v4476_v17 = vsel %vm8289_vm7, %v4414_v27, %v4475_v33 }
 0x39f   : > { %4869 = vst [vmem:[#allocation6 + $0x38] sm:$0x80] %v4868_v37  ;;  %4477 = vst [vmem:[#allocation6 + $0x60] sm:$0xff] %v4476_v17  ;;  %v4738_v5 = vld [vmem:[#allocation6 + $0x58] sm:$0xff] }
 0x3a1   : > { %v4675_v2 = vpop.permute.xlu1 %4674  ;;  %v4416_v48 = vpop.permute.xlu0 %4415  ;;  %v5282_v26 = vld [vmem:[#allocation6 + $0x10] sm:$0xff] }
 0x3a2   : > { %v4730_v25 = vsel %vm8422_vm15, %v4675_v2, %v4729_v63  ;;  %v4479_v4 = vsel %vm8289_vm7, %v4416_v48, %v4478_v45  ;;  %6121 = vmatprep.mubr.msk.bf16.mxu1 %vm5342_vm6, %v5282_v26  ;;  %v5076_v28 = vld [vmem:[#allocation6 + $0x30] sm:$0xff] }
 0x3a3   : > { %4731 = vst [vmem:[#allocation6 + $0x40] sm:$0xff] %v4730_v25  ;;  %4480 = vst [vmem:[#allocation6 + $0x68] sm:$0xff] %v4479_v4 }
 0x3a5   : > { %v4799_v62 = vpop.permute.xlu1 %4798  ;;  %v4677_v58 = vpop.permute.xlu0 %4676  ;;  %v5283_v61 = vld [vmem:[#allocation6 + $0x18] sm:$0xff] }
 0x3a6   : > { %v4528_v1 = vld [vmem:[#allocation6 + $0x60] sm:$0x1]  ;;  %4835 = vst.msk [vmem:[#allocation6 + $0x40] sm:$0xff] %vm4750_vm11, %v4799_v62  ;;  %v4733_v10 = vsel %vm8422_vm15, %v4677_v58, %v4732_v55  ;;  %6122 = vmatmul.mubr.msk.bf16.gmra.mrb[4].mxu1 %vm5342_vm6, %v5283_v61  ;;  %v5079_v17 = vld [vmem:[#allocation6 + $0x38] sm:$0xff] }
 0x3a7   : > { %v4529_v36 = vsel %vm8333_vm9, 0, %v4528_v1  ;;  %4734 = vst [vmem:[#allocation6 + $0x48] sm:$0xff] %v4733_v10 }
 0x3a8   : > { %4530 = vst [vmem:[#allocation6 + $0x60] sm:$0x1] %v4529_v36 }
 0x3a9   : > { %v5020_v54 = vpop.permute.xlu1 %5019  ;;  %v4801_v34 = vpop.permute.xlu0 %4800 }
 0x3aa   : > { %v4531_v38 = vld [vmem:[#allocation6 + $0x68] sm:$0x1]  ;;  %v5071_v6 = vsel %vm8580_vm8, %v5020_v54, %v5070_v11  ;;  %4836 = vst.msk [vmem:[#allocation6 + $0x48] sm:$0xff] %vm4750_vm11, %v4801_v34 }
 0x3ab   : > { %v4532_v23 = vsel %vm8333_vm9, 0, %v4531_v38  ;;  %5072 = vst [vmem:[#allocation6 + $0x20] sm:$0xff] %v5071_v6 }
 0x3ac   : > { %4533 = vst [vmem:[#allocation6 + $0x68] sm:$0x1] %v4532_v23 }
 0x3ad   : > { %v4870_v14 = vld [vmem:[#allocation6 + $0x40] sm:$0x80]  ;;  %v5022_v51 = vpop.permute.xlu1 %5021  ;;  %v3774_v43 = vpop.permute.xlu0 %3773 }
 0x3ae   : > { %v4871_v9 = vsel %vm8470_vm0, 0, %v4870_v14  ;;  %v5074_v22 = vsel %vm8580_vm8, %v5022_v51, %v5073_v42  ;;  %v3836_v41 = vsel %vm8062_vm1, %v3774_v43, %v3835_v35 }
 0x3af   : > { %4872 = vst [vmem:[#allocation6 + $0x40] sm:$0x80] %v4871_v9  ;;  %5075 = vst [vmem:[#allocation6 + $0x28] sm:$0xff] %v5074_v22  ;;  %v4741_v45 = vld [vmem:[#allocation6 + $0x60] sm:$0xff] }
 0x3b0   : > { %3837 = vst [vmem:[#allocation6 + $0x78] sm:$0xff] %v3836_v41 }
 0x3b1   : > { %v4873_v32 = vld [vmem:[#allocation6 + $0x48] sm:$0x80]  ;;  %v4418_v46 = vpop.permute.xlu1 %4417  ;;  %v5224_v0 = vpop.permute.xlu0 %5223 }
 0x3b2   : > { %v4874_v53 = vsel %vm8470_vm0, 0, %v4873_v32  ;;  %v4482_v50 = vsel %vm8289_vm7, %v4418_v46, %v4481_v56  ;;  %5268 = vst.msk [vmem:[#allocation6 + $0x20] sm:$0xff] %vm5263_vm13, %v5224_v0 }
 0x3b3   : > { %4875 = vst [vmem:[#allocation6 + $0x48] sm:$0x80] %v4874_v53  ;;  %4483 = vst [vmem:[#allocation6 + $0x70] sm:$0xff] %v4482_v50  ;;  %v4744_v55 = vld [vmem:[#allocation6 + $0x68] sm:$0xff] }
 0x3b5   : > { %v4679_v20 = vpop.permute.xlu1 %4678  ;;  %v5226_v3 = vpop.permute.xlu0 %5225 }
 0x3b6   : > { %v4736_v8 = vsel %vm8422_vm15, %v4679_v20, %v4735_v13  ;;  %5269 = vst.msk [vmem:[#allocation6 + $0x28] sm:$0xff] %vm5263_vm13, %v5226_v3  ;;  %v5082_v36 = vld [vmem:[#allocation6 + $0x40] sm:$0xff] }
 0x3b7   : > { %v3885_v59 = vld [vmem:[#allocation6 + $0x78] sm:$0x1]  ;;  %4737 = vst [vmem:[#allocation6 + $0x50] sm:$0xff] %v4736_v8 }
 0x3b8   : > { %v3886_v12 = vsel %vm7860_vm5, 0, %v3885_v59 }
 0x3b9   : > { %3887 = vst [vmem:[#allocation6 + $0x78] sm:$0x1] %v3886_v12  ;;  %v4803_v19 = vpop.permute.xlu1 %4802  ;;  %v4681_v24 = vpop.permute.xlu0 %4680  ;;  %v5284_v29 = vld [vmem:[#allocation6 + $0x20] sm:$0xff] }
 0x3ba   : > { %v4534_v47 = vld [vmem:[#allocation6 + $0x70] sm:$0x1]  ;;  %4837 = vst.msk [vmem:[#allocation6 + $0x50] sm:$0xff] %vm4750_vm11, %v4803_v19  ;;  %v4739_v60 = vsel %vm8422_vm15, %v4681_v24, %v4738_v5  ;;  %6125 = vmatprep.mubr.msk.bf16.mxu1 %vm5342_vm6, %v5284_v29  ;;  %v5085_v14 = vld [vmem:[#allocation6 + $0x48] sm:$0xff] }
 0x3bb   : > { %v4535_v18 = vsel %vm8333_vm9, 0, %v4534_v47  ;;  %4740 = vst [vmem:[#allocation6 + $0x58] sm:$0xff] %v4739_v60 }
 0x3bc   : > { %4536 = vst [vmem:[#allocation6 + $0x70] sm:$0x1] %v4535_v18 }
 0x3bd   : > { %v5024_v15 = vpop.permute.xlu1 %5023  ;;  %v4805_v40 = vpop.permute.xlu0 %4804  ;;  %v5285_v52 = vld [vmem:[#allocation6 + $0x28] sm:$0xff] }
 0x3be   : > { %v5077_v16 = vsel %vm8580_vm8, %v5024_v15, %v5076_v28  ;;  %4838 = vst.msk [vmem:[#allocation6 + $0x58] sm:$0xff] %vm4750_vm11, %v4805_v40  ;;  %6126 = vmatmul.mubr.msk.bf16.gmra.mrb[8].mxu1 %vm5342_vm6, %v5285_v52 }
 0x3bf   : > { %5078 = vst [vmem:[#allocation6 + $0x30] sm:$0xff] %v5077_v16 }
 0x3c0   : > { %v4111_v22 = vld [vmem:[#allocation6 + $0x78] sm:$0xff] }
 0x3c1   : > { %v4876_v27 = vld [vmem:[#allocation6 + $0x50] sm:$0x80]  ;;  %v5228_v33 = vpop.permute.xlu1 %5227  ;;  %v5026_v37 = vpop.permute.xlu0 %5025 }
 0x3c2   : > { %v4877_v30 = vsel %vm8470_vm0, 0, %v4876_v27  ;;  %5270 = vst.msk [vmem:[#allocation6 + $0x30] sm:$0xff] %vm5263_vm13, %v5228_v33  ;;  %v5080_v2 = vsel %vm8580_vm8, %v5026_v37, %v5079_v17 }
 0x3c3   : > { %4878 = vst [vmem:[#allocation6 + $0x50] sm:$0x80] %v4877_v30  ;;  %5081 = vst [vmem:[#allocation6 + $0x38] sm:$0xff] %v5080_v2  ;;  %v4747_v56 = vld [vmem:[#allocation6 + $0x70] sm:$0xff] }
 0x3c5   : > { %v4879_v63 = vld [vmem:[#allocation6 + $0x58] sm:$0x80]  ;;  %v4683_v48 = vpop.permute.xlu1 %4682  ;;  %v5230_v26 = vpop.permute.xlu0 %5229 }
 0x3c6   : > { %v4880_v25 = vsel %vm8470_vm0, 0, %v4879_v63  ;;  %v4742_v4 = vsel %vm8422_vm15, %v4683_v48, %v4741_v45  ;;  %5271 = vst.msk [vmem:[#allocation6 + $0x38] sm:$0xff] %vm5263_vm13, %v5230_v26 }
 0x3c7   : > { %4881 = vst [vmem:[#allocation6 + $0x58] sm:$0x80] %v4880_v25  ;;  %4743 = vst [vmem:[#allocation6 + $0x60] sm:$0xff] %v4742_v4 }
 0x3c9   : > { %v4807_v62 = vpop.permute.xlu1 %4806  ;;  %v4685_v58 = vpop.permute.xlu0 %4684  ;;  %v5286_v61 = vld [vmem:[#allocation6 + $0x30] sm:$0xff] }
 0x3ca   : > { %4839 = vst.msk [vmem:[#allocation6 + $0x60] sm:$0xff] %vm4750_vm11, %v4807_v62  ;;  %v4745_v1 = vsel %vm8422_vm15, %v4685_v58, %v4744_v55  ;;  %6129 = vmatprep.mubr.msk.bf16.mxu1 %vm5342_vm6, %v5286_v61  ;;  %v5088_v13 = vld [vmem:[#allocation6 + $0x50] sm:$0xff] }
 0x3cb   : > { %4746 = vst [vmem:[#allocation6 + $0x68] sm:$0xff] %v4745_v1 }
 0x3cd   : > { %v5028_v10 = vpop.permute.xlu1 %5027  ;;  %v4809_v54 = vpop.permute.xlu0 %4808  ;;  %v5287_v11 = vld [vmem:[#allocation6 + $0x38] sm:$0xff] }
 0x3ce   : > { %v5083_v34 = vsel %vm8580_vm8, %v5028_v10, %v5082_v36  ;;  %4840 = vst.msk [vmem:[#allocation6 + $0x68] sm:$0xff] %vm4750_vm11, %v4809_v54  ;;  %6130 = vmatmul.mubr.msk.bf16.gmra.mrb[12].mxu1 %vm5342_vm6, %v5287_v11  ;;  %v5091_v19 = vld [vmem:[#allocation6 + $0x58] sm:$0xff] }
 0x3cf   : > { %5084 = vst [vmem:[#allocation6 + $0x40] sm:$0xff] %v5083_v34 }
 0x3d1   : > { %v4882_v38 = vld [vmem:[#allocation6 + $0x60] sm:$0x80]  ;;  %v5232_v6 = vpop.permute.xlu1 %5231  ;;  %v5030_v23 = vpop.permute.xlu0 %5029 }
 0x3d2   : > { %v4883_v51 = vsel %vm8470_vm0, 0, %v4882_v38  ;;  %5272 = vst.msk [vmem:[#allocation6 + $0x40] sm:$0xff] %vm5263_vm13, %v5232_v6  ;;  %v5086_v42 = vsel %vm8580_vm8, %v5030_v23, %v5085_v14 }
 0x3d3   : > { %4884 = vst [vmem:[#allocation6 + $0x60] sm:$0x80] %v4883_v51  ;;  %5087 = vst [vmem:[#allocation6 + $0x48] sm:$0xff] %v5086_v42 }
 0x3d5   : > { %v4885_v43 = vld [vmem:[#allocation6 + $0x68] sm:$0x80]  ;;  %v5234_v35 = vpop.permute.xlu1 %5233  ;;  %v4047_v9 = vpop.permute.xlu0 %4046 }
 0x3d6   : > { %v4886_v41 = vsel %vm8470_vm0, 0, %v4885_v43  ;;  %5273 = vst.msk [vmem:[#allocation6 + $0x48] sm:$0xff] %vm5263_vm13, %v5234_v35  ;;  %v4112_v32 = vsel %vm8103_vm10, %v4047_v9, %v4111_v22 }
 0x3d7   : > { %4887 = vst [vmem:[#allocation6 + $0x68] sm:$0x80] %v4886_v41  ;;  %4113 = vst [vmem:[#allocation6 + $0x78] sm:$0xff] %v4112_v32 }
 0x3d9   : > { %v4687_v46 = vpop.permute.xlu1 %4686  ;;  %v4177_v0 = vpop.permute.xlu0 %4176  ;;  %v5288_v53 = vld [vmem:[#allocation6 + $0x40] sm:$0xff] }
 0x3da   : > { %v4748_v50 = vsel %vm8422_vm15, %v4687_v46, %v4747_v56  ;;  %4210 = vst.msk [vmem:[#allocation6 + $0x78] sm:$0xff] %vm4194_vm12, %v4177_v0  ;;  %6133 = vmatprep.mubr.msk.bf16.mxu1 %vm5342_vm6, %v5288_v53  ;;  %v5094_v60 = vld [vmem:[#allocation6 + $0x60] sm:$0xff] }
 0x3db   : > { %4749 = vst [vmem:[#allocation6 + $0x70] sm:$0xff] %v4748_v50 }
 0x3dd   : > { %v5032_v20 = vpop.permute.xlu1 %5031  ;;  %v4811_v3 = vpop.permute.xlu0 %4810  ;;  %v5289_v59 = vld [vmem:[#allocation6 + $0x48] sm:$0xff] }
 0x3de   : > { %v5089_v7 = vsel %vm8580_vm8, %v5032_v20, %v5088_v13  ;;  %4841 = vst.msk [vmem:[#allocation6 + $0x70] sm:$0xff] %vm4750_vm11, %v4811_v3  ;;  %6134 = vmatmul.mubr.msk.bf16.gmra.mrb[16].mxu1 %vm5342_vm6, %v5289_v59  ;;  %v5097_v52 = vld [vmem:[#allocation6 + $0x68] sm:$0xff] }
 0x3df   : > { %5090 = vst [vmem:[#allocation6 + $0x50] sm:$0xff] %v5089_v7 }
 0x3e1   : > { %v4258_v8 = vld [vmem:[#allocation6 + $0x78] sm:$0x80]  ;;  %v5236_v44 = vpop.permute.xlu1 %5235  ;;  %v5034_v12 = vpop.permute.xlu0 %5033 }
 0x3e2   : > { %v4259_v24 = vsel %vm8166_vm2, 0, %v4258_v8  ;;  %5274 = vst.msk [vmem:[#allocation6 + $0x50] sm:$0xff] %vm5263_vm13, %v5236_v44  ;;  %v5092_v5 = vsel %vm8580_vm8, %v5034_v12, %v5091_v19 }
 0x3e3   : > { %4260 = vst [vmem:[#allocation6 + $0x78] sm:$0x80] %v4259_v24  ;;  %5093 = vst [vmem:[#allocation6 + $0x58] sm:$0xff] %v5092_v5 }
 0x3e5   : > { %v4888_v29 = vld [vmem:[#allocation6 + $0x70] sm:$0x80]  ;;  %v5036_v47 = vpop.permute.xlu1 %5035  ;;  %v5238_v18 = vpop.permute.xlu0 %5237 }
 0x3e6   : > { %v4889_v15 = vsel %vm8470_vm0, 0, %v4888_v29  ;;  %v5095_v28 = vsel %vm8580_vm8, %v5036_v47, %v5094_v60  ;;  %5275 = vst.msk [vmem:[#allocation6 + $0x58] sm:$0xff] %vm5263_vm13, %v5238_v18 }
 0x3e7   : > { %4890 = vst [vmem:[#allocation6 + $0x70] sm:$0x80] %v4889_v15  ;;  %5096 = vst [vmem:[#allocation6 + $0x60] sm:$0xff] %v5095_v28 }
 0x3e9   : > { %v5240_v49 = vpop.permute.xlu1 %5239  ;;  %v5038_v40 = vpop.permute.xlu0 %5037  ;;  %v5290_v16 = vld [vmem:[#allocation6 + $0x50] sm:$0xff] }
 0x3ea   : > { %5276 = vst.msk [vmem:[#allocation6 + $0x60] sm:$0xff] %vm5263_vm13, %v5240_v49  ;;  %v5098_v27 = vsel %vm8580_vm8, %v5038_v40, %v5097_v52  ;;  %6137 = vmatprep.mubr.msk.bf16.mxu1 %vm5342_vm6, %v5290_v16  ;;  %v4484_v33 = vld [vmem:[#allocation6 + $0x78] sm:$0xff] }
 0x3eb   : > { %5099 = vst [vmem:[#allocation6 + $0x68] sm:$0xff] %v5098_v27 }
 0x3ed   : > { %v4420_v21 = vpop.permute.xlu1 %4419  ;;  %v5242_v37 = vpop.permute.xlu0 %5241  ;;  %v5291_v17 = vld [vmem:[#allocation6 + $0x58] sm:$0xff] }
 0x3ee   : > { %v4485_v30 = vsel %vm8289_vm7, %v4420_v21, %v4484_v33  ;;  %5277 = vst.msk [vmem:[#allocation6 + $0x68] sm:$0xff] %vm5263_vm13, %v5242_v37  ;;  %6138 = vmatmul.mubr.msk.bf16.gmra.mrb[20].mxu1 %vm5342_vm6, %v5291_v17  ;;  %v5100_v63 = vld [vmem:[#allocation6 + $0x70] sm:$0xff] }
 0x3ef   : > { %4486 = vst [vmem:[#allocation6 + $0x78] sm:$0xff] %v4485_v30 }
 0x3f0   : > { %4489 = vst.msk [vmem:[#allocation6 + $0x78] sm:$0xff] %vm4488_vm14, %v6451_v57 }
 0x3f1   : > { %4751 = vst.msk [vmem:[#allocation6 + $0x78] sm:$0xff] %vm4750_vm11, %v6451_v57  ;;  %v5040_v2 = vpop.permute.xlu0 %5039  ;;  %v5292_v48 = vld [vmem:[#allocation6 + $0x60] sm:$0xff]  ;;  %v5244_v45 = vpop.permute.xlu1 %5243 }
 0x3f2   : > { %4843 = vst.msk [vmem:[#allocation6 + $0x78] sm:$0xff] %vm4842_vm3, %v6451_v57  ;;  %v5101_v39 = vsel %vm8580_vm8, %v5040_v2, %v5100_v63  ;;  %6141 = vmatprep.mubr.msk.bf16.mxu1 %vm5342_vm6, %v5292_v48  ;;  %v8743_v57 = vld [vmem:[%s8826_s4] ss:$0 sm:$0xff] }
 0x3f3   : > { %5102 = vst [vmem:[#allocation6 + $0x70] sm:$0xff] %v5101_v39 }
 0x3f4   : > { %5278 = vst.msk [vmem:[#allocation6 + $0x70] sm:$0xff] %vm5263_vm13, %v5244_v45 }
 0x3f5   : > { %v5293_v26 = vld [vmem:[#allocation6 + $0x68] sm:$0xff]  ;;  %v5246_v25 = vpop.permute.xlu0 %5245 }
 0x3f6   : > { %6142 = vmatmul.mubr.msk.bf16.gmra.mrb[24].mxu1 %vm5342_vm6, %v5293_v26  ;;  %5279 = vst.msk [vmem:[#allocation6 + $0x78] sm:$0xff] %vm5263_vm13, %v5246_v25 }
 0x3fb   : > { %v5294_v4 = vld [vmem:[#allocation6 + $0x70] sm:$0xff] }
 0x3fc   : > { %6145 = vmatprep.mubr.msk.bf16.mxu1 %vm5342_vm6, %v5294_v4 }
 0x3fd   : > { %v5295_v62 = vld [vmem:[#allocation6 + $0x78] sm:$0xff] }
 0x3fe   : > { %6146 = vmatmul.mubr.msk.bf16.gmra.mrb[28].mxu1 %vm5342_vm6, %v5295_v62 }
 0x465   : > { %v6119_v31 = vpop.f32.mrb[0].mxu1 }
 0x466   : > { %v5429_v58 = vpop.f32.mrb[1].mxu1  ;;  %v5438_v54 = vadd.f32 %v6119_v31, %v8743_v57 }
 0x467   : > { %v5430_v55 = vadd.f32 %v8743_v57, %v5429_v58  ;;  %v6120_v61 = vpop.f32.mrb[2].mxu1 }
 0x468   : > { %v5432_v1 = vpop.f32.mrb[3].mxu1  ;;  %v5558_v34 = vmax.f32 %v5438_v54, 0.0  ;;  %v5441_v38 = vadd.f32 %v6120_v61, %v8743_v57 }
 0x469   : > { %v5556_v10 = vmax.f32 %v5430_v55, 0.0  ;;  %v5433_v36 = vadd.f32 %v8743_v57, %v5432_v1 }
 0x46a   : > { %v5559_v6 = vmax.f32 %v5441_v38, 0.0 }
 0x46b   : > { %5588 = vxpose.xlu1.b32.start [1/16] (narrow) %v5556_v10, 8  ;;  %v5557_v11 = vmax.f32 %v5433_v36, 0.0 }
 0x46f   : > { %5589 = vxpose.xlu1.b32.cont [2/16] (narrow) %v5557_v11, 8 }
 0x473   : > { %5590 = vxpose.xlu1.b32.cont [3/16] (narrow) %v5558_v34, 8 }
 0x477   : > { %5591 = vxpose.xlu1.b32.cont [4/16] (narrow) %v5559_v6, 8 }
 0x479   : > { %v6123_v23 = vpop.f32.mrb[4].mxu1 }
 0x47a   : > { %v5445_v14 = vpop.f32.mrb[5].mxu1  ;;  %v5454_v22 = vadd.f32 %v6123_v23, %v8743_v57 }
 0x47b   : > { %v5446_v51 = vadd.f32 %v8743_v57, %v5445_v14  ;;  %v6124_v42 = vpop.f32.mrb[6].mxu1 }
 0x47c   : > { %v5448_v43 = vpop.f32.mrb[7].mxu1  ;;  %v5562_v32 = vmax.f32 %v5454_v22, 0.0  ;;  %v5457_v46 = vadd.f32 %v6124_v42, %v8743_v57 }
 0x47d   : > { %v5560_v35 = vmax.f32 %v5446_v51, 0.0  ;;  %v5449_v9 = vadd.f32 %v8743_v57, %v5448_v43 }
 0x47e   : > { %v5563_v56 = vmax.f32 %v5457_v46, 0.0 }
 0x47f   : > { %5592 = vxpose.xlu1.b32.cont [5/16] (narrow) %v5560_v35, 8  ;;  %v5561_v41 = vmax.f32 %v5449_v9, 0.0 }
 0x483   : > { %5593 = vxpose.xlu1.b32.cont [6/16] (narrow) %v5561_v41, 8 }
 0x487   : > { %5594 = vxpose.xlu1.b32.cont [7/16] (narrow) %v5562_v32, 8 }
 0x48b   : > { %5595 = vxpose.xlu1.b32.cont [8/16] (narrow) %v5563_v56, 8 }
 0x491   : > { %v6127_v0 = vpop.f32.mrb[8].mxu1 }
 0x492   : > { %v5461_v53 = vpop.f32.mrb[9].mxu1  ;;  %v5470_v7 = vadd.f32 %v6127_v0, %v8743_v57 }
 0x493   : > { %v5462_v50 = vadd.f32 %v8743_v57, %v5461_v53  ;;  %v6128_v20 = vpop.f32.mrb[10].mxu1 }
 0x494   : > { %v5464_v13 = vpop.f32.mrb[11].mxu1  ;;  %v5566_v44 = vmax.f32 %v5470_v7, 0.0  ;;  %v5473_v12 = vadd.f32 %v6128_v20, %v8743_v57 }
 0x495   : > { %v5564_v3 = vmax.f32 %v5462_v50, 0.0  ;;  %v5465_v59 = vadd.f32 %v8743_v57, %v5464_v13 }
 0x496   : > { %v5567_v19 = vmax.f32 %v5473_v12, 0.0 }
 0x497   : > { %5596 = vxpose.xlu1.b32.cont [9/16] (narrow) %v5564_v3, 8  ;;  %v5565_v8 = vmax.f32 %v5465_v59, 0.0 }
 0x49b   : > { %5597 = vxpose.xlu1.b32.cont [10/16] (narrow) %v5565_v8, 8 }
 0x49f   : > { %5598 = vxpose.xlu1.b32.cont [11/16] (narrow) %v5566_v44, 8 }
 0x4a1   : > { %v6131_v24 = vpop.f32.mrb[12].mxu1 }
 0x4a2   : > { %v5477_v5 = vpop.f32.mrb[13].mxu1  ;;  %v5486_v28 = vadd.f32 %v6131_v24, %v8743_v57 }
 0x4a3   : > { %v5478_v29 = vadd.f32 %v8743_v57, %v5477_v5  ;;  %v6132_v47 = vpop.f32.mrb[14].mxu1  ;;  %5599 = vxpose.xlu1.b32.cont [12/16] (narrow) %v5567_v19, 8 }
 0x4a4   : > { %v5480_v60 = vpop.f32.mrb[15].mxu1  ;;  %v5570_v40 = vmax.f32 %v5486_v28, 0.0  ;;  %v5489_v52 = vadd.f32 %v6132_v47, %v8743_v57 }
 0x4a5   : > { %v5568_v18 = vmax.f32 %v5478_v29, 0.0  ;;  %v5481_v15 = vadd.f32 %v8743_v57, %v5480_v60 }
 0x4a6   : > { %v5571_v16 = vmax.f32 %v5489_v52, 0.0 }
 0x4a7   : > { %5600 = vxpose.xlu1.b32.cont [13/16] (narrow) %v5568_v18, 8  ;;  %v5569_v49 = vmax.f32 %v5481_v15, 0.0 }
 0x4ab   : > { %5601 = vxpose.xlu1.b32.cont [14/16] (narrow) %v5569_v49, 8 }
 0x4af   : > { %5602 = vxpose.xlu1.b32.cont [15/16] (narrow) %v5570_v40, 8 }
 0x4b1   : > { %v6135_v27 = vpop.f32.mrb[16].mxu1 }
 0x4b2   : > { %v5493_v21 = vpop.f32.mrb[17].mxu1  ;;  %v5502_v63 = vadd.f32 %v6135_v27, %v8743_v57 }
 0x4b3   : > { %v5494_v33 = vadd.f32 %v8743_v57, %v5493_v21  ;;  %v6136_v37 = vpop.f32.mrb[18].mxu1  ;;  %5603 = vxpose.xlu1.b32.end [16/16] (narrow) %v5571_v16, 8 }
 0x4b4   : > { %v5496_v17 = vpop.f32.mrb[19].mxu1  ;;  %v5574_v45 = vmax.f32 %v5502_v63, 0.0  ;;  %v5505_v39 = vadd.f32 %v6136_v37, %v8743_v57 }
 0x4b5   : > { %v5572_v30 = vmax.f32 %v5494_v33, 0.0  ;;  %v5497_v2 = vadd.f32 %v8743_v57, %v5496_v17 }
 0x4b6   : > { %v5575_v26 = vmax.f32 %v5505_v39, 0.0 }
 0x4b7   : > { %5620 = vxpose.xlu0.b32.start [1/16] (narrow) %v5572_v30, 8  ;;  %v5573_v48 = vmax.f32 %v5497_v2, 0.0 }
 0x4bb   : > { %5621 = vxpose.xlu0.b32.cont [2/16] (narrow) %v5573_v48, 8 }
 0x4bf   : > { %5622 = vxpose.xlu0.b32.cont [3/16] (narrow) %v5574_v45, 8 }
 0x4c1   : > { %v6139_v25 = vpop.f32.mrb[20].mxu1 }
 0x4c2   : > { %v5509_v4 = vpop.f32.mrb[21].mxu1  ;;  %v5518_v1 = vadd.f32 %v6139_v25, %v8743_v57 }
 0x4c3   : > { %v5510_v62 = vadd.f32 %v8743_v57, %v5509_v4  ;;  %v6140_v31 = vpop.f32.mrb[22].mxu1  ;;  %5623 = vxpose.xlu0.b32.cont [4/16] (narrow) %v5575_v26, 8 }
 0x4c4   : > { %v5512_v58 = vpop.f32.mrb[23].mxu1  ;;  %v5578_v38 = vmax.f32 %v5518_v1, 0.0  ;;  %v5521_v6 = vadd.f32 %v6140_v31, %v8743_v57 }
 0x4c5   : > { %v5576_v55 = vmax.f32 %v5510_v62, 0.0  ;;  %v5513_v61 = vadd.f32 %v8743_v57, %v5512_v58 }
 0x4c6   : > { %v5579_v14 = vmax.f32 %v5521_v6, 0.0 }
 0x4c7   : > { %5624 = vxpose.xlu0.b32.cont [5/16] (narrow) %v5576_v55, 8  ;;  %v5577_v10 = vmax.f32 %v5513_v61, 0.0 }
 0x4c9   : > { %v6143_v36 = vpop.f32.mrb[24].mxu1 }
 0x4ca   : > { %v5525_v54 = vpop.f32.mrb[25].mxu1  ;;  %v5534_v41 = vadd.f32 %v6143_v36, %v8743_v57 }
 0x4cb   : > { %5625 = vxpose.xlu0.b32.cont [6/16] (narrow) %v5577_v10, 8  ;;  %v6144_v11 = vpop.f32.mrb[26].mxu1  ;;  %v5526_v23 = vadd.f32 %v8743_v57, %v5525_v54 }
 0x4cc   : > { %v5528_v34 = vpop.f32.mrb[27].mxu1  ;;  %v5582_v46 = vmax.f32 %v5534_v41, 0.0  ;;  %v5537_v56 = vadd.f32 %v6144_v11, %v8743_v57 }
 0x4cd   : > { %v5580_v43 = vmax.f32 %v5526_v23, 0.0  ;;  %v5529_v22 = vadd.f32 %v8743_v57, %v5528_v34 }
 0x4ce   : > { %v5583_v53 = vmax.f32 %v5537_v56, 0.0 }
 0x4cf   : > { %5626 = vxpose.xlu0.b32.cont [7/16] (narrow) %v5578_v38, 8  ;;  %v5581_v32 = vmax.f32 %v5529_v22, 0.0 }
 0x4d1   : > { %v6147_v51 = vpop.f32.mrb[28].mxu1 }
 0x4d2   : > { %v5541_v42 = vpop.f32.mrb[29].mxu1  ;;  %v5550_v13 = vadd.f32 %v6147_v51, %v8743_v57 }
 0x4d3   : > { %5627 = vxpose.xlu0.b32.cont [8/16] (narrow) %v5579_v14, 8  ;;  %v6148_v35 = vpop.f32.mrb[30].mxu1  ;;  %v5542_v0 = vadd.f32 %v8743_v57, %v5541_v42 }
 0x4d4   : > { %v5544_v9 = vpop.f32.mrb[31].mxu1  ;;  %v5586_v59 = vmax.f32 %v5550_v13, 0.0  ;;  %v5553_v7 = vadd.f32 %v6148_v35, %v8743_v57 }
 0x4d5   : > { %v5584_v50 = vmax.f32 %v5542_v0, 0.0  ;;  %v5545_v20 = vadd.f32 %v8743_v57, %v5544_v9 }
 0x4d6   : > { %v5587_v8 = vmax.f32 %v5553_v7, 0.0 }
 0x4d7   : > { %5628 = vxpose.xlu0.b32.cont [9/16] (narrow) %v5580_v43, 8  ;;  %v5585_v3 = vmax.f32 %v5545_v20, 0.0 }
 0x4db   : > { %5629 = vxpose.xlu0.b32.cont [10/16] (narrow) %v5581_v32, 8 }
 0x4df   : > { %5630 = vxpose.xlu0.b32.cont [11/16] (narrow) %v5582_v46, 8 }
 0x4e3   : > { %5631 = vxpose.xlu0.b32.cont [12/16] (narrow) %v5583_v53, 8 }
 0x4e7   : > { %5632 = vxpose.xlu0.b32.cont [13/16] (narrow) %v5584_v50, 8 }
 0x4eb   : > { %5633 = vxpose.xlu0.b32.cont [14/16] (narrow) %v5585_v3, 8 }
 0x4ef   : > { %5634 = vxpose.xlu0.b32.cont [15/16] (narrow) %v5586_v59, 8 }
 0x4f3   : > { %5635 = vxpose.xlu0.b32.end [16/16] (narrow) %v5587_v8, 8 }
 0x4f7   : > { %v5604_v44 = vpop.trf.xlu1 }
 0x4f8   : > { %5652 = vst [vmem:[%s6546_s12] sm:$0xff] %v5604_v44 }
 0x537   : > { %v5636_v12 = vpop.trf.xlu0 }
 0x538   : > { %5653 = vst [vmem:[%s6546_s12 + $0x8] sm:$0xff] %v5636_v12 }
 0x539   : > { %6387 = shalt.err (!%p6384_p3)
}
 0x53a   : > { %s6388_s22 = scalar_lea.hbm %s8783_s8, 256  ;;  %s6392_s15 = scalar_lea.hbm %s8827_s5, 512 }
 0x53b   : > { %p6389_p4 = scmp.ne.s32.totalorder %s8783_s8, %s6388_s22  ;;  %p6393_p9 = scmp.lt.u32.totalorder %s8783_s8, %s8827_s5 }
 0x53c   : > { %p6394_p10 = scmp.lt.u32.totalorder %s6392_s15, %s6388_s22  ;;  %p6396_p12 = scmp.lt.u32.totalorder %s6388_s22, %s8783_s8 }
 0x53d   : > { %p6390_p7 = pnand %p6389_p4, %p6526_p5 }
 0x53e   : > { %p6395_p11 = por %p6394_p10, %p6393_p9 }
 0x53f   : > { %p6391_p8 = pneg %p6390_p7 }
 0x540   : > { %p6397_p13 = por %p6396_p12, %p6395_p11 }
 0x542   : > { %p6398_p0 = pnand %p6397_p13, %p6391_p8 }
 0x544   : > { %6401 = shalt.err (!%p6398_p0)
}
 0x545   : > { %6151 = dma.vmem_to_hbm [thread:$0]  (%p6526_p5), %s5670_s9, 256, %s8783_s8, %s5655_s17  }
 0x546 PF: > { %p6157_p1 = scmp.ge.s32.totalorder %s6436_s21, 2  ;;  %s5681_s25 = sand.u32 1, %s6424_s18  }
 0x547   : > { %s5682_s26 = scalar_lea.sflag [#allocation4], %s5681_s25 }
 0x548   : > { %p6154_p2 = pnand %p6157_p1, %p6530_p6 }
 0x54a   : > { %6419 = dma.done.wait (!%p6154_p2), %s5682_s26, 256  }
 0x54b   : > { %6421 = vsyncadd (!%p6154_p2), %s5682_s26, 4294967040  ;;  %p15_p3 = scmp.ge.s32.totalorder %s6513_s24, 4   ;;  %s8890_s18 = smov %s6428_s19 }
 0x54c   : > { %s8891_s19 = smov %s6432_s20  ;;  %s8892_s20 = smov %s6524_s27 }
 0x54d   : > { %s8893_s21 = smov %s6513_s24  ;;  %17 = sbr.rel (!%p15_p3) target bundleno = 3 (0x3), region = 83 }
 0x554   :  { %5687 = vsyncpa [#allocation4], 1 }
 0x555   :  { %5689 = vsyncpa [#allocation4 + $0x1], 1 }

</bundles_post_ra>
